<compile_context>
chip_gen: v5e
topology: v5e:2x2
jax: 0.10.0
libtpu: 0.0.40
codegen_flags: <defaults>
</compile_context>

<pallas_src>
import functools

import jax
import jax.numpy as jnp
from jax.experimental import pallas as pl
from jax.experimental.pallas import tpu as pltpu

# Raised scoped-VMEM limit (defaults are ~16/32 MiB on v5e/v6e) while staying
# under v7x's 64 MiB physical VMEM so one setting is safe on all three chips.
_VMEM_LIMIT_BYTES = 48 * 1024 * 1024


def _round_up(x, m):
    return ((x + m - 1) // m) * m


def _pad_rows(x, n_rows):
    pad = n_rows - x.shape[0]
    if pad == 0:
        return x
    return jnp.pad(x, ((0, pad),) + ((0, 0),) * (x.ndim - 1))


# ----------------------------------------------------------------------------
# Stage 1: batched input->gate projection (parallel over row tiles, bf16 out)
# ----------------------------------------------------------------------------
def _input_proj_kernel(x_ref, wi_ref, bi_ref, gx_ref):
    # x: [RT, E] bf16, wi: [E, GP] bf16, bi: [1, GP] f32 -> gx: [RT, GP] bf16
    gx_ref[...] = (
        jnp.dot(x_ref[...], wi_ref[...], preferred_element_type=jnp.float32)
        + bi_ref[...]
    ).astype(jnp.bfloat16)


def _input_projection(x_flat, wi, bi):
    n, e = x_flat.shape
    gp = wi.shape[1]
    row_tile = min(_round_up(n, 16), 512)   # 16-row granule for bf16 output
    n_pad = _round_up(n, row_tile)
    xp = _pad_rows(x_flat, n_pad)
    out = pl.pallas_call(
        _input_proj_kernel,
        out_shape=jax.ShapeDtypeStruct((n_pad, gp), jnp.bfloat16),
        grid=(n_pad // row_tile,),
        in_specs=[
            pl.BlockSpec((row_tile, e), lambda i: (i, 0)),
            pl.BlockSpec((e, gp), lambda i: (0, 0)),
            pl.BlockSpec((1, gp), lambda i: (0, 0)),
        ],
        out_specs=pl.BlockSpec((row_tile, gp), lambda i: (i, 0)),
        compiler_params=pltpu.CompilerParams(
            dimension_semantics=("parallel",),
            vmem_limit_bytes=_VMEM_LIMIT_BYTES),
    )(xp, wi, bi)
    return out[:n]


# ----------------------------------------------------------------------------
# Stage 2: GRU recurrence, streamed over time chunks, batch-split across TCs
# ----------------------------------------------------------------------------
def _gru_recurrence_kernel(gx_ref, h0_ref, wh_ref, bh_ref, h_out_ref, h_carry,
                           *, chunk, hidden):
    hd = hidden
    tj = pl.program_id(1)

    # (re)initialize the carried hidden state at the start of each batch slab
    @pl.when(tj == 0)
    def _():
        h_carry[...] = h0_ref[...]

    # hoist loop-invariant weight load + bias broadcast off the serial path
    wh = wh_ref[...]                                              # [H, GP] bf16
    bsz = h_carry.shape[0]
    bh = jnp.broadcast_to(bh_ref[...], (bsz, bh_ref.shape[-1]))   # [B, GP] f32

    def step(t, h_prev):
        gx = gx_ref[t].astype(jnp.float32)                        # [B, GP]
        gh = jnp.dot(h_prev.astype(jnp.bfloat16), wh,
                     preferred_element_type=jnp.float32) + bh
        # PyTorch nn.GRU gate order: r, z, n
        r = jax.nn.sigmoid(gx[:, 0:hd] + gh[:, 0:hd])
        zg = jax.nn.sigmoid(gx[:, hd:2 * hd] + gh[:, hd:2 * hd])
        n = jnp.tanh(gx[:, 2 * hd:3 * hd] + r * gh[:, 2 * hd:3 * hd])
        h_new = n + zg * (h_prev - n)                 # == (1-z)*n + z*h_prev
        h_out_ref[t] = h_new.astype(jnp.bfloat16)
        return h_new

    h_final = jax.lax.fori_loop(0, chunk, step, h_carry[...],
                                unroll=min(chunk, 8))
    h_carry[...] = h_final


def _gru_recurrence(gx_tbg, h0, wh, bh, *, t_chunk):
    t_pad, b, gp = gx_tbg.shape
    hd = h0.shape[1]
    # Split the batch across the two v7x TensorCores when the split keeps the
    # bf16 block sublane dim a multiple of 16 (harmless serial loop on v5e/v6e).
    nb = 2 if b % 32 == 0 else 1
    b_split = b // nb
    nt = t_pad // t_chunk
    kernel = functools.partial(_gru_recurrence_kernel, chunk=t_chunk, hidden=hd)
    # NOTE: pl.Buffered(1) on the constant-index blocks (h0/wh/bh) would halve
    # their double-buffered VMEM footprint; omitted for compatibility (tiny here).
    return pl.pallas_call(
        kernel,
        out_shape=jax.ShapeDtypeStruct((t_pad, b, hd), jnp.bfloat16),
        grid=(nb, nt),
        in_specs=[
            pl.BlockSpec((t_chunk, b_split, gp), lambda bi, tj: (tj, bi, 0)),
            pl.BlockSpec((b_split, hd), lambda bi, tj: (bi, 0)),
            pl.BlockSpec((hd, gp), lambda bi, tj: (0, 0)),
            pl.BlockSpec((1, gp), lambda bi, tj: (0, 0)),
        ],
        out_specs=pl.BlockSpec((t_chunk, b_split, hd),
                               lambda bi, tj: (tj, bi, 0)),
        scratch_shapes=[pltpu.VMEM((b_split, hd), jnp.float32)],
        compiler_params=pltpu.CompilerParams(
            dimension_semantics=("parallel", "arbitrary"),
            vmem_limit_bytes=_VMEM_LIMIT_BYTES),
    )(gx_tbg, h0, wh, bh)


# ----------------------------------------------------------------------------
# Stage 3: vocab-tiled output projection + two-pass (online LSE) log_softmax
# ----------------------------------------------------------------------------
def _lse_kernel(h_ref, w_ref, b_ref, lse_ref, m_sc, l_sc):
    j = pl.program_id(1)

    @pl.when(j == 0)
    def _():
        m_sc[...] = jnp.full(m_sc.shape, -jnp.inf, jnp.float32)
        l_sc[...] = jnp.zeros(l_sc.shape, jnp.float32)

    logits = (jnp.dot(h_ref[...], w_ref[...],
                      preferred_element_type=jnp.float32) + b_ref[...])
    m_prev = m_sc[...]
    m_new = jnp.maximum(m_prev, jnp.max(logits, axis=-1, keepdims=True))
    l_sc[...] = (l_sc[...] * jnp.exp(m_prev - m_new)
                 + jnp.sum(jnp.exp(logits - m_new), axis=-1, keepdims=True))
    m_sc[...] = m_new

    @pl.when(j == pl.num_programs(1) - 1)
    def _():
        lse_ref[...] = m_sc[...] + jnp.log(l_sc[...])


def _logp_kernel(h_ref, w_ref, b_ref, lse_ref, out_ref):
    out_ref[...] = (jnp.dot(h_ref[...], w_ref[...],
                            preferred_element_type=jnp.float32)
                    + b_ref[...] - lse_ref[...])


def _output_projection(h_flat, wout, bout):
    n, hd = h_flat.shape
    vp = wout.shape[1]
    v_tile = next(c for c in (512, 256, 128) if vp % c == 0)
    row_tile = min(_round_up(n, 16), 512)
    n_pad = _round_up(n, row_tile)
    hp = _pad_rows(h_flat, n_pad)
    n_rows = n_pad // row_tile
    n_vt = vp // v_tile

    # pass A: per-row log-sum-exp, streaming vocab tiles with running max/sum
    lse = pl.pallas_call(
        _lse_kernel,
        out_shape=jax.ShapeDtypeStruct((n_pad, 1), jnp.float32),
        grid=(n_rows, n_vt),
        in_specs=[
            pl.BlockSpec((row_tile, hd), lambda i, j: (i, 0)),
            pl.BlockSpec((hd, v_tile), lambda i, j: (0, j)),
            pl.BlockSpec((1, v_tile), lambda i, j: (0, j)),
        ],
        out_specs=pl.BlockSpec((row_tile, 1), lambda i, j: (i, 0)),
        scratch_shapes=[pltpu.VMEM((row_tile, 1), jnp.float32),
                        pltpu.VMEM((row_tile, 1), jnp.float32)],
        compiler_params=pltpu.CompilerParams(
            dimension_semantics=("parallel", "arbitrary"),
            vmem_limit_bytes=_VMEM_LIMIT_BYTES),
    )(hp, wout, bout)

    # pass B: recompute each logits tile and normalize; output stores are
    # lane-dense 128-multiples, and no [N, VP] f32 logits tensor hits HBM.
    out = pl.pallas_call(
        _logp_kernel,
        out_shape=jax.ShapeDtypeStruct((n_pad, vp), jnp.float32),
        grid=(n_rows, n_vt),
        in_specs=[
            pl.BlockSpec((row_tile, hd), lambda i, j: (i, 0)),
            pl.BlockSpec((hd, v_tile), lambda i, j: (0, j)),
            pl.BlockSpec((1, v_tile), lambda i, j: (0, j)),
            pl.BlockSpec((row_tile, 1), lambda i, j: (i, 0)),
        ],
        out_specs=pl.BlockSpec((row_tile, v_tile), lambda i, j: (i, j)),
        compiler_params=pltpu.CompilerParams(
            dimension_semantics=("parallel", "parallel"),
            vmem_limit_bytes=_VMEM_LIMIT_BYTES),
    )(hp, wout, bout, lse)
    return out[:n]


# ----------------------------------------------------------------------------
# pack_padded_sequence row order, built with vectorized jnp (no host sync)
# ----------------------------------------------------------------------------
def _packed_row_indices(lengths_sorted, seq_len, batch, n_packed):
    t_iota = jax.lax.broadcasted_iota(jnp.int32, (seq_len, batch), 0)
    valid = t_iota < lengths_sorted[None, :]                  # [T, B]
    # stable argsort: valid (t, b) positions first, in t-major/b-minor order
    order = jnp.argsort((~valid).reshape(-1).astype(jnp.int32))
    return order[:n_packed]


# ----------------------------------------------------------------------------
# Decoder.forward equivalent (jittable; n_packed = sum(lengths) is static)
# ----------------------------------------------------------------------------
@functools.partial(jax.jit, static_argnames=("n_packed", "t_chunk"))
def decoder_forward(input_sequence, input_length, hx, z, params, *,
                    n_packed, t_chunk=16):
    batch, seq_len = input_sequence.shape
    hidden = hx.shape[-1] + z.shape[-1]
    vocab = params["embedding"].shape[0]

    # sort by length, descending (pack_padded_sequence requirement).
    # NOTE: jnp.argsort is stable; torch.sort(descending=True) is not, so
    # equal-length sequences may be packed in a different (valid) order.
    order = jnp.argsort(-input_length)
    lengths_sorted = input_length[order]
    h0 = jnp.concatenate([hx[order], z[order]], axis=-1).astype(jnp.float32)
    seq_sorted = input_sequence[order]

    # time-chunk padding: pad the tiny int32 index matrix, not a big tensor
    tc = max(1, min(t_chunk, seq_len))
    t_pad = _round_up(seq_len, tc)
    idx_tm = jnp.pad(seq_sorted.T, ((0, t_pad - seq_len), (0, 0)))  # [T_pad, B]

    # embedding lookup directly in [T, B, E] order (no HBM transpose of the
    # embedded tensor).  Word dropout is identity in eval mode.
    # TODO(synk): training-mode nn.Dropout(word_dropout) is not implemented.
    emb_tm = jnp.take(params["embedding"], idx_tm, axis=0)      # [T_pad, B, E]

    # Stage 1: batched input->gate projection (bf16 gx, halves HBM traffic)
    gx = _input_projection(emb_tm.reshape(t_pad * batch, -1),
                           params["wi_3h"], params["bi_3h"])
    gx_tm = gx.reshape(t_pad, batch, -1)

    # Stage 2: sequential GRU recurrence (streamed time chunks, bf16 h_all)
    h_all = _gru_recurrence(gx_tm, h0, params["wh_3h"], params["bh_3h"],
                            t_chunk=tc)

    # gather packed rows BEFORE the vocab projection: Stage 3 only touches
    # the n_packed rows instead of all T*B rows.
    pack_idx = _packed_row_indices(lengths_sorted, seq_len, batch, n_packed)
    h_packed = h_all.reshape(t_pad * batch, hidden)[pack_idx]   # [N, H] bf16

    # Stage 3: vocab-tiled projection + two-pass log_softmax, lane-dense out
    logp = _output_projection(h_packed, params["wout"], params["bout"])
    return logp[:, :vocab]


# ----------------------------------------------------------------------------
# Pure-JAX reference (same fused params / dtype flow) for correctness check
# ----------------------------------------------------------------------------
def reference_forward(input_sequence, input_length, hx, z, params, *, n_packed):
    batch, seq_len = input_sequence.shape
    hd = hx.shape[-1] + z.shape[-1]
    vocab = params["embedding"].shape[0]

    order = jnp.argsort(-input_length)
    lengths_sorted = input_length[order]
    h = jnp.concatenate([hx[order], z[order]], axis=-1).astype(jnp.float32)
    seq_sorted = input_sequence[order]

    emb_tm = jnp.take(params["embedding"], seq_sorted.T, axis=0)  # [T, B, E]

    hs = []
    for t in range(seq_len):
        gx = (jnp.dot(emb_tm[t], params["wi_3h"],
                      preferred_element_type=jnp.float32) + params["bi_3h"])
        gx = gx.astype(jnp.bfloat16).astype(jnp.float32)      # match bf16 gx
        gh = jnp.dot(h.astype(jnp.bfloat16), params["wh_3h"],
                     preferred_element_type=jnp.float32) + params["bh_3h"]
        r = jax.nn.sigmoid(gx[:, 0:hd] + gh[:, 0:hd])
        zg = jax.nn.sigmoid(gx[:, hd:2 * hd] + gh[:, hd:2 * hd])
        n = jnp.tanh(gx[:, 2 * hd:3 * hd] + r * gh[:, 2 * hd:3 * hd])
        h = n + zg * (h - n)
        hs.append(h.astype(jnp.bfloat16))                     # match bf16 h_all
    h_all = jnp.stack(hs, axis=0)                             # [T, B, H] bf16

    idx = _packed_row_indices(lengths_sorted, seq_len, batch, n_packed)
    h_packed = h_all.reshape(seq_len * batch, hd)[idx]
    logits = (jnp.dot(h_packed, params["wout"],
                      preferred_element_type=jnp.float32) + params["bout"])
    return jax.nn.log_softmax(logits, axis=-1)[:, :vocab]


# ----------------------------------------------------------------------------
# Deterministic parameter construction (synthetic, shapes from __init__)
# ----------------------------------------------------------------------------
def make_params(key, vocab_size, embedding_size, hidden_size, latent_size):
    h = hidden_size + latent_size
    gp = _round_up(3 * h, 128)       # lane-dense fused gate width (r|z|n|pad)
    vp = _round_up(vocab_size, 128)  # lane-dense padded vocab
    ks = jax.random.split(key, 7)
    s = 0.1

    def pad_cols(w, target):
        return jnp.pad(w, ((0, 0), (0, target - w.shape[1])))

    emb = jax.random.normal(ks[0], (vocab_size, embedding_size), jnp.float32)
    wi = s * jax.random.normal(ks[1], (embedding_size, 3 * h), jnp.float32)
    bi = s * jax.random.normal(ks[2], (1, 3 * h), jnp.float32)   # b_ir|b_iz|b_in
    wh = s * jax.random.normal(ks[3], (h, 3 * h), jnp.float32)
    bh = s * jax.random.normal(ks[4], (1, 3 * h), jnp.float32)   # b_hr|b_hz|b_hn
    wout = s * jax.random.normal(ks[5], (h, vocab_size), jnp.float32)
    bout = s * jax.random.normal(ks[6], (1, vocab_size), jnp.float32)

    neg = jnp.full((1, vp - vocab_size), -1e30, jnp.float32)     # mask padded vocab cols
    return {
        "embedding": emb.astype(jnp.bfloat16),
        "wi_3h": pad_cols(wi, gp).astype(jnp.bfloat16),
        "bi_3h": pad_cols(bi, gp).astype(jnp.float32),
        "wh_3h": pad_cols(wh, gp).astype(jnp.bfloat16),
        "bh_3h": pad_cols(bh, gp).astype(jnp.float32),
        "wout": pad_cols(wout, vp).astype(jnp.bfloat16),
        "bout": jnp.concatenate([bout, neg], axis=1).astype(jnp.float32),
    }


if __name__ == "__main__":
    # Small shapes chosen so every optimized path is exercised:
    #   vocab 160 -> padded 256 -> 2 vocab tiles (tiled log-softmax)
    #   batch 32  -> 2-way batch split in the recurrence (megacore path)
    #   seq 12, t_chunk 4 -> 3 streamed time chunks
    vocab_size = 160
    embedding_size = 32
    hidden_size = 24
    latent_size = 8
    batch = 32
    seq_len = 12

    key = jax.random.PRNGKey(0)
    k_par, k_seq, k_len, k_hx, k_z = jax.random.split(key, 5)

    params = make_params(k_par, vocab_size, embedding_size, hidden_size, latent_size)

    input_sequence = jax.random.randint(k_seq, (batch, seq_len), 0, vocab_size,
                                        dtype=jnp.int32)
    input_length = jax.random.randint(k_len, (batch,), 1, seq_len + 1,
                                      dtype=jnp.int32)
    hx = jax.random.normal(k_hx, (batch, hidden_size), jnp.float32)
    z = jax.random.normal(k_z, (batch, latent_size), jnp.float32)

    n_packed = int(jnp.sum(input_length))

    log_probs = decoder_forward(input_sequence, input_length, hx, z, params,
                                n_packed=n_packed, t_chunk=4)
    log_probs = jax.block_until_ready(log_probs)

    # sanity: packed row count, normalized log-probs, match pure-JAX reference
    assert log_probs.shape == (n_packed, vocab_size), log_probs.shape
    assert bool(jnp.all(jnp.isfinite(log_probs)))
    row_sums = jnp.sum(jnp.exp(log_probs), axis=-1)
    assert bool(jnp.all(jnp.abs(row_sums - 1.0) < 1e-3))

    ref = reference_forward(input_sequence, input_length, hx, z, params,
                            n_packed=n_packed)
    max_err = float(jnp.max(jnp.abs(log_probs - ref)))
    assert max_err < 1e-2, f"max abs err vs reference: {max_err}"

    print("KERNEL_OK")
</pallas_src>

<mosaic_0001>
module attributes {stable_mosaic.version = 11 : i64} {
  func.func @_input_proj_kernel(%arg0: i32, %arg1: memref<384x32xbf16, #tpu.memory_space<vmem>>, %arg2: memref<32x128xbf16, #tpu.memory_space<vmem>>, %arg3: memref<1x128xf32, #tpu.memory_space<vmem>>, %arg4: memref<384x128xbf16, #tpu.memory_space<vmem>>) attributes {dimension_semantics = [#tpu.dimension_semantics<parallel>], iteration_bounds = array<i64: 1>, scalar_prefetch = 0 : i64, scratch_operands = 0 : i64, tpu.core_type = #tpu.core_type<tc>, window_params = [{transform_indices = @transform_0, window_bounds = array<i64: 384, 32>}, {pipeline_mode = #tpu.pipeline_mode<synchronous>, transform_indices = @transform_1, window_bounds = array<i64: 32, 128>}, {pipeline_mode = #tpu.pipeline_mode<synchronous>, transform_indices = @transform_2, window_bounds = array<i64: 1, 128>}, {transform_indices = @transform_3, window_bounds = array<i64: 384, 128>}]} {
    %c0 = arith.constant 0 : index
    %c0_0 = arith.constant 0 : index
    %0 = vector.load %arg1[%c0, %c0_0] : memref<384x32xbf16, #tpu.memory_space<vmem>>, vector<384x32xbf16>
    %c0_1 = arith.constant 0 : index
    %c0_2 = arith.constant 0 : index
    %1 = vector.load %arg2[%c0_1, %c0_2] : memref<32x128xbf16, #tpu.memory_space<vmem>>, vector<32x128xbf16>
    %cst = arith.constant dense<0.000000e+00> : vector<384x128xf32>
    %2 = tpu.matmul %0, %1, %cst {dimension_numbers = #tpu.dot_dimension_numbers<[1], [0], [0], [1], [0, 0, 1, 1], [], []>} : vector<384x32xbf16>, vector<32x128xbf16>, vector<384x128xf32> -> vector<384x128xf32>
    %c0_3 = arith.constant 0 : index
    %c0_4 = arith.constant 0 : index
    %3 = vector.load %arg3[%c0_3, %c0_4] : memref<1x128xf32, #tpu.memory_space<vmem>>, vector<1x128xf32>
    %4 = vector.broadcast %3 : vector<1x128xf32> to vector<384x128xf32>
    %5 = arith.addf %2, %4 : vector<384x128xf32>
    %6 = arith.truncf %5 : vector<384x128xf32> to vector<384x128xbf16>
    %c0_5 = arith.constant 0 : index
    %c0_6 = arith.constant 0 : index
    %7 = vector.load %arg4[%c0_5, %c0_6] : memref<384x128xbf16, #tpu.memory_space<vmem>>, vector<384x128xbf16>
    tpu.vector_store %arg4[%c0_5, %c0_6], %6 {strides = array<i32>} : memref<384x128xbf16, #tpu.memory_space<vmem>>, vector<384x128xbf16>,
    return
  }
  func.func @transform_0(%arg0: i32) -> (i32, i32) {
    %c0_i32 = arith.constant 0 : i32
    %c0_i32_0 = arith.constant 0 : i32
    return %arg0, %c0_i32 : i32, i32
  }
  func.func @transform_1(%arg0: i32) -> (i32, i32) {
    %c0_i32 = arith.constant 0 : i32
    %c0_i32_0 = arith.constant 0 : i32
    %c0_i32_1 = arith.constant 0 : i32
    return %c0_i32, %c0_i32_0 : i32, i32
  }
  func.func @transform_2(%arg0: i32) -> (i32, i32) {
    %c0_i32 = arith.constant 0 : i32
    %c0_i32_0 = arith.constant 0 : i32
    %c0_i32_1 = arith.constant 0 : i32
    return %c0_i32, %c0_i32_0 : i32, i32
  }
  func.func @transform_3(%arg0: i32) -> (i32, i32) {
    %c0_i32 = arith.constant 0 : i32
    %c0_i32_0 = arith.constant 0 : i32
    return %arg0, %c0_i32 : i32, i32
  }
}

module attributes {stable_mosaic.version = 11 : i64} {
  func.func @_gru_recurrence_kernel(%arg0: i32, %arg1: i32, %arg2: memref<4x16x128xbf16, #tpu.memory_space<vmem>>, %arg3: memref<16x32xf32, #tpu.memory_space<vmem>>, %arg4: memref<32x128xbf16, #tpu.memory_space<vmem>>, %arg5: memref<1x128xf32, #tpu.memory_space<vmem>>, %arg6: memref<4x16x32xbf16, #tpu.memory_space<vmem>>, %arg7: memref<16x32xf32, #tpu.memory_space<vmem>>) attributes {dimension_semantics = [#tpu.dimension_semantics<parallel>, #tpu.dimension_semantics<arbitrary>], iteration_bounds = array<i64: 2, 3>, scalar_prefetch = 0 : i64, scratch_operands = 1 : i64, tpu.core_type = #tpu.core_type<tc>, window_params = [{transform_indices = @transform_0, window_bounds = array<i64: 4, 16, 128>}, {transform_indices = @transform_1, window_bounds = array<i64: 16, 32>}, {pipeline_mode = #tpu.pipeline_mode<synchronous>, transform_indices = @transform_2, window_bounds = array<i64: 32, 128>}, {pipeline_mode = #tpu.pipeline_mode<synchronous>, transform_indices = @transform_3, window_bounds = array<i64: 1, 128>}, {transform_indices = @transform_4, window_bounds = array<i64: 4, 16, 32>}]} {
    %c0_i32 = arith.constant 0 : i32
    %0 = arith.cmpi eq, %arg1, %c0_i32 : i32
    %1 = arith.extui %0 : i1 to i32
    %c0_i32_0 = arith.constant 0 : i32
    %2 = arith.cmpi ne, %1, %c0_i32_0 : i32
    scf.if %2 {
      %c0_36 = arith.constant 0 : index
      %c0_37 = arith.constant 0 : index
      %153 = vector.load %arg3[%c0_36, %c0_37] : memref<16x32xf32, #tpu.memory_space<vmem>>, vector<16x32xf32>
      %c0_38 = arith.constant 0 : index
      %c0_39 = arith.constant 0 : index
      %154 = vector.load %arg7[%c0_38, %c0_39] : memref<16x32xf32, #tpu.memory_space<vmem>>, vector<16x32xf32>
      tpu.vector_store %arg7[%c0_38, %c0_39], %153 {strides = array<i32>} : memref<16x32xf32, #tpu.memory_space<vmem>>, vector<16x32xf32>,
    } else {
    }
    %c0 = arith.constant 0 : index
    %c0_1 = arith.constant 0 : index
    %3 = vector.load %arg4[%c0, %c0_1] : memref<32x128xbf16, #tpu.memory_space<vmem>>, vector<32x128xbf16>
    %c0_2 = arith.constant 0 : index
    %c0_3 = arith.constant 0 : index
    %4 = vector.load %arg5[%c0_2, %c0_3] : memref<1x128xf32, #tpu.memory_space<vmem>>, vector<1x128xf32>
    %5 = vector.shape_cast %4 : vector<1x128xf32> to vector<1x128xf32>
    %6 = vector.broadcast %5 : vector<1x128xf32> to vector<16x128xf32>
    %c0_4 = arith.constant 0 : index
    %c0_5 = arith.constant 0 : index
    %7 = vector.load %arg7[%c0_4, %c0_5] : memref<16x32xf32, #tpu.memory_space<vmem>>, vector<16x32xf32>
    %c0_i32_6 = arith.constant 0 : i32
    %8 = arith.index_cast %c0_i32_6 : i32 to index
    %c0_7 = arith.constant 0 : index
    %c0_8 = arith.constant 0 : index
    %9 = vector.load %arg2[%8, %c0_7, %c0_8] : memref<4x16x128xbf16, #tpu.memory_space<vmem>>, vector<1x16x128xbf16>
    %10 = vector.shape_cast %9 : vector<1x16x128xbf16> to vector<16x128xbf16>
    %11 = arith.extf %10 : vector<16x128xbf16> to vector<16x128xf32>
    %12 = arith.truncf %7 : vector<16x32xf32> to vector<16x32xbf16>
    %cst = arith.constant dense<0.000000e+00> : vector<16x128xf32>
    %13 = tpu.matmul %12, %3, %cst {dimension_numbers = #tpu.dot_dimension_numbers<[1], [0], [0], [1], [0, 0, 1, 1], [], []>} : vector<16x32xbf16>, vector<32x128xbf16>, vector<16x128xf32> -> vector<16x128xf32>
    %14 = arith.addf %13, %6 : vector<16x128xf32>
    %15 = vector.extract_strided_slice %11 {offsets = [0, 0], sizes = [16, 32], strides = [1, 1]} : vector<16x128xf32> to vector<16x32xf32>
    %16 = vector.extract_strided_slice %14 {offsets = [0, 0], sizes = [16, 32], strides = [1, 1]} : vector<16x128xf32> to vector<16x32xf32>
    %17 = arith.addf %15, %16 : vector<16x32xf32>
    %18 = arith.negf %17 : vector<16x32xf32>
    %19 = math.exp %18 : vector<16x32xf32>
    %cst_9 = arith.constant 1.000000e+00 : f32
    %20 = vector.broadcast %cst_9 : f32 to vector<16x32xf32>
    %21 = arith.addf %20, %19 : vector<16x32xf32>
    %22 = arith.divf %20, %21 : vector<16x32xf32>
    %23 = vector.extract_strided_slice %11 {offsets = [0, 32], sizes = [16, 32], strides = [1, 1]} : vector<16x128xf32> to vector<16x32xf32>
    %24 = vector.extract_strided_slice %14 {offsets = [0, 32], sizes = [16, 32], strides = [1, 1]} : vector<16x128xf32> to vector<16x32xf32>
    %25 = arith.addf %23, %24 : vector<16x32xf32>
    %26 = arith.negf %25 : vector<16x32xf32>
    %27 = math.exp %26 : vector<16x32xf32>
    %cst_10 = arith.constant 1.000000e+00 : f32
    %28 = vector.broadcast %cst_10 : f32 to vector<16x32xf32>
    %29 = arith.addf %28, %27 : vector<16x32xf32>
    %30 = arith.divf %28, %29 : vector<16x32xf32>
    %31 = vector.extract_strided_slice %11 {offsets = [0, 64], sizes = [16, 32], strides = [1, 1]} : vector<16x128xf32> to vector<16x32xf32>
    %32 = vector.extract_strided_slice %14 {offsets = [0, 64], sizes = [16, 32], strides = [1, 1]} : vector<16x128xf32> to vector<16x32xf32>
    %33 = arith.mulf %22, %32 : vector<16x32xf32>
    %34 = arith.addf %31, %33 : vector<16x32xf32>
    %35 = math.tanh %34 : vector<16x32xf32>
    %36 = arith.subf %7, %35 : vector<16x32xf32>
    %37 = arith.mulf %30, %36 : vector<16x32xf32>
    %38 = arith.addf %35, %37 : vector<16x32xf32>
    %39 = arith.truncf %38 : vector<16x32xf32> to vector<16x32xbf16>
    %40 = arith.index_cast %c0_i32_6 : i32 to index
    %c0_11 = arith.constant 0 : index
    %c0_12 = arith.constant 0 : index
    %41 = vector.load %arg6[%40, %c0_11, %c0_12] : memref<4x16x32xbf16, #tpu.memory_space<vmem>>, vector<1x16x32xbf16>
    %42 = vector.shape_cast %41 : vector<1x16x32xbf16> to vector<16x32xbf16>
    %43 = vector.shape_cast %39 : vector<16x32xbf16> to vector<1x16x32xbf16>
    tpu.vector_store %arg6[%40, %c0_11, %c0_12], %43 {strides = array<i32>} : memref<4x16x32xbf16, #tpu.memory_space<vmem>>, vector<1x16x32xbf16>,
    %c1_i32 = arith.constant 1 : i32
    %44 = arith.index_cast %c1_i32 : i32 to index
    %c0_13 = arith.constant 0 : index
    %c0_14 = arith.constant 0 : index
    %45 = vector.load %arg2[%44, %c0_13, %c0_14] : memref<4x16x128xbf16, #tpu.memory_space<vmem>>, vector<1x16x128xbf16>
    %46 = vector.shape_cast %45 : vector<1x16x128xbf16> to vector<16x128xbf16>
    %47 = arith.extf %46 : vector<16x128xbf16> to vector<16x128xf32>
    %48 = arith.truncf %38 : vector<16x32xf32> to vector<16x32xbf16>
    %cst_15 = arith.constant dense<0.000000e+00> : vector<16x128xf32>
    %49 = tpu.matmul %48, %3, %cst_15 {dimension_numbers = #tpu.dot_dimension_numbers<[1], [0], [0], [1], [0, 0, 1, 1], [], []>} : vector<16x32xbf16>, vector<32x128xbf16>, vector<16x128xf32> -> vector<16x128xf32>
    %50 = arith.addf %49, %6 : vector<16x128xf32>
    %51 = vector.extract_strided_slice %47 {offsets = [0, 0], sizes = [16, 32], strides = [1, 1]} : vector<16x128xf32> to vector<16x32xf32>
    %52 = vector.extract_strided_slice %50 {offsets = [0, 0], sizes = [16, 32], strides = [1, 1]} : vector<16x128xf32> to vector<16x32xf32>
    %53 = arith.addf %51, %52 : vector<16x32xf32>
    %54 = arith.negf %53 : vector<16x32xf32>
    %55 = math.exp %54 : vector<16x32xf32>
    %cst_16 = arith.constant 1.000000e+00 : f32
    %56 = vector.broadcast %cst_16 : f32 to vector<16x32xf32>
    %57 = arith.addf %56, %55 : vector<16x32xf32>
    %58 = arith.divf %56, %57 : vector<16x32xf32>
    %59 = vector.extract_strided_slice %47 {offsets = [0, 32], sizes = [16, 32], strides = [1, 1]} : vector<16x128xf32> to vector<16x32xf32>
    %60 = vector.extract_strided_slice %50 {offsets = [0, 32], sizes = [16, 32], strides = [1, 1]} : vector<16x128xf32> to vector<16x32xf32>
    %61 = arith.addf %59, %60 : vector<16x32xf32>
    %62 = arith.negf %61 : vector<16x32xf32>
    %63 = math.exp %62 : vector<16x32xf32>
    %cst_17 = arith.constant 1.000000e+00 : f32
    %64 = vector.broadcast %cst_17 : f32 to vector<16x32xf32>
    %65 = arith.addf %64, %63 : vector<16x32xf32>
    %66 = arith.divf %64, %65 : vector<16x32xf32>
    %67 = vector.extract_strided_slice %47 {offsets = [0, 64], sizes = [16, 32], strides = [1, 1]} : vector<16x128xf32> to vector<16x32xf32>
    %68 = vector.extract_strided_slice %50 {offsets = [0, 64], sizes = [16, 32], strides = [1, 1]} : vector<16x128xf32> to vector<16x32xf32>
    %69 = arith.mulf %58, %68 : vector<16x32xf32>
    %70 = arith.addf %67, %69 : vector<16x32xf32>
    %71 = math.tanh %70 : vector<16x32xf32>
    %72 = arith.subf %38, %71 : vector<16x32xf32>
    %73 = arith.mulf %66, %72 : vector<16x32xf32>
    %74 = arith.addf %71, %73 : vector<16x32xf32>
    %75 = arith.truncf %74 : vector<16x32xf32> to vector<16x32xbf16>
    %76 = arith.index_cast %c1_i32 : i32 to index
    %c0_18 = arith.constant 0 : index
    %c0_19 = arith.constant 0 : index
    %77 = vector.load %arg6[%76, %c0_18, %c0_19] : memref<4x16x32xbf16, #tpu.memory_space<vmem>>, vector<1x16x32xbf16>
    %78 = vector.shape_cast %77 : vector<1x16x32xbf16> to vector<16x32xbf16>
    %79 = vector.shape_cast %75 : vector<16x32xbf16> to vector<1x16x32xbf16>
    tpu.vector_store %arg6[%76, %c0_18, %c0_19], %79 {strides = array<i32>} : memref<4x16x32xbf16, #tpu.memory_space<vmem>>, vector<1x16x32xbf16>,
    %c2_i32 = arith.constant 2 : i32
    %80 = arith.index_cast %c2_i32 : i32 to index
    %c0_20 = arith.constant 0 : index
    %c0_21 = arith.constant 0 : index
    %81 = vector.load %arg2[%80, %c0_20, %c0_21] : memref<4x16x128xbf16, #tpu.memory_space<vmem>>, vector<1x16x128xbf16>
    %82 = vector.shape_cast %81 : vector<1x16x128xbf16> to vector<16x128xbf16>
    %83 = arith.extf %82 : vector<16x128xbf16> to vector<16x128xf32>
    %84 = arith.truncf %74 : vector<16x32xf32> to vector<16x32xbf16>
    %cst_22 = arith.constant dense<0.000000e+00> : vector<16x128xf32>
    %85 = tpu.matmul %84, %3, %cst_22 {dimension_numbers = #tpu.dot_dimension_numbers<[1], [0], [0], [1], [0, 0, 1, 1], [], []>} : vector<16x32xbf16>, vector<32x128xbf16>, vector<16x128xf32> -> vector<16x128xf32>
    %86 = arith.addf %85, %6 : vector<16x128xf32>
    %87 = vector.extract_strided_slice %83 {offsets = [0, 0], sizes = [16, 32], strides = [1, 1]} : vector<16x128xf32> to vector<16x32xf32>
    %88 = vector.extract_strided_slice %86 {offsets = [0, 0], sizes = [16, 32], strides = [1, 1]} : vector<16x128xf32> to vector<16x32xf32>
    %89 = arith.addf %87, %88 : vector<16x32xf32>
    %90 = arith.negf %89 : vector<16x32xf32>
    %91 = math.exp %90 : vector<16x32xf32>
    %cst_23 = arith.constant 1.000000e+00 : f32
    %92 = vector.broadcast %cst_23 : f32 to vector<16x32xf32>
    %93 = arith.addf %92, %91 : vector<16x32xf32>
    %94 = arith.divf %92, %93 : vector<16x32xf32>
    %95 = vector.extract_strided_slice %83 {offsets = [0, 32], sizes = [16, 32], strides = [1, 1]} : vector<16x128xf32> to vector<16x32xf32>
    %96 = vector.extract_strided_slice %86 {offsets = [0, 32], sizes = [16, 32], strides = [1, 1]} : vector<16x128xf32> to vector<16x32xf32>
    %97 = arith.addf %95, %96 : vector<16x32xf32>
    %98 = arith.negf %97 : vector<16x32xf32>
    %99 = math.exp %98 : vector<16x32xf32>
    %cst_24 = arith.constant 1.000000e+00 : f32
    %100 = vector.broadcast %cst_24 : f32 to vector<16x32xf32>
    %101 = arith.addf %100, %99 : vector<16x32xf32>
    %102 = arith.divf %100, %101 : vector<16x32xf32>
    %103 = vector.extract_strided_slice %83 {offsets = [0, 64], sizes = [16, 32], strides = [1, 1]} : vector<16x128xf32> to vector<16x32xf32>
    %104 = vector.extract_strided_slice %86 {offsets = [0, 64], sizes = [16, 32], strides = [1, 1]} : vector<16x128xf32> to vector<16x32xf32>
    %105 = arith.mulf %94, %104 : vector<16x32xf32>
    %106 = arith.addf %103, %105 : vector<16x32xf32>
    %107 = math.tanh %106 : vector<16x32xf32>
    %108 = arith.subf %74, %107 : vector<16x32xf32>
    %109 = arith.mulf %102, %108 : vector<16x32xf32>
    %110 = arith.addf %107, %109 : vector<16x32xf32>
    %111 = arith.truncf %110 : vector<16x32xf32> to vector<16x32xbf16>
    %112 = arith.index_cast %c2_i32 : i32 to index
    %c0_25 = arith.constant 0 : index
    %c0_26 = arith.constant 0 : index
    %113 = vector.load %arg6[%112, %c0_25, %c0_26] : memref<4x16x32xbf16, #tpu.memory_space<vmem>>, vector<1x16x32xbf16>
    %114 = vector.shape_cast %113 : vector<1x16x32xbf16> to vector<16x32xbf16>
    %115 = vector.shape_cast %111 : vector<16x32xbf16> to vector<1x16x32xbf16>
    tpu.vector_store %arg6[%112, %c0_25, %c0_26], %115 {strides = array<i32>} : memref<4x16x32xbf16, #tpu.memory_space<vmem>>, vector<1x16x32xbf16>,
    %c3_i32 = arith.constant 3 : i32
    %116 = arith.index_cast %c3_i32 : i32 to index
    %c0_27 = arith.constant 0 : index
    %c0_28 = arith.constant 0 : index
    %117 = vector.load %arg2[%116, %c0_27, %c0_28] : memref<4x16x128xbf16, #tpu.memory_space<vmem>>, vector<1x16x128xbf16>
    %118 = vector.shape_cast %117 : vector<1x16x128xbf16> to vector<16x128xbf16>
    %119 = arith.extf %118 : vector<16x128xbf16> to vector<16x128xf32>
    %120 = arith.truncf %110 : vector<16x32xf32> to vector<16x32xbf16>
    %cst_29 = arith.constant dense<0.000000e+00> : vector<16x128xf32>
    %121 = tpu.matmul %120, %3, %cst_29 {dimension_numbers = #tpu.dot_dimension_numbers<[1], [0], [0], [1], [0, 0, 1, 1], [], []>} : vector<16x32xbf16>, vector<32x128xbf16>, vector<16x128xf32> -> vector<16x128xf32>
    %122 = arith.addf %121, %6 : vector<16x128xf32>
    %123 = vector.extract_strided_slice %119 {offsets = [0, 0], sizes = [16, 32], strides = [1, 1]} : vector<16x128xf32> to vector<16x32xf32>
    %124 = vector.extract_strided_slice %122 {offsets = [0, 0], sizes = [16, 32], strides = [1, 1]} : vector<16x128xf32> to vector<16x32xf32>
    %125 = arith.addf %123, %124 : vector<16x32xf32>
    %126 = arith.negf %125 : vector<16x32xf32>
    %127 = math.exp %126 : vector<16x32xf32>
    %cst_30 = arith.constant 1.000000e+00 : f32
    %128 = vector.broadcast %cst_30 : f32 to vector<16x32xf32>
    %129 = arith.addf %128, %127 : vector<16x32xf32>
    %130 = arith.divf %128, %129 : vector<16x32xf32>
    %131 = vector.extract_strided_slice %119 {offsets = [0, 32], sizes = [16, 32], strides = [1, 1]} : vector<16x128xf32> to vector<16x32xf32>
    %132 = vector.extract_strided_slice %122 {offsets = [0, 32], sizes = [16, 32], strides = [1, 1]} : vector<16x128xf32> to vector<16x32xf32>
    %133 = arith.addf %131, %132 : vector<16x32xf32>
    %134 = arith.negf %133 : vector<16x32xf32>
    %135 = math.exp %134 : vector<16x32xf32>
    %cst_31 = arith.constant 1.000000e+00 : f32
    %136 = vector.broadcast %cst_31 : f32 to vector<16x32xf32>
    %137 = arith.addf %136, %135 : vector<16x32xf32>
    %138 = arith.divf %136, %137 : vector<16x32xf32>
    %139 = vector.extract_strided_slice %119 {offsets = [0, 64], sizes = [16, 32], strides = [1, 1]} : vector<16x128xf32> to vector<16x32xf32>
    %140 = vector.extract_strided_slice %122 {offsets = [0, 64], sizes = [16, 32], strides = [1, 1]} : vector<16x128xf32> to vector<16x32xf32>
    %141 = arith.mulf %130, %140 : vector<16x32xf32>
    %142 = arith.addf %139, %141 : vector<16x32xf32>
    %143 = math.tanh %142 : vector<16x32xf32>
    %144 = arith.subf %110, %143 : vector<16x32xf32>
    %145 = arith.mulf %138, %144 : vector<16x32xf32>
    %146 = arith.addf %143, %145 : vector<16x32xf32>
    %147 = arith.truncf %146 : vector<16x32xf32> to vector<16x32xbf16>
    %148 = arith.index_cast %c3_i32 : i32 to index
    %c0_32 = arith.constant 0 : index
    %c0_33 = arith.constant 0 : index
    %149 = vector.load %arg6[%148, %c0_32, %c0_33] : memref<4x16x32xbf16, #tpu.memory_space<vmem>>, vector<1x16x32xbf16>
    %150 = vector.shape_cast %149 : vector<1x16x32xbf16> to vector<16x32xbf16>
    %151 = vector.shape_cast %147 : vector<16x32xbf16> to vector<1x16x32xbf16>
    tpu.vector_store %arg6[%148, %c0_32, %c0_33], %151 {strides = array<i32>} : memref<4x16x32xbf16, #tpu.memory_space<vmem>>, vector<1x16x32xbf16>,
    %c4_i32 = arith.constant 4 : i32
    %c0_34 = arith.constant 0 : index
    %c0_35 = arith.constant 0 : index
    %152 = vector.load %arg7[%c0_34, %c0_35] : memref<16x32xf32, #tpu.memory_space<vmem>>, vector<16x32xf32>
    tpu.vector_store %arg7[%c0_34, %c0_35], %146 {strides = array<i32>} : memref<16x32xf32, #tpu.memory_space<vmem>>, vector<16x32xf32>,
    return
  }
  func.func @transform_0(%arg0: i32, %arg1: i32) -> (i32, i32, i32) {
    %c0_i32 = arith.constant 0 : i32
    %c0_i32_0 = arith.constant 0 : i32
    return %arg1, %arg0, %c0_i32 : i32, i32, i32
  }
  func.func @transform_1(%arg0: i32, %arg1: i32) -> (i32, i32) {
    %c0_i32 = arith.constant 0 : i32
    %c0_i32_0 = arith.constant 0 : i32
    return %arg0, %c0_i32 : i32, i32
  }
  func.func @transform_2(%arg0: i32, %arg1: i32) -> (i32, i32) {
    %c0_i32 = arith.constant 0 : i32
    %c0_i32_0 = arith.constant 0 : i32
    %c0_i32_1 = arith.constant 0 : i32
    return %c0_i32, %c0_i32_0 : i32, i32
  }
  func.func @transform_3(%arg0: i32, %arg1: i32) -> (i32, i32) {
    %c0_i32 = arith.constant 0 : i32
    %c0_i32_0 = arith.constant 0 : i32
    %c0_i32_1 = arith.constant 0 : i32
    return %c0_i32, %c0_i32_0 : i32, i32
  }
  func.func @transform_4(%arg0: i32, %arg1: i32) -> (i32, i32, i32) {
    %c0_i32 = arith.constant 0 : i32
    %c0_i32_0 = arith.constant 0 : i32
    return %arg1, %arg0, %c0_i32 : i32, i32, i32
  }
}

module attributes {stable_mosaic.version = 11 : i64} {
  func.func @_lse_kernel(%arg0: i32, %arg1: i32, %arg2: memref<224x32xbf16, #tpu.memory_space<vmem>>, %arg3: memref<32x256xbf16, #tpu.memory_space<vmem>>, %arg4: memref<1x256xf32, #tpu.memory_space<vmem>>, %arg5: memref<224x1xf32, #tpu.memory_space<vmem>>, %arg6: memref<224x1xf32, #tpu.memory_space<vmem>>, %arg7: memref<224x1xf32, #tpu.memory_space<vmem>>) attributes {dimension_semantics = [#tpu.dimension_semantics<parallel>, #tpu.dimension_semantics<arbitrary>], iteration_bounds = array<i64: 1, 1>, scalar_prefetch = 0 : i64, scratch_operands = 2 : i64, tpu.core_type = #tpu.core_type<tc>, window_params = [{transform_indices = @transform_0, window_bounds = array<i64: 224, 32>}, {transform_indices = @transform_1, window_bounds = array<i64: 32, 256>}, {transform_indices = @transform_2, window_bounds = array<i64: 1, 256>}, {transform_indices = @transform_3, window_bounds = array<i64: 224, 1>}]} {
    %c0_i32 = arith.constant 0 : i32
    %0 = arith.cmpi eq, %arg1, %c0_i32 : i32
    %1 = arith.extui %0 : i1 to i32
    %c0_i32_0 = arith.constant 0 : i32
    %2 = arith.cmpi ne, %1, %c0_i32_0 : i32
    scf.if %2 {
      %cst_18 = arith.constant 0xFF800000 : f32
      %28 = vector.broadcast %cst_18 : f32 to vector<224x1xf32>
      %c0_19 = arith.constant 0 : index
      %c0_20 = arith.constant 0 : index
      %29 = vector.load %arg6[%c0_19, %c0_20] : memref<224x1xf32, #tpu.memory_space<vmem>>, vector<224x1xf32>
      tpu.vector_store %arg6[%c0_19, %c0_20], %28 {strides = array<i32>} : memref<224x1xf32, #tpu.memory_space<vmem>>, vector<224x1xf32>,
      %cst_21 = arith.constant 0.000000e+00 : f32
      %30 = vector.broadcast %cst_21 : f32 to vector<224x1xf32>
      %c0_22 = arith.constant 0 : index
      %c0_23 = arith.constant 0 : index
      %31 = vector.load %arg7[%c0_22, %c0_23] : memref<224x1xf32, #tpu.memory_space<vmem>>, vector<224x1xf32>
      tpu.vector_store %arg7[%c0_22, %c0_23], %30 {strides = array<i32>} : memref<224x1xf32, #tpu.memory_space<vmem>>, vector<224x1xf32>,
    } else {
    }
    %c0 = arith.constant 0 : index
    %c0_1 = arith.constant 0 : index
    %3 = vector.load %arg2[%c0, %c0_1] : memref<224x32xbf16, #tpu.memory_space<vmem>>, vector<224x32xbf16>
    %c0_2 = arith.constant 0 : index
    %c0_3 = arith.constant 0 : index
    %4 = vector.load %arg3[%c0_2, %c0_3] : memref<32x256xbf16, #tpu.memory_space<vmem>>, vector<32x256xbf16>
    %cst = arith.constant dense<0.000000e+00> : vector<224x256xf32>
    %5 = tpu.matmul %3, %4, %cst {dimension_numbers = #tpu.dot_dimension_numbers<[1], [0], [0], [1], [0, 0, 1, 1], [], []>} : vector<224x32xbf16>, vector<32x256xbf16>, vector<224x256xf32> -> vector<224x256xf32>
    %c0_4 = arith.constant 0 : index
    %c0_5 = arith.constant 0 : index
    %6 = vector.load %arg4[%c0_4, %c0_5] : memref<1x256xf32, #tpu.memory_space<vmem>>, vector<1x256xf32>
    %7 = vector.broadcast %6 : vector<1x256xf32> to vector<224x256xf32>
    %8 = arith.addf %5, %7 : vector<224x256xf32>
    %c0_6 = arith.constant 0 : index
    %c0_7 = arith.constant 0 : index
    %9 = vector.load %arg6[%c0_6, %c0_7] : memref<224x1xf32, #tpu.memory_space<vmem>>, vector<224x1xf32>
    %cst_8 = arith.constant dense<0xFF800000> : vector<224xf32>
    %10 = vector.multi_reduction <maximumf>, %8, %cst_8 [1] : vector<224x256xf32> to vector<224xf32>
    %11 = vector.shape_cast %10 : vector<224xf32> to vector<224x1xf32>
    %12 = arith.maximumf %9, %11 : vector<224x1xf32>
    %c0_9 = arith.constant 0 : index
    %c0_10 = arith.constant 0 : index
    %13 = vector.load %arg7[%c0_9, %c0_10] : memref<224x1xf32, #tpu.memory_space<vmem>>, vector<224x1xf32>
    %14 = arith.subf %9, %12 : vector<224x1xf32>
    %15 = math.exp %14 : vector<224x1xf32>
    %16 = arith.mulf %13, %15 : vector<224x1xf32>
    %17 = vector.broadcast %12 : vector<224x1xf32> to vector<224x256xf32>
    %18 = arith.subf %8, %17 : vector<224x256xf32>
    %19 = math.exp %18 : vector<224x256xf32>
    %cst_11 = arith.constant dense<0.000000e+00> : vector<224xf32>
    %20 = vector.multi_reduction <add>, %19, %cst_11 [1] : vector<224x256xf32> to vector<224xf32>
    %21 = vector.shape_cast %20 : vector<224xf32> to vector<224x1xf32>
    %22 = arith.addf %16, %21 : vector<224x1xf32>
    %c0_12 = arith.constant 0 : index
    %c0_13 = arith.constant 0 : index
    %23 = vector.load %arg7[%c0_12, %c0_13] : memref<224x1xf32, #tpu.memory_space<vmem>>, vector<224x1xf32>
    tpu.vector_store %arg7[%c0_12, %c0_13], %22 {strides = array<i32>} : memref<224x1xf32, #tpu.memory_space<vmem>>, vector<224x1xf32>,
    %c0_14 = arith.constant 0 : index
    %c0_15 = arith.constant 0 : index
    %24 = vector.load %arg6[%c0_14, %c0_15] : memref<224x1xf32, #tpu.memory_space<vmem>>, vector<224x1xf32>
    tpu.vector_store %arg6[%c0_14, %c0_15], %12 {strides = array<i32>} : memref<224x1xf32, #tpu.memory_space<vmem>>, vector<224x1xf32>,
    %c0_i32_16 = arith.constant 0 : i32
    %25 = arith.cmpi eq, %arg1, %c0_i32_16 : i32
    %26 = arith.extui %25 : i1 to i32
    %c0_i32_17 = arith.constant 0 : i32
    %27 = arith.cmpi ne, %26, %c0_i32_17 : i32
    scf.if %27 {
      %c0_18 = arith.constant 0 : index
      %c0_19 = arith.constant 0 : index
      %28 = vector.load %arg6[%c0_18, %c0_19] : memref<224x1xf32, #tpu.memory_space<vmem>>, vector<224x1xf32>
      %c0_20 = arith.constant 0 : index
      %c0_21 = arith.constant 0 : index
      %29 = vector.load %arg7[%c0_20, %c0_21] : memref<224x1xf32, #tpu.memory_space<vmem>>, vector<224x1xf32>
      %30 = math.log %29 : vector<224x1xf32>
      %31 = arith.addf %28, %30 : vector<224x1xf32>
      %c0_22 = arith.constant 0 : index
      %c0_23 = arith.constant 0 : index
      %32 = vector.load %arg5[%c0_22, %c0_23] : memref<224x1xf32, #tpu.memory_space<vmem>>, vector<224x1xf32>
      tpu.vector_store %arg5[%c0_22, %c0_23], %31 {strides = array<i32>} : memref<224x1xf32, #tpu.memory_space<vmem>>, vector<224x1xf32>,
    } else {
    }
    return
  }
  func.func @transform_0(%arg0: i32, %arg1: i32) -> (i32, i32) {
    %c0_i32 = arith.constant 0 : i32
    %c0_i32_0 = arith.constant 0 : i32
    return %arg0, %c0_i32 : i32, i32
  }
  func.func @transform_1(%arg0: i32, %arg1: i32) -> (i32, i32) {
    %c0_i32 = arith.constant 0 : i32
    %c0_i32_0 = arith.constant 0 : i32
    return %c0_i32, %arg1 : i32, i32
  }
  func.func @transform_2(%arg0: i32, %arg1: i32) -> (i32, i32) {
    %c0_i32 = arith.constant 0 : i32
    %c0_i32_0 = arith.constant 0 : i32
    return %c0_i32, %arg1 : i32, i32
  }
  func.func @transform_3(%arg0: i32, %arg1: i32) -> (i32, i32) {
    %c0_i32 = arith.constant 0 : i32
    %c0_i32_0 = arith.constant 0 : i32
    return %arg0, %c0_i32 : i32, i32
  }
}

module attributes {stable_mosaic.version = 11 : i64} {
  func.func @_logp_kernel(%arg0: i32, %arg1: i32, %arg2: memref<224x32xbf16, #tpu.memory_space<vmem>>, %arg3: memref<32x256xbf16, #tpu.memory_space<vmem>>, %arg4: memref<1x256xf32, #tpu.memory_space<vmem>>, %arg5: memref<224x1xf32, #tpu.memory_space<vmem>>, %arg6: memref<224x256xf32, #tpu.memory_space<vmem>>) attributes {dimension_semantics = [#tpu.dimension_semantics<parallel>, #tpu.dimension_semantics<parallel>], iteration_bounds = array<i64: 1, 1>, scalar_prefetch = 0 : i64, scratch_operands = 0 : i64, tpu.core_type = #tpu.core_type<tc>, window_params = [{transform_indices = @transform_0, window_bounds = array<i64: 224, 32>}, {transform_indices = @transform_1, window_bounds = array<i64: 32, 256>}, {transform_indices = @transform_2, window_bounds = array<i64: 1, 256>}, {transform_indices = @transform_3, window_bounds = array<i64: 224, 1>}, {transform_indices = @transform_4, window_bounds = array<i64: 224, 256>}]} {
    %c0 = arith.constant 0 : index
    %c0_0 = arith.constant 0 : index
    %0 = vector.load %arg2[%c0, %c0_0] : memref<224x32xbf16, #tpu.memory_space<vmem>>, vector<224x32xbf16>
    %c0_1 = arith.constant 0 : index
    %c0_2 = arith.constant 0 : index
    %1 = vector.load %arg3[%c0_1, %c0_2] : memref<32x256xbf16, #tpu.memory_space<vmem>>, vector<32x256xbf16>
    %cst = arith.constant dense<0.000000e+00> : vector<224x256xf32>
    %2 = tpu.matmul %0, %1, %cst {dimension_numbers = #tpu.dot_dimension_numbers<[1], [0], [0], [1], [0, 0, 1, 1], [], []>} : vector<224x32xbf16>, vector<32x256xbf16>, vector<224x256xf32> -> vector<224x256xf32>
    %c0_3 = arith.constant 0 : index
    %c0_4 = arith.constant 0 : index
    %3 = vector.load %arg4[%c0_3, %c0_4] : memref<1x256xf32, #tpu.memory_space<vmem>>, vector<1x256xf32>
    %4 = vector.broadcast %3 : vector<1x256xf32> to vector<224x256xf32>
    %5 = arith.addf %2, %4 : vector<224x256xf32>
    %c0_5 = arith.constant 0 : index
    %c0_6 = arith.constant 0 : index
    %6 = vector.load %arg5[%c0_5, %c0_6] : memref<224x1xf32, #tpu.memory_space<vmem>>, vector<224x1xf32>
    %7 = vector.broadcast %6 : vector<224x1xf32> to vector<224x256xf32>
    %8 = arith.subf %5, %7 : vector<224x256xf32>
    %c0_7 = arith.constant 0 : index
    %c0_8 = arith.constant 0 : index
    %9 = vector.load %arg6[%c0_7, %c0_8] : memref<224x256xf32, #tpu.memory_space<vmem>>, vector<224x256xf32>
    tpu.vector_store %arg6[%c0_7, %c0_8], %8 {strides = array<i32>} : memref<224x256xf32, #tpu.memory_space<vmem>>, vector<224x256xf32>,
    return
  }
  func.func @transform_0(%arg0: i32, %arg1: i32) -> (i32, i32) {
    %c0_i32 = arith.constant 0 : i32
    %c0_i32_0 = arith.constant 0 : i32
    return %arg0, %c0_i32 : i32, i32
  }
  func.func @transform_1(%arg0: i32, %arg1: i32) -> (i32, i32) {
    %c0_i32 = arith.constant 0 : i32
    %c0_i32_0 = arith.constant 0 : i32
    return %c0_i32, %arg1 : i32, i32
  }
  func.func @transform_2(%arg0: i32, %arg1: i32) -> (i32, i32) {
    %c0_i32 = arith.constant 0 : i32
    %c0_i32_0 = arith.constant 0 : i32
    return %c0_i32, %arg1 : i32, i32
  }
  func.func @transform_3(%arg0: i32, %arg1: i32) -> (i32, i32) {
    %c0_i32 = arith.constant 0 : i32
    %c0_i32_0 = arith.constant 0 : i32
    return %arg0, %c0_i32 : i32, i32
  }
  func.func @transform_4(%arg0: i32, %arg1: i32) -> (i32, i32) {
    %c0_i32 = arith.constant 0 : i32
    return %arg0, %arg1 : i32, i32
  }
}

</mosaic_0001>

<bundles_post_ra>
// kernel: neg.1
= control target key start
LH: loop header
LB: loop body
LE: loop exit
PB: predicated region body
PF: predicated region fallthrough
CT: control target
= control target key end

     0   :  { %s24_s0 = inlined_call_operand.vmem [shape: s32[32], index: 0, kind: input, shape index: {}]   ;;  %s25_s1 = inlined_call_operand.vmem [shape: s32[32], index: 1, kind: output, shape index: {}]  }
   0x1   :  { %v2_v0 = vld [vmem:[%s24_s0] sm:$0x1] }
   0x2   :  { %v5_v1 = vsub.s32 0, %v2_v0 }
   0x4   :  { %7 = vst [vmem:[%s25_s1] sm:$0x1] %v5_v1 }

// kernel: decoder_forward.4
= control target key start
LH: loop header
LB: loop body
LE: loop exit
PB: predicated region body
PF: predicated region fallthrough
CT: control target
= control target key end

     0   :  { %vm203_vm0 = vcmask 261120   ;;  %s1056_s1 = inlined_call_operand.vmem [shape: bf16[32,128], index: 1, kind: input, shape index: {}]   ;;  %s1057_s0 = inlined_call_operand.vmem [shape: bf16[384,32], index: 0, kind: input, shape index: {}]   ;;  %s1058_s2 = inlined_call_operand.vmem [shape: f32[1,128], index: 2, kind: input, shape index: {}]   ;;  %s1059_s3 = inlined_call_operand.vmem [shape: bf16[384,128], index: 3, kind: output, shape index: {}]  }
   0x1   :  { %v658_v0 = vld [vmem:[%s1056_s1 + $0x8] sm:$0xff]  ;;  %v657_v1 = vld [vmem:[%s1056_s1] sm:$0xff]  ;;  %v639_v3 = vld [vmem:[%s1057_s0 + $0x30] sm:$0xff] }
   0x2   :  { %282 = vmatpush.bf16.msra.mxu0 %v658_v0  ;;  %802 = vmatpush.bf16.msra.mxu1 %v658_v0  ;;  %v633_v2 = vld [vmem:[%s1057_s0] sm:$0xff]  ;;  %v651_v5 = vld [vmem:[%s1057_s0 + $0x90] sm:$0xff]  ;;  %v634_v6 = vld [vmem:[%s1057_s0 + $0x8] sm:$0xff] }
   0x3   :  { %803 = vmatpush.bf16.msra.mxu2 %v658_v0  ;;  %804 = vmatpush.bf16.msra.mxu3 %v658_v0  ;;  %v645_v4 = vld [vmem:[%s1057_s0 + $0x60] sm:$0xff]  ;;  %v640_v7 = vld [vmem:[%s1057_s0 + $0x38] sm:$0xff]  ;;  %v646_v8 = vld [vmem:[%s1057_s0 + $0x68] sm:$0xff] }
   0x4   :  { %v652_v9 = vld [vmem:[%s1057_s0 + $0x98] sm:$0xff]  ;;  %v635_v10 = vld [vmem:[%s1057_s0 + $0x10] sm:$0xff]  ;;  %v641_v11 = vld [vmem:[%s1057_s0 + $0x40] sm:$0xff] }
   0x5   :  { %v647_v12 = vld [vmem:[%s1057_s0 + $0x70] sm:$0xff]  ;;  %v653_v13 = vld [vmem:[%s1057_s0 + $0xa0] sm:$0xff]  ;;  %v636_v14 = vld [vmem:[%s1057_s0 + $0x18] sm:$0xff] }
   0x6   :  { %283 = vmatpush.bf16.msra.mxu0 %v657_v1  ;;  %805 = vmatpush.bf16.msra.mxu1 %v657_v1  ;;  %v642_v15 = vld [vmem:[%s1057_s0 + $0x48] sm:$0xff]  ;;  %v648_v16 = vld [vmem:[%s1057_s0 + $0x78] sm:$0xff]  ;;  %v637_v18 = vld [vmem:[%s1057_s0 + $0x20] sm:$0xff] }
   0x7   :  { %806 = vmatpush.bf16.msra.mxu2 %v657_v1  ;;  %807 = vmatpush.bf16.msra.mxu3 %v657_v1  ;;  %v654_v17 = vld [vmem:[%s1057_s0 + $0xa8] sm:$0xff]  ;;  %v643_v19 = vld [vmem:[%s1057_s0 + $0x50] sm:$0xff]  ;;  %v649_v20 = vld [vmem:[%s1057_s0 + $0x80] sm:$0xff] }
   0x8   :  { %v655_v21 = vld [vmem:[%s1057_s0 + $0xb0] sm:$0xff]  ;;  %v638_v22 = vld [vmem:[%s1057_s0 + $0x28] sm:$0xff]  ;;  %v644_v23 = vld [vmem:[%s1057_s0 + $0x58] sm:$0xff] }
   0x9   :  { %609 = vmatmul.msk.bf16.vlgmr.msra.gmra.mxu0 %vm203_vm0, %v633_v2  ;;  %615 = vmatmul.msk.bf16.vlgmr.msra.gmra.mxu1 %vm203_vm0, %v639_v3  ;;  %v650_v24 = vld [vmem:[%s1057_s0 + $0x88] sm:$0xff]  ;;  %v656_v25 = vld [vmem:[%s1057_s0 + $0xb8] sm:$0xff]  ;;  %v934_v28 = vld [vmem:[%s1058_s2] ss:$0 sm:$0xff] }
   0xa   :  { %621 = vmatmul.msk.bf16.vlgmr.msra.gmra.mxu2 %vm203_vm0, %v645_v4  ;;  %627 = vmatmul.msk.bf16.vlgmr.msra.gmra.mxu3 %vm203_vm0, %v651_v5 }
  0x19   :  { %610 = vmatmul.msk.bf16.gmra.mxu0 %vm203_vm0, %v634_v6  ;;  %616 = vmatmul.msk.bf16.gmra.mxu1 %vm203_vm0, %v640_v7 }
  0x1a   :  { %622 = vmatmul.msk.bf16.gmra.mxu2 %vm203_vm0, %v646_v8  ;;  %628 = vmatmul.msk.bf16.gmra.mxu3 %vm203_vm0, %v652_v9 }
  0x29   :  { %611 = vmatmul.msk.bf16.gmra.mxu0 %vm203_vm0, %v635_v10  ;;  %617 = vmatmul.msk.bf16.gmra.mxu1 %vm203_vm0, %v641_v11 }
  0x2a   :  { %623 = vmatmul.msk.bf16.gmra.mxu2 %vm203_vm0, %v647_v12  ;;  %629 = vmatmul.msk.bf16.gmra.mxu3 %vm203_vm0, %v653_v13 }
  0x39   :  { %612 = vmatmul.msk.bf16.gmra.mxu0 %vm203_vm0, %v636_v14  ;;  %618 = vmatmul.msk.bf16.gmra.mxu1 %vm203_vm0, %v642_v15 }
  0x3a   :  { %624 = vmatmul.msk.bf16.gmra.mxu2 %vm203_vm0, %v648_v16  ;;  %630 = vmatmul.msk.bf16.gmra.mxu3 %vm203_vm0, %v654_v17 }
  0x49   :  { %613 = vmatmul.msk.bf16.gmra.mxu0 %vm203_vm0, %v637_v18  ;;  %619 = vmatmul.msk.bf16.gmra.mxu1 %vm203_vm0, %v643_v19 }
  0x4a   :  { %625 = vmatmul.msk.bf16.gmra.mxu2 %vm203_vm0, %v649_v20  ;;  %631 = vmatmul.msk.bf16.gmra.mxu3 %vm203_vm0, %v655_v21 }
  0x59   :  { %614 = vmatmul.msk.bf16.gmra.mxu0 %vm203_vm0, %v638_v22  ;;  %620 = vmatmul.msk.bf16.gmra.mxu1 %vm203_vm0, %v644_v23 }
  0x5a   :  { %626 = vmatmul.msk.bf16.gmra.mxu2 %vm203_vm0, %v650_v24  ;;  %632 = vmatmul.msk.bf16.gmra.mxu3 %vm203_vm0, %v656_v25 }
  0x86   :  { %v285_v26 = vpop.f32.mrf.mxu0  ;;  %v315_v27 = vpop.f32.mrf.mxu1 }
  0x87   :  { %v286_v33 = vadd.f32 %v934_v28, %v285_v26  ;;  %v316_v34 = vadd.f32 %v934_v28, %v315_v27 }
  0x8d   :  { %v345_v29 = vpop.f32.mrf.mxu2  ;;  %v375_v30 = vpop.f32.mrf.mxu3 }
  0x8e   :  { %v287_v31 = vpop.f32.mrf.mxu0  ;;  %v317_v32 = vpop.f32.mrf.mxu1  ;;  %v346_v41 = vadd.f32 %v934_v28, %v345_v29  ;;  %v376_v42 = vadd.f32 %v934_v28, %v375_v30 }
  0x8f   :  { %v288_v35 = vadd.f32 %v934_v28, %v287_v31  ;;  %v318_v36 = vadd.f32 %v934_v28, %v317_v32 }
  0x91   :  { %v662_v37 = vpack.c.bf16 %v288_v35, %v286_v33  ;;  %v692_v38 = vpack.c.bf16 %v318_v36, %v316_v34 }
  0x93   :  { %663 = vst [vmem:[%s1059_s3] sm:$0xff] %v662_v37  }
  0x94   :  { %784 = vst [vmem:[%s1059_s3 + $0x30] sm:$0xff] %v692_v38  }
  0x95   :  { %v347_v39 = vpop.f32.mrf.mxu2  ;;  %v377_v40 = vpop.f32.mrf.mxu3 }
  0x96   :  { %v348_v43 = vadd.f32 %v934_v28, %v347_v39  ;;  %v378_v44 = vadd.f32 %v934_v28, %v377_v40  ;;  %v290_v45 = vpop.f32.mrf.mxu0  ;;  %v320_v46 = vpop.f32.mrf.mxu1 }
  0x97   :  { %v291_v53 = vadd.f32 %v934_v28, %v290_v45  ;;  %v321_v54 = vadd.f32 %v934_v28, %v320_v46 }
  0x98   :  { %v722_v47 = vpack.c.bf16 %v348_v43, %v346_v41  ;;  %v752_v48 = vpack.c.bf16 %v378_v44, %v376_v42 }
  0x9a   :  { %790 = vst [vmem:[%s1059_s3 + $0x60] sm:$0xff] %v722_v47  }
  0x9b   :  { %796 = vst [vmem:[%s1059_s3 + $0x90] sm:$0xff] %v752_v48  }
  0x9d   :  { %v350_v49 = vpop.f32.mrf.mxu2  ;;  %v380_v50 = vpop.f32.mrf.mxu3 }
  0x9e   :  { %v292_v51 = vpop.f32.mrf.mxu0  ;;  %v322_v52 = vpop.f32.mrf.mxu1  ;;  %v351_v61 = vadd.f32 %v934_v28, %v350_v49  ;;  %v381_v62 = vadd.f32 %v934_v28, %v380_v50 }
  0x9f   :  { %v293_v55 = vadd.f32 %v934_v28, %v292_v51  ;;  %v323_v56 = vadd.f32 %v934_v28, %v322_v52 }
  0xa1   :  { %v667_v57 = vpack.c.bf16 %v293_v55, %v291_v53  ;;  %v697_v58 = vpack.c.bf16 %v323_v56, %v321_v54 }
  0xa3   :  { %779 = vst [vmem:[%s1059_s3 + $0x8] sm:$0xff] %v667_v57  }
  0xa4   :  { %785 = vst [vmem:[%s1059_s3 + $0x38] sm:$0xff] %v697_v58  }
  0xa5   :  { %v352_v59 = vpop.f32.mrf.mxu2  ;;  %v382_v60 = vpop.f32.mrf.mxu3 }
  0xa6   :  { %v353_v63 = vadd.f32 %v934_v28, %v352_v59  ;;  %v383_v0 = vadd.f32 %v934_v28, %v382_v60  ;;  %v295_v1 = vpop.f32.mrf.mxu0  ;;  %v325_v2 = vpop.f32.mrf.mxu1 }
  0xa7   :  { %v296_v9 = vadd.f32 %v934_v28, %v295_v1  ;;  %v326_v10 = vadd.f32 %v934_v28, %v325_v2 }
  0xa8   :  { %v727_v3 = vpack.c.bf16 %v353_v63, %v351_v61  ;;  %v757_v4 = vpack.c.bf16 %v383_v0, %v381_v62 }
  0xaa   :  { %791 = vst [vmem:[%s1059_s3 + $0x68] sm:$0xff] %v727_v3  }
  0xab   :  { %797 = vst [vmem:[%s1059_s3 + $0x98] sm:$0xff] %v757_v4  }
  0xad   :  { %v355_v5 = vpop.f32.mrf.mxu2  ;;  %v385_v6 = vpop.f32.mrf.mxu3 }
  0xae   :  { %v297_v7 = vpop.f32.mrf.mxu0  ;;  %v327_v8 = vpop.f32.mrf.mxu1  ;;  %v356_v17 = vadd.f32 %v934_v28, %v355_v5  ;;  %v386_v18 = vadd.f32 %v934_v28, %v385_v6 }
  0xaf   :  { %v298_v11 = vadd.f32 %v934_v28, %v297_v7  ;;  %v328_v12 = vadd.f32 %v934_v28, %v327_v8 }
  0xb1   :  { %v672_v13 = vpack.c.bf16 %v298_v11, %v296_v9  ;;  %v702_v14 = vpack.c.bf16 %v328_v12, %v326_v10 }
  0xb3   :  { %780 = vst [vmem:[%s1059_s3 + $0x10] sm:$0xff] %v672_v13  }
  0xb4   :  { %786 = vst [vmem:[%s1059_s3 + $0x40] sm:$0xff] %v702_v14  }
  0xb5   :  { %v357_v15 = vpop.f32.mrf.mxu2  ;;  %v387_v16 = vpop.f32.mrf.mxu3 }
  0xb6   :  { %v358_v19 = vadd.f32 %v934_v28, %v357_v15  ;;  %v388_v20 = vadd.f32 %v934_v28, %v387_v16  ;;  %v300_v21 = vpop.f32.mrf.mxu0  ;;  %v330_v22 = vpop.f32.mrf.mxu1 }
  0xb7   :  { %v301_v30 = vadd.f32 %v934_v28, %v300_v21  ;;  %v331_v31 = vadd.f32 %v934_v28, %v330_v22 }
  0xb8   :  { %v732_v23 = vpack.c.bf16 %v358_v19, %v356_v17  ;;  %v762_v24 = vpack.c.bf16 %v388_v20, %v386_v18 }
  0xba   :  { %792 = vst [vmem:[%s1059_s3 + $0x70] sm:$0xff] %v732_v23  }
  0xbb   :  { %798 = vst [vmem:[%s1059_s3 + $0xa0] sm:$0xff] %v762_v24  }
  0xbd   :  { %v360_v25 = vpop.f32.mrf.mxu2  ;;  %v390_v26 = vpop.f32.mrf.mxu3 }
  0xbe   :  { %v302_v27 = vpop.f32.mrf.mxu0  ;;  %v332_v29 = vpop.f32.mrf.mxu1  ;;  %v361_v38 = vadd.f32 %v934_v28, %v360_v25  ;;  %v391_v39 = vadd.f32 %v934_v28, %v390_v26 }
  0xbf   :  { %v303_v32 = vadd.f32 %v934_v28, %v302_v27  ;;  %v333_v33 = vadd.f32 %v934_v28, %v332_v29 }
  0xc1   :  { %v677_v34 = vpack.c.bf16 %v303_v32, %v301_v30  ;;  %v707_v35 = vpack.c.bf16 %v333_v33, %v331_v31 }
  0xc3   :  { %781 = vst [vmem:[%s1059_s3 + $0x18] sm:$0xff] %v677_v34  }
  0xc4   :  { %787 = vst [vmem:[%s1059_s3 + $0x48] sm:$0xff] %v707_v35  }
  0xc5   :  { %v362_v36 = vpop.f32.mrf.mxu2  ;;  %v392_v37 = vpop.f32.mrf.mxu3 }
  0xc6   :  { %v363_v40 = vadd.f32 %v934_v28, %v362_v36  ;;  %v393_v41 = vadd.f32 %v934_v28, %v392_v37  ;;  %v305_v42 = vpop.f32.mrf.mxu0  ;;  %v335_v43 = vpop.f32.mrf.mxu1 }
  0xc7   :  { %v306_v50 = vadd.f32 %v934_v28, %v305_v42  ;;  %v336_v51 = vadd.f32 %v934_v28, %v335_v43 }
  0xc8   :  { %v737_v44 = vpack.c.bf16 %v363_v40, %v361_v38  ;;  %v767_v45 = vpack.c.bf16 %v393_v41, %v391_v39 }
  0xca   :  { %793 = vst [vmem:[%s1059_s3 + $0x78] sm:$0xff] %v737_v44  }
  0xcb   :  { %799 = vst [vmem:[%s1059_s3 + $0xa8] sm:$0xff] %v767_v45  }
  0xcd   :  { %v365_v46 = vpop.f32.mrf.mxu2  ;;  %v395_v47 = vpop.f32.mrf.mxu3 }
  0xce   :  { %v307_v48 = vpop.f32.mrf.mxu0  ;;  %v337_v49 = vpop.f32.mrf.mxu1  ;;  %v366_v58 = vadd.f32 %v934_v28, %v365_v46  ;;  %v396_v59 = vadd.f32 %v934_v28, %v395_v47 }
  0xcf   :  { %v308_v52 = vadd.f32 %v934_v28, %v307_v48  ;;  %v338_v53 = vadd.f32 %v934_v28, %v337_v49 }
  0xd1   :  { %v682_v54 = vpack.c.bf16 %v308_v52, %v306_v50  ;;  %v712_v55 = vpack.c.bf16 %v338_v53, %v336_v51 }
  0xd3   :  { %782 = vst [vmem:[%s1059_s3 + $0x20] sm:$0xff] %v682_v54  }
  0xd4   :  { %788 = vst [vmem:[%s1059_s3 + $0x50] sm:$0xff] %v712_v55  }
  0xd5   :  { %v367_v56 = vpop.f32.mrf.mxu2  ;;  %v397_v57 = vpop.f32.mrf.mxu3 }
  0xd6   :  { %v368_v60 = vadd.f32 %v934_v28, %v367_v56  ;;  %v398_v61 = vadd.f32 %v934_v28, %v397_v57  ;;  %v310_v62 = vpop.f32.mrf.mxu0  ;;  %v340_v63 = vpop.f32.mrf.mxu1 }
  0xd7   :  { %v311_v6 = vadd.f32 %v934_v28, %v310_v62  ;;  %v341_v7 = vadd.f32 %v934_v28, %v340_v63 }
  0xd8   :  { %v742_v0 = vpack.c.bf16 %v368_v60, %v366_v58  ;;  %v772_v1 = vpack.c.bf16 %v398_v61, %v396_v59 }
  0xda   :  { %794 = vst [vmem:[%s1059_s3 + $0x80] sm:$0xff] %v742_v0  }
  0xdb   :  { %800 = vst [vmem:[%s1059_s3 + $0xb0] sm:$0xff] %v772_v1  }
  0xdd   :  { %v370_v2 = vpop.f32.mrf.mxu2  ;;  %v400_v3 = vpop.f32.mrf.mxu3 }
  0xde   :  { %v312_v4 = vpop.f32.mrf.mxu0  ;;  %v342_v5 = vpop.f32.mrf.mxu1  ;;  %v371_v14 = vadd.f32 %v934_v28, %v370_v2  ;;  %v401_v15 = vadd.f32 %v934_v28, %v400_v3 }
  0xdf   :  { %v313_v8 = vadd.f32 %v934_v28, %v312_v4  ;;  %v343_v9 = vadd.f32 %v934_v28, %v342_v5 }
  0xe1   :  { %v687_v10 = vpack.c.bf16 %v313_v8, %v311_v6  ;;  %v717_v11 = vpack.c.bf16 %v343_v9, %v341_v7 }
  0xe3   :  { %783 = vst [vmem:[%s1059_s3 + $0x28] sm:$0xff] %v687_v10  }
  0xe4   :  { %789 = vst [vmem:[%s1059_s3 + $0x58] sm:$0xff] %v717_v11  }
  0xe5   :  { %v372_v12 = vpop.f32.mrf.mxu2  ;;  %v402_v13 = vpop.f32.mrf.mxu3 }
  0xe6   :  { %v373_v16 = vadd.f32 %v934_v28, %v372_v12  ;;  %v403_v17 = vadd.f32 %v934_v28, %v402_v13 }
  0xe8   :  { %v747_v18 = vpack.c.bf16 %v373_v16, %v371_v14  ;;  %v777_v19 = vpack.c.bf16 %v403_v17, %v401_v15 }
  0xea   :  { %795 = vst [vmem:[%s1059_s3 + $0x88] sm:$0xff] %v747_v18  }
  0xeb   :  { %801 = vst [vmem:[%s1059_s3 + $0xb8] sm:$0xff] %v777_v19  }

// kernel: decoder_forward.5
= control target key start
LH: loop header
LB: loop body
LE: loop exit
PB: predicated region body
PF: predicated region fallthrough
CT: control target
= control target key end

     0   :  { %s1288_s15 = smov 0   ;;  %s1290_s16 = smov 0   ;;  %s1555_s0 = inlined_call_operand.vmem [shape: bf16[12,32,128], index: 0, kind: input, shape index: {}]   ;;  %s1556_s1 = inlined_call_operand.vmem [shape: f32[32,32], index: 1, kind: input, shape index: {}]   ;;  %s1557_s2 = inlined_call_operand.vmem [shape: bf16[32,128], index: 2, kind: input, shape index: {}]   ;;  %s1558_s3 = inlined_call_operand.vmem [shape: f32[1,128], index: 3, kind: input, shape index: {}]   ;;  %s1559_s4 = inlined_call_operand.vmem [shape: bf16[12,32,32], index: 4, kind: output, shape index: {}]  }
   0x1   :  { %s1292_s17 = smov 0   ;;  %s1294_s18 = smov 0  }
   0x2   :  { %s1296_s19 = smov 0   ;;  %s1298_s20 = smov 0  }
   0x3   :  { %s1300_s21 = smov 0  }
   0x4 LB: > { %s23_s22 = sadd.s32 1, %s1250_s19  ;;  %s26_s23 = sadd.s32 1, %s1254_s20  ;;  %s1258_s21 = sphi %s1300_s21, %s14_s21   ;;  %s1254_s20 = sphi %s1298_s20, %s1566_s20   ;;  %s1250_s19 = sphi %s1296_s19, %s1565_s19   ;;  %s1246_s18 = sphi %s1294_s18, %s1564_s18   ;;  %s1242_s17 = sphi %s1292_s17, %s1563_s17   ;;  %s1238_s16 = sphi %s1290_s16, %s1562_s16   ;;  %s1234_s15 = sphi %s1288_s15, %s1561_s15  }
   0x5   : > { %p24_p0 = scmp.ge.s32.totalorder %s23_s22, 3  ;;  %s1019_s24 = sadd.s32 4294967295, %s1258_s21  }
   0x6   : > { %p42_p1 = scmp.ne.s32.totalorder %s1238_s16, %s1234_s15  ;;  %p43_p2 = scmp.eq.s32.totalorder %s1258_s21, 0 }
   0x7   : > { %s1568_s22 = smov (%p24_p0, %s23_s22), 0  ;;  %s1570_s23 = smov (!%p24_p0, %s26_s23), %s1254_s20 }
   0x8   : > { %p28_p3 = scmp.ge.s32.totalorder %s1570_s23, 2  ;;  %p142_p4 = scmp.eq.s32.totalorder %s1019_s24, 5 }
   0x9   : > { %s30_s25 = ssub.s32 %s1250_s19, %s1568_s22  ;;  %p44_p5 = por %p43_p2, %p42_p1 }
   0xa   : > { %s1572_s23 = smov (%p28_p3, %s1570_s23), 0  ;;  %p1336_p6 = por %p142_p4, %p42_p1 }
   0xb   : > { %s31_s27 = ssub.s32 %s1254_s20, %s1572_s23  ;;  %s35_s29 = sadd.s32 1, %s1238_s16 }
   0xc   : > { %s32_s28 = sor.u32 %s31_s27, %s30_s25  ;;  %p1022_p8 = scmp.ge.s32.totalorder %s1258_s21, 6 }
   0xd   : > { %p33_p7 = scmp.eq.s32.totalorder %s32_s28, 0 }
   0xe   : > { %170 = sbr.rel (%p1022_p8) target bundleno = 30 (0x1e), region = 24 }
   0xf   : > { %s1344_s30 = scalar_select %p33_p7, %s1238_s16, %s35_s29  }
  0x13   : > { %173 = sbr.rel (!%p44_p5) target bundleno = 30 (0x1e), region = 28  ;;  %s175_s5 = sand.u32 (%p44_p5), 1, %s1238_s16  }
  0x14   : > { %s1025_s6 = sshll.u32 (%p44_p5), %s1254_s20, 1  ;;  %s1023_s7 = sshll.u32 (%p44_p5), %s175_s5, 5 }
  0x15   : > { %s1073_s8 = sshll.u32 (%p44_p5), %s1250_s19, 4  ;;  %s177_s14 = scalar_lea.vmem (%p44_p5), [#allocation3], %s1023_s7 }
  0x16   : > { %s181_s9 = sadd.s32 (%p44_p5), %s1073_s8, %s1025_s6 }
  0x17   : > { %s1027_s10 = sshll.u32 (%p44_p5), %s181_s9, 2 }
  0x18   : > { %s183_s13 = scalar_lea.vmem %s1555_s0, %s1027_s10 }
  0x19   : > { %v200_v0 = vld [vmem:[%s183_s13] sm:$0xff]   ;;  %v204_v1 = vld [vmem:[%s183_s13 + $0x10] sm:$0xff]  }
  0x1a   : > { %v208_v2 = vld [vmem:[%s183_s13 + $0x20] sm:$0xff]   ;;  %201 = vst [vmem:[%s177_s14] sm:$0xff] %v200_v0   ;;  %v212_v3 = vld [vmem:[%s183_s13 + $0x30] sm:$0xff]  }
  0x1b   : > { %205 = vst [vmem:[%s177_s14 + $0x8] sm:$0xff] %v204_v1  }
  0x1c   : > { %209 = vst [vmem:[%s177_s14 + $0x10] sm:$0xff] %v208_v2  }
  0x1d   : > { %213 = vst [vmem:[%s177_s14 + $0x18] sm:$0xff] %v212_v3  }
  0x1e PF: > { %p1028_p9 = scmp.ge.s32.totalorder %s1258_s21, 1  ;;  %p263_p10 = scmp.lt.s32.totalorder %s1258_s21, 7 }
  0x20   : > { %p264_p11 = pnand %p1028_p9, %p263_p10 }
  0x21   : > { %s270_s24 = sand.u32 (!%p264_p11), 1, %s1234_s15   ;;  %s1357_s25 = sshll.u32 (!%p264_p11), %s1246_s18, 1 }
  0x22   : > { %267 = sbr.rel (%p264_p11) target bundleno = 3019 (0xbcb), region = 73  ;;  %s1029_s27 = sshll.u32 (!%p264_p11), %s270_s24, 5 }
  0x23   : > { %p302_p12 = scmp.lt.s32.totalorder (!%p264_p11), %s1357_s25, 3  ;;  %s1364_s8 = scalar_lea.vmem (!%p264_p11), [#allocation3], %s1029_s27 }
  0x24   : > { %s1366_s9 = scalar_lea.vmem (!%p264_p11), [#allocation4], %s1029_s27  ;;  %p1033_p13 = scmp.ne.s32.totalorder (!%p264_p11), %s1242_s17, 0 }
  0x27   : > { %s303_s28 = scalar_select %p302_p12, %s1357_s25, 3 }
  0x28   : > { %313 = sbr.rel (%p1033_p13) target bundleno = 48 (0x30), region = 81 }
  0x29   : > { %s1032_s29 = sshll.u32 %s303_s28, 3 }
  0x2a   : > { %s305_s7 = scalar_lea.vmem %s1556_s1, %s1032_s29 }
  0x2d   : > { %v314_v4 = vld [vmem:[%s305_s7] sm:$0xff]  ;;  %vm316_vm0 = vcmask 261120   ;;  %v315_v5 = vld [vmem:[%s305_s7 + $0x8] sm:$0xff] }
  0x2e   : > { %317 = vst.msk [vmem:[#allocation2] sm:$0xff] %vm316_vm0, %v314_v4 }
  0x2f   : > { %318 = vst.msk [vmem:[#allocation2 + $0x8] sm:$0xff] %vm316_vm0, %v315_v5 }
  0x30 PF: > { %v1075_v6 = vld [vmem:[%s1557_s2 + $0x8] sm:$0xff]  ;;  %v1074_v7 = vld [vmem:[%s1557_s2] sm:$0xff]  ;;  %vm346_vm1 = vcmask 261120   ;;  %s1260_s14 = smov 64   ;;  %v1078_v16 = vld [vmem:[%s1364_s8] sm:$0xff]   ;;  %s1261_s24 = smov 32  }
  0x31   : > { %356 = vmatpush.bf16.msra.mxu0 %v1075_v6  ;;  %488 = vmatpush.bf16.msra.mxu1 %v1075_v6  ;;  %v1385_v11 = vld [vmem:[%s1558_s3] ss:$0 sm:$0xff]  ;;  %v1079_v17 = vunpack.c.l.bf16 %v1078_v16  ;;  %v1080_v20 = vunpack.c.h.bf16 %v1078_v16  ;;  %v1093_v16 = vld [vmem:[%s1364_s8 + $0x8] sm:$0xff]   ;;  %s1262_s27 = smov 96   ;;  %s1076_s28 = sshll.u32 (%p1336_p6), %s1242_s17, 4 }
  0x32   : > { %612 = vmatpush.bf16.msra.mxu2 %v1075_v6  ;;  %736 = vmatpush.bf16.msra.mxu3 %v1075_v6  ;;  %s861_s29 = sadd.s32 (%p1336_p6), %s1076_s28, %s1357_s25 }
  0x33   : > { %s1070_s5 = sshll.u32 (%p1336_p6), %s861_s29, 2 }
  0x35   : > { %v1375_v8 = vld [vmem:[#allocation2] sm:$0xff]  ;;  %357 = vmatpush.bf16.msra.mxu0 %v1074_v7  ;;  %489 = vmatpush.bf16.msra.mxu1 %v1074_v7 }
  0x36   : > { %v1377_v9 = vld [vmem:[#allocation2 + $0x8] sm:$0xff]  ;;  %613 = vmatpush.bf16.msra.mxu2 %v1074_v7  ;;  %737 = vmatpush.bf16.msra.mxu3 %v1074_v7 }
  0x37   : > { %v333_v10 = vpack.c.bf16 %v1377_v9, %v1375_v8 }
  0x39   : > { %1042 = vmatmul.msk.bf16.vlgmr.msra.gmra.mxu0 %vm346_vm1, %v333_v10 }
  0xb6   : > { %v359_v12 = vpop.f32.mrf.mxu0 }
  0xb7   : > { %v360_v13 = vadd.f32 %v1385_v11, %v359_v12 }
  0xb9   : > { %406 = vrot.lane.b32.xlu0 %v360_v13, %s1260_s14  ;;  %v364_v18 = vadd.f32 %v1079_v17, %v360_v13 }
  0xbb   : > { %v1043_v19 = vmul.f32 -1.442695, %v364_v18 }
  0xbd   : > { %1156 = vpow2.f32 %v1043_v19 }
  0xbe   : > { %v361_v14 = vpop.f32.mrf.mxu0 }
  0xbf   : > { %v362_v15 = vadd.f32 %v1385_v11, %v361_v14 }
  0xc1   : > { %408 = vrot.lane.b32.xlu0 %v362_v15, %s1260_s14  ;;  %v365_v21 = vadd.f32 %v1080_v20, %v362_v15 }
  0xc3   : > { %v1044_v22 = vmul.f32 -1.442695, %v365_v21  ;;  %v1157_v23 = vpop.eup %1156 }
  0xc4   : > { %v372_v24 = vadd.f32 1.0, %v1157_v23  ;;  %v1084_v23 = vunpack.c.h.bf16 %v1093_v16 }
  0xc5   : > { %1158 = vpow2.f32 %v1044_v22 }
  0xc6   : > { %1160 = vrcp.f32 %v372_v24  ;;  %v385_v35 = vand.u32 2147483648, %v372_v24  ;;  %vm379_vm3 = vweird.f32 %v372_v24  ;;  %v383_v36 = vand.u32 2147483647, %v372_v24 }
  0xc8   : > { %v386_v39 = vor.u32 1.1754944e-38, %v385_v35  ;;  %vm384_vm5 = vcmp.eq.f32.partialorder %v383_v36, 8.507059e+37 }
  0xcb   : > { %v1159_v25 = vpop.eup %1158 }
  0xcc   : > { %v373_v26 = vadd.f32 1.0, %v1159_v25  ;;  %v1161_v27 = vpop.eup %1160 }
  0xcd   : > { %v375_v28 = vmul.f32 %v1161_v27, %v372_v24  ;;  %vm380_vm2 = vweird.f32 %v1161_v27 }
  0xce   : > { %1162 = vrcp.f32 %v373_v26  ;;  %vm381_vm4 = vmor %vm379_vm3, %vm380_vm2  ;;  %v400_v44 = vand.u32 2147483648, %v373_v26  ;;  %vm394_vm7 = vweird.f32 %v373_v26  ;;  %v398_v45 = vand.u32 2147483647, %v373_v26 }
  0xcf   : > { %v376_v29 = vsub.f32 1.0, %v375_v28 }
  0xd0   : > { %v401_v47 = vor.u32 1.1754944e-38, %v400_v44  ;;  %vm399_vm9 = vcmp.eq.f32.partialorder %v398_v45, 8.507059e+37 }
  0xd1   : > { %v377_v31 = vmul.f32 %v1161_v27, %v376_v29 }
  0xd3   : > { %v378_v33 = vadd.f32 %v1161_v27, %v377_v31 }
  0xd4   : > { %v1163_v30 = vpop.eup %1162 }
  0xd5   : > { %v390_v32 = vmul.f32 %v1163_v30, %v373_v26  ;;  %v382_v37 = vsel %vm381_vm4, %v1161_v27, %v378_v33  ;;  %vm395_vm6 = vweird.f32 %v1163_v30 }
  0xd6   : > { %v387_v41 = vsel %vm384_vm5, %v386_v39, %v382_v37  ;;  %vm396_vm8 = vmor %vm394_vm7, %vm395_vm6 }
  0xd7   : > { %v391_v34 = vsub.f32 1.0, %v390_v32 }
  0xd9   : > { %v392_v38 = vmul.f32 %v1163_v30, %v391_v34 }
  0xdb   : > { %v393_v43 = vadd.f32 %v1163_v30, %v392_v38 }
  0xdd   : > { %v397_v46 = vsel %vm396_vm8, %v1163_v30, %v393_v43 }
  0xde   : > { %v402_v48 = vsel %vm399_vm9, %v401_v47, %v397_v46 }
 0x12b   : > { %v407_v40 = vpop.permute.xlu0 %406 }
 0x12c   : > { %v412_v42 = vmul.f32 %v407_v40, %v387_v41 }
 0x12e   : > { %416 = vrot.lane.b32.xlu1 %v412_v42, %s1260_s14 }
 0x133   : > { %v409_v49 = vpop.permute.xlu0 %408 }
 0x134   : > { %v413_v50 = vmul.f32 %v409_v49, %v402_v48 }
 0x136   : > { %418 = vrot.lane.b32.xlu1 %v413_v50, %s1260_s14 }
 0x1a0   : > { %v417_v51 = vpop.permute.xlu1 %416 }
 0x1a1   : > { %v422_v52 = vadd.f32 %v1079_v17, %v417_v51  ;;  %v1083_v17 = vunpack.c.l.bf16 %v1093_v16  ;;  %v1094_v16 = vld [vmem:[%s1364_s8 + $0x10] sm:$0xff]  }
 0x1a3   : > { %1164 = vtanh.f32 %v422_v52 }
 0x1a8   : > { %v419_v53 = vpop.permute.xlu1 %418 }
 0x1a9   : > { %v1165_v54 = vpop.eup %1164  ;;  %v423_v55 = vadd.f32 %v1080_v20, %v419_v53 }
 0x1aa   : > { %428 = vrot.lane.b32.xlu2 %v1165_v54, %s1260_s14 }
 0x1ab   : > { %1166 = vtanh.f32 %v423_v55 }
 0x1b1   : > { %v1167_v56 = vpop.eup %1166 }
 0x1b2   : > { %430 = vrot.lane.b32.xlu2 %v1167_v56, %s1260_s14 }
 0x204   : > { %v429_v57 = vpop.permute.xlu2 %428 }
 0x205   : > { %v434_v58 = vsub.f32 %v1375_v8, %v429_v57 }
 0x207   : > { %438 = vrot.lane.b32.xlu0 %v434_v58, %s1261_s24 }
 0x20c   : > { %v431_v59 = vpop.permute.xlu2 %430 }
 0x20d   : > { %v435_v60 = vsub.f32 %v1377_v9, %v431_v59 }
 0x20f   : > { %440 = vrot.lane.b32.xlu1 %v435_v60, %s1261_s24 }
 0x279   : > { %v439_v61 = vpop.permute.xlu0 %438 }
 0x27a   : > { %v444_v62 = vmul.f32 %v439_v61, %v387_v41 }
 0x27c   : > { %448 = vrot.lane.b32.xlu2 %v444_v62, %s1261_s24 }
 0x281   : > { %v441_v63 = vpop.permute.xlu1 %440 }
 0x282   : > { %v445_v0 = vmul.f32 %v441_v63, %v402_v48 }
 0x284   : > { %450 = vrot.lane.b32.xlu0 %v445_v0, %s1261_s24 }
 0x2d6   : > { %v449_v1 = vpop.permute.xlu2 %448 }
 0x2d7   : > { %v1402_v2 = vadd.f32 %v1165_v54, %v449_v1 }
 0x2d9   : > { %v1406_v4 = vpack.c.bf16 %v1402_v2, %v1402_v2 }
 0x2db   : > { %v474_v7 = vunpack.c.l.b16 %v1406_v4 }
 0x2f6   : > { %v451_v3 = vpop.permute.xlu0 %450 }
 0x2f7   : > { %v1408_v5 = vadd.f32 %v1167_v56, %v451_v3 }
 0x2f9   : > { %v1412_v6 = vpack.c.bf16 %v1408_v5, %v1408_v5 }
 0x2fb   : > { %v475_v8 = vunpack.c.l.b16 %v1412_v6 }
 0x2fd   : > { %v476_v9 = vpack.c.b16 %v475_v8, %v474_v7 }
 0x2ff   : > { %477 = vrot.lane.b32.xlu1 %v476_v9, %s1260_s14 }
 0x371   : > { %v478_v10 = vpop.permute.xlu1 %477 }
 0x372   : > { %1047 = vmatmul.msk.bf16.vlgmr.msra.gmra.mxu1 %vm346_vm1, %v478_v10 }
 0x3ef   : > { %v491_v12 = vpop.f32.mrf.mxu1 }
 0x3f0   : > { %v492_v13 = vadd.f32 %v1385_v11, %v491_v12 }
 0x3f2   : > { %538 = vrot.lane.b32.xlu2 %v492_v13, %s1260_s14  ;;  %v496_v18 = vadd.f32 %v1083_v17, %v492_v13 }
 0x3f4   : > { %v1048_v19 = vmul.f32 -1.442695, %v496_v18 }
 0x3f6   : > { %1168 = vpow2.f32 %v1048_v19 }
 0x3f7   : > { %v493_v14 = vpop.f32.mrf.mxu1 }
 0x3f8   : > { %v494_v15 = vadd.f32 %v1385_v11, %v493_v14 }
 0x3fa   : > { %540 = vrot.lane.b32.xlu0 %v494_v15, %s1260_s14  ;;  %v497_v25 = vadd.f32 %v1084_v23, %v494_v15 }
 0x3fc   : > { %v1169_v20 = vpop.eup %1168  ;;  %v1049_v27 = vmul.f32 -1.442695, %v497_v25 }
 0x3fd   : > { %v504_v21 = vadd.f32 1.0, %v1169_v20 }
 0x3ff   : > { %1170 = vrcp.f32 %v504_v21  ;;  %v517_v30 = vand.u32 2147483648, %v504_v21  ;;  %vm511_vm11 = vweird.f32 %v504_v21  ;;  %v515_v31 = vand.u32 2147483647, %v504_v21 }
 0x400   : > { %1172 = vpow2.f32 %v1049_v27 }
 0x401   : > { %v518_v34 = vor.u32 1.1754944e-38, %v517_v30  ;;  %vm516_vm13 = vcmp.eq.f32.partialorder %v515_v31, 8.507059e+37 }
 0x405   : > { %v1171_v22 = vpop.eup %1170 }
 0x406   : > { %v507_v24 = vmul.f32 %v1171_v22, %v504_v21  ;;  %vm512_vm10 = vweird.f32 %v1171_v22  ;;  %v1173_v32 = vpop.eup %1172 }
 0x407   : > { %vm513_vm12 = vmor %vm511_vm11, %vm512_vm10  ;;  %v505_v35 = vadd.f32 1.0, %v1173_v32 }
 0x408   : > { %v508_v26 = vsub.f32 1.0, %v507_v24 }
 0x409   : > { %1174 = vrcp.f32 %v505_v35  ;;  %v532_v44 = vand.u32 2147483648, %v505_v35  ;;  %vm526_vm15 = vweird.f32 %v505_v35  ;;  %v530_v45 = vand.u32 2147483647, %v505_v35 }
 0x40a   : > { %v509_v28 = vmul.f32 %v1171_v22, %v508_v26 }
 0x40b   : > { %v533_v47 = vor.u32 1.1754944e-38, %v532_v44  ;;  %vm531_vm2 = vcmp.eq.f32.partialorder %v530_v45, 8.507059e+37 }
 0x40c   : > { %v510_v29 = vadd.f32 %v1171_v22, %v509_v28 }
 0x40e   : > { %v514_v33 = vsel %vm513_vm12, %v1171_v22, %v510_v29 }
 0x40f   : > { %v519_v37 = vsel %vm516_vm13, %v518_v34, %v514_v33  ;;  %v1175_v39 = vpop.eup %1174 }
 0x410   : > { %v522_v40 = vmul.f32 %v1175_v39, %v505_v35  ;;  %vm527_vm14 = vweird.f32 %v1175_v39 }
 0x411   : > { %vm528_vm0 = vmor %vm526_vm15, %vm527_vm14 }
 0x412   : > { %v523_v41 = vsub.f32 1.0, %v522_v40 }
 0x414   : > { %v524_v42 = vmul.f32 %v1175_v39, %v523_v41 }
 0x416   : > { %v525_v43 = vadd.f32 %v1175_v39, %v524_v42 }
 0x418   : > { %v529_v46 = vsel %vm528_vm0, %v1175_v39, %v525_v43 }
 0x419   : > { %v534_v49 = vsel %vm531_vm2, %v533_v47, %v529_v46 }
 0x44c   : > { %v539_v36 = vpop.permute.xlu2 %538 }
 0x44d   : > { %v544_v38 = vmul.f32 %v539_v36, %v519_v37 }
 0x44f   : > { %548 = vrot.lane.b32.xlu1 %v544_v38, %s1260_s14 }
 0x46c   : > { %v541_v48 = vpop.permute.xlu0 %540 }
 0x46d   : > { %v545_v50 = vmul.f32 %v541_v48, %v534_v49 }
 0x46f   : > { %550 = vrot.lane.b32.xlu2 %v545_v50, %s1260_s14 }
 0x4c1   : > { %v549_v51 = vpop.permute.xlu1 %548 }
 0x4c2   : > { %v554_v52 = vadd.f32 %v1083_v17, %v549_v51  ;;  %v1087_v17 = vunpack.c.l.bf16 %v1094_v16 }
 0x4c4   : > { %1176 = vtanh.f32 %v554_v52 }
 0x4c9   : > { %v551_v53 = vpop.permute.xlu2 %550 }
 0x4ca   : > { %v1177_v54 = vpop.eup %1176  ;;  %v555_v55 = vadd.f32 %v1084_v23, %v551_v53  ;;  %v1088_v23 = vunpack.c.h.bf16 %v1094_v16 }
 0x4cb   : > { %v558_v56 = vsub.f32 %v1402_v2, %v1177_v54 }
 0x4cc   : > { %1178 = vtanh.f32 %v555_v55 }
 0x4cd   : > { %562 = vrot.lane.b32.xlu0 %v558_v56, %s1262_s27 }
 0x4d2   : > { %v1179_v57 = vpop.eup %1178 }
 0x4d3   : > { %v559_v58 = vsub.f32 %v1408_v5, %v1179_v57 }
 0x4d5   : > { %564 = vrot.lane.b32.xlu1 %v559_v58, %s1262_s27 }
 0x53f   : > { %v563_v59 = vpop.permute.xlu0 %562 }
 0x540   : > { %v568_v60 = vmul.f32 %v563_v59, %v519_v37 }
 0x542   : > { %572 = vrot.lane.b32.xlu2 %v568_v60, %s1261_s24 }
 0x547   : > { %v565_v61 = vpop.permute.xlu1 %564 }
 0x548   : > { %v569_v62 = vmul.f32 %v565_v61, %v534_v49 }
 0x54a   : > { %574 = vrot.lane.b32.xlu0 %v569_v62, %s1261_s24 }
 0x59c   : > { %v573_v63 = vpop.permute.xlu2 %572 }
 0x59d   : > { %v1431_v0 = vadd.f32 %v1177_v54, %v573_v63 }
 0x59f   : > { %v1435_v2 = vpack.c.bf16 %v1431_v0, %v1431_v0 }
 0x5a1   : > { %v598_v7 = vunpack.c.l.b16 %v1435_v2 }
 0x5bc   : > { %v575_v1 = vpop.permute.xlu0 %574 }
 0x5bd   : > { %v1437_v3 = vadd.f32 %v1179_v57, %v575_v1 }
 0x5bf   : > { %v1441_v5 = vpack.c.bf16 %v1437_v3, %v1437_v3 }
 0x5c1   : > { %v599_v8 = vunpack.c.l.b16 %v1441_v5 }
 0x5c3   : > { %v600_v9 = vpack.c.b16 %v599_v8, %v598_v7 }
 0x5c5   : > { %601 = vrot.lane.b32.xlu1 %v600_v9, %s1260_s14 }
 0x637   : > { %v602_v10 = vpop.permute.xlu1 %601 }
 0x638   : > { %1054 = vmatmul.msk.bf16.vlgmr.msra.gmra.mxu2 %vm346_vm1, %v602_v10 }
 0x6bb   : > { %v615_v12 = vpop.f32.mrf.mxu2 }
 0x6bc   : > { %v616_v13 = vadd.f32 %v1385_v11, %v615_v12 }
 0x6be   : > { %662 = vrot.lane.b32.xlu2 %v616_v13, %s1260_s14  ;;  %v620_v18 = vadd.f32 %v1087_v17, %v616_v13 }
 0x6c0   : > { %v1055_v19 = vmul.f32 -1.442695, %v620_v18  ;;  %v1095_v18 = vld [vmem:[%s1364_s8 + $0x18] sm:$0xff]   ;;  %s863_s8 = scalar_lea.vmem (%p1336_p6), %s1559_s4, %s1070_s5 }
 0x6c2   : > { %1180 = vpow2.f32 %v1055_v19  ;;  %v1091_v19 = vunpack.c.l.bf16 %v1095_v18 }
 0x6c3   : > { %v617_v14 = vpop.f32.mrf.mxu2 }
 0x6c4   : > { %v618_v15 = vadd.f32 %v1385_v11, %v617_v14 }
 0x6c6   : > { %664 = vrot.lane.b32.xlu0 %v618_v15, %s1260_s14  ;;  %v621_v25 = vadd.f32 %v1088_v23, %v618_v15 }
 0x6c8   : > { %v1181_v20 = vpop.eup %1180  ;;  %v1056_v27 = vmul.f32 -1.442695, %v621_v25  ;;  %v1092_v25 = vunpack.c.h.bf16 %v1095_v18 }
 0x6c9   : > { %v628_v21 = vadd.f32 1.0, %v1181_v20 }
 0x6cb   : > { %1182 = vrcp.f32 %v628_v21  ;;  %v641_v30 = vand.u32 2147483648, %v628_v21  ;;  %vm635_vm4 = vweird.f32 %v628_v21  ;;  %v639_v31 = vand.u32 2147483647, %v628_v21 }
 0x6cc   : > { %1184 = vpow2.f32 %v1056_v27 }
 0x6cd   : > { %v642_v34 = vor.u32 1.1754944e-38, %v641_v30  ;;  %vm640_vm6 = vcmp.eq.f32.partialorder %v639_v31, 8.507059e+37 }
 0x6d1   : > { %v1183_v22 = vpop.eup %1182 }
 0x6d2   : > { %v631_v24 = vmul.f32 %v1183_v22, %v628_v21  ;;  %vm636_vm3 = vweird.f32 %v1183_v22  ;;  %v1185_v32 = vpop.eup %1184 }
 0x6d3   : > { %vm637_vm5 = vmor %vm635_vm4, %vm636_vm3  ;;  %v629_v35 = vadd.f32 1.0, %v1185_v32  ;;  %vm466_vm4 = vcmask 257024  }
 0x6d4   : > { %v632_v26 = vsub.f32 1.0, %v631_v24 }
 0x6d5   : > { %1186 = vrcp.f32 %v629_v35  ;;  %v656_v44 = vand.u32 2147483648, %v629_v35  ;;  %vm650_vm8 = vweird.f32 %v629_v35  ;;  %v654_v45 = vand.u32 2147483647, %v629_v35 }
 0x6d6   : > { %v633_v28 = vmul.f32 %v1183_v22, %v632_v26 }
 0x6d7   : > { %v657_v47 = vor.u32 1.1754944e-38, %v656_v44  ;;  %vm655_vm10 = vcmp.eq.f32.partialorder %v654_v45, 8.507059e+37 }
 0x6d8   : > { %v634_v29 = vadd.f32 %v1183_v22, %v633_v28 }
 0x6da   : > { %v638_v33 = vsel %vm637_vm5, %v1183_v22, %v634_v29 }
 0x6db   : > { %v643_v37 = vsel %vm640_vm6, %v642_v34, %v638_v33  ;;  %v1187_v39 = vpop.eup %1186 }
 0x6dc   : > { %v646_v40 = vmul.f32 %v1187_v39, %v629_v35  ;;  %vm651_vm7 = vweird.f32 %v1187_v39 }
 0x6dd   : > { %vm652_vm9 = vmor %vm650_vm8, %vm651_vm7 }
 0x6de   : > { %v647_v41 = vsub.f32 1.0, %v646_v40 }
 0x6e0   : > { %v648_v42 = vmul.f32 %v1187_v39, %v647_v41 }
 0x6e2   : > { %v649_v43 = vadd.f32 %v1187_v39, %v648_v42 }
 0x6e4   : > { %v653_v46 = vsel %vm652_vm9, %v1187_v39, %v649_v43 }
 0x6e5   : > { %v658_v49 = vsel %vm655_vm10, %v657_v47, %v653_v46 }
 0x718   : > { %v663_v36 = vpop.permute.xlu2 %662 }
 0x719   : > { %v668_v38 = vmul.f32 %v663_v36, %v643_v37 }
 0x71b   : > { %672 = vrot.lane.b32.xlu1 %v668_v38, %s1260_s14 }
 0x738   : > { %v665_v48 = vpop.permute.xlu0 %664 }
 0x739   : > { %v669_v50 = vmul.f32 %v665_v48, %v658_v49 }
 0x73b   : > { %674 = vrot.lane.b32.xlu2 %v669_v50, %s1260_s14 }
 0x78d   : > { %v673_v51 = vpop.permute.xlu1 %672 }
 0x78e   : > { %v678_v52 = vadd.f32 %v1087_v17, %v673_v51 }
 0x790   : > { %1188 = vtanh.f32 %v678_v52 }
 0x795   : > { %v675_v53 = vpop.permute.xlu2 %674 }
 0x796   : > { %v1189_v54 = vpop.eup %1188  ;;  %v679_v55 = vadd.f32 %v1088_v23, %v675_v53 }
 0x797   : > { %v682_v56 = vsub.f32 %v1431_v0, %v1189_v54 }
 0x798   : > { %1190 = vtanh.f32 %v679_v55 }
 0x799   : > { %686 = vrot.lane.b32.xlu0 %v682_v56, %s1262_s27 }
 0x79e   : > { %v1191_v57 = vpop.eup %1190 }
 0x79f   : > { %v683_v58 = vsub.f32 %v1437_v3, %v1191_v57 }
 0x7a1   : > { %688 = vrot.lane.b32.xlu1 %v683_v58, %s1262_s27 }
 0x80b   : > { %v687_v59 = vpop.permute.xlu0 %686 }
 0x80c   : > { %v692_v60 = vmul.f32 %v687_v59, %v643_v37 }
 0x80e   : > { %696 = vrot.lane.b32.xlu2 %v692_v60, %s1261_s24 }
 0x813   : > { %v689_v61 = vpop.permute.xlu1 %688 }
 0x814   : > { %v693_v62 = vmul.f32 %v689_v61, %v658_v49 }
 0x816   : > { %698 = vrot.lane.b32.xlu0 %v693_v62, %s1261_s24 }
 0x868   : > { %v697_v63 = vpop.permute.xlu2 %696 }
 0x869   : > { %v1460_v1 = vadd.f32 %v1189_v54, %v697_v63 }
 0x86b   : > { %v1464_v7 = vpack.c.bf16 %v1460_v1, %v1460_v1 }
 0x86d   : > { %v722_v9 = vunpack.c.l.b16 %v1464_v7 }
 0x888   : > { %v699_v0 = vpop.permute.xlu0 %698 }
 0x889   : > { %v1466_v3 = vadd.f32 %v1191_v57, %v699_v0 }
 0x88b   : > { %v1470_v8 = vpack.c.bf16 %v1466_v3, %v1466_v3 }
 0x88d   : > { %v723_v10 = vunpack.c.l.b16 %v1470_v8 }
 0x88f   : > { %v724_v12 = vpack.c.b16 %v723_v10, %v722_v9 }
 0x891   : > { %725 = vrot.lane.b32.xlu1 %v724_v12, %s1260_s14 }
 0x903   : > { %v726_v13 = vpop.permute.xlu1 %725 }
 0x904   : > { %1061 = vmatmul.msk.bf16.vlgmr.msra.gmra.mxu3 %vm346_vm1, %v726_v13 }
 0x987   : > { %v739_v14 = vpop.f32.mrf.mxu3 }
 0x988   : > { %v740_v15 = vadd.f32 %v1385_v11, %v739_v14 }
 0x98a   : > { %786 = vrot.lane.b32.xlu2 %v740_v15, %s1260_s14  ;;  %v744_v20 = vadd.f32 %v1091_v19, %v740_v15 }
 0x98c   : > { %v1062_v21 = vmul.f32 -1.442695, %v744_v20 }
 0x98e   : > { %1192 = vpow2.f32 %v1062_v21 }
 0x98f   : > { %v741_v16 = vpop.f32.mrf.mxu3 }
 0x990   : > { %v742_v17 = vadd.f32 %v1385_v11, %v741_v16 }
 0x992   : > { %788 = vrot.lane.b32.xlu0 %v742_v17, %s1260_s14  ;;  %v745_v27 = vadd.f32 %v1092_v25, %v742_v17 }
 0x994   : > { %v1193_v22 = vpop.eup %1192  ;;  %v1063_v29 = vmul.f32 -1.442695, %v745_v27 }
 0x995   : > { %v752_v23 = vadd.f32 1.0, %v1193_v22 }
 0x997   : > { %1194 = vrcp.f32 %v752_v23  ;;  %v765_v11 = vand.u32 2147483648, %v752_v23  ;;  %vm759_vm12 = vweird.f32 %v752_v23  ;;  %v763_v32 = vand.u32 2147483647, %v752_v23 }
 0x998   : > { %1196 = vpow2.f32 %v1063_v29 }
 0x999   : > { %v766_v35 = vor.u32 1.1754944e-38, %v765_v11  ;;  %vm764_vm14 = vcmp.eq.f32.partialorder %v763_v32, 8.507059e+37 }
 0x99d   : > { %v1195_v24 = vpop.eup %1194 }
 0x99e   : > { %v755_v26 = vmul.f32 %v1195_v24, %v752_v23  ;;  %vm760_vm11 = vweird.f32 %v1195_v24  ;;  %v1197_v33 = vpop.eup %1196 }
 0x99f   : > { %vm761_vm13 = vmor %vm759_vm12, %vm760_vm11  ;;  %v753_v36 = vadd.f32 1.0, %v1197_v33 }
 0x9a0   : > { %v756_v28 = vsub.f32 1.0, %v755_v26 }
 0x9a1   : > { %1198 = vrcp.f32 %v753_v36  ;;  %v780_v45 = vand.u32 2147483648, %v753_v36  ;;  %vm774_vm0 = vweird.f32 %v753_v36  ;;  %v778_v46 = vand.u32 2147483647, %v753_v36 }
 0x9a2   : > { %v757_v30 = vmul.f32 %v1195_v24, %v756_v28 }
 0x9a3   : > { %v781_v48 = vor.u32 1.1754944e-38, %v780_v45  ;;  %vm779_vm3 = vcmp.eq.f32.partialorder %v778_v46, 8.507059e+37 }
 0x9a4   : > { %v758_v31 = vadd.f32 %v1195_v24, %v757_v30 }
 0x9a6   : > { %v762_v34 = vsel %vm761_vm13, %v1195_v24, %v758_v31 }
 0x9a7   : > { %v767_v38 = vsel %vm764_vm14, %v766_v35, %v762_v34  ;;  %v1199_v40 = vpop.eup %1198 }
 0x9a8   : > { %v770_v41 = vmul.f32 %v1199_v40, %v753_v36  ;;  %vm775_vm15 = vweird.f32 %v1199_v40 }
 0x9a9   : > { %vm776_vm2 = vmor %vm774_vm0, %vm775_vm15 }
 0x9aa   : > { %v771_v42 = vsub.f32 1.0, %v770_v41 }
 0x9ac   : > { %v772_v43 = vmul.f32 %v1199_v40, %v771_v42 }
 0x9ae   : > { %v773_v44 = vadd.f32 %v1199_v40, %v772_v43 }
 0x9b0   : > { %v777_v47 = vsel %vm776_vm2, %v1199_v40, %v773_v44 }
 0x9b1   : > { %v782_v50 = vsel %vm779_vm3, %v781_v48, %v777_v47 }
 0x9e4   : > { %v787_v37 = vpop.permute.xlu2 %786 }
 0x9e5   : > { %v792_v39 = vmul.f32 %v787_v37, %v767_v38 }
 0x9e7   : > { %796 = vrot.lane.b32.xlu1 %v792_v39, %s1260_s14 }
 0xa04   : > { %v789_v49 = vpop.permute.xlu0 %788 }
 0xa05   : > { %v793_v51 = vmul.f32 %v789_v49, %v782_v50 }
 0xa07   : > { %798 = vrot.lane.b32.xlu2 %v793_v51, %s1260_s14 }
 0xa59   : > { %v797_v52 = vpop.permute.xlu1 %796 }
 0xa5a   : > { %v802_v53 = vadd.f32 %v1091_v19, %v797_v52 }
 0xa5c   : > { %1200 = vtanh.f32 %v802_v53 }
 0xa61   : > { %v799_v54 = vpop.permute.xlu2 %798 }
 0xa62   : > { %v1201_v55 = vpop.eup %1200  ;;  %v803_v56 = vadd.f32 %v1092_v25, %v799_v54 }
 0xa63   : > { %v806_v57 = vsub.f32 %v1460_v1, %v1201_v55 }
 0xa64   : > { %1202 = vtanh.f32 %v803_v56 }
 0xa65   : > { %810 = vrot.lane.b32.xlu0 %v806_v57, %s1262_s27 }
 0xa6a   : > { %v1203_v58 = vpop.eup %1202 }
 0xa6b   : > { %v807_v59 = vsub.f32 %v1466_v3, %v1203_v58 }
 0xa6d   : > { %812 = vrot.lane.b32.xlu1 %v807_v59, %s1262_s27 }
 0xa75   : > { %460 = vrot.lane.b32.xlu1 %v1406_v4, %s1260_s14 }
 0xa7d   : > { %586 = vrot.lane.b32.xlu1 %v1441_v5, %s1260_s14 }
 0xad7   : > { %v811_v60 = vpop.permute.xlu0 %810 }
 0xad8   : > { %v816_v61 = vmul.f32 %v811_v60, %v767_v38 }
 0xada   : > { %820 = vrot.lane.b32.xlu2 %v816_v61, %s1261_s24 }
 0xadf   : > { %v813_v62 = vpop.permute.xlu1 %812 }
 0xae0   : > { %v817_v63 = vmul.f32 %v813_v62, %v782_v50 }
 0xae2   : > { %462 = vrot.lane.b32.xlu2 %v1412_v6, %s1260_s14  ;;  %822 = vrot.lane.b32.xlu0 %v817_v63, %s1261_s24 }
 0xae7   : > { %v461_v1 = vpop.permute.xlu1 %460 }
 0xae8   : > { %467 = vst.msk [vmem:[%s1366_s9] sm:$0xf] %vm466_vm4, %v461_v1 }
 0xaea   : > { %708 = vrot.lane.b32.xlu2 %v1464_v7, %s1260_s14  ;;  %584 = vrot.lane.b32.xlu0 %v1435_v2, %s1260_s14 }
 0xaef   : > { %v587_v4 = vpop.permute.xlu1 %586 }
 0xaf0   : > { %1051 = vst.msk [vmem:[%s1366_s9 + $0xc] sm:$0xf] %vm466_vm4, %v587_v4 }
 0xaf2   : > { %710 = vrot.lane.b32.xlu0 %v1470_v8, %s1260_s14 }
 0xb34   : > { %v821_v6 = vpop.permute.xlu2 %820 }
 0xb35   : > { %v826_v5 = vadd.f32 %v1201_v55, %v821_v6 }
 0xb37   : > { %v828_v0 = vpack.c.bf16 %v826_v5, %v826_v5  ;;  %843 = vrot.lane.b32.xlu0 %v826_v5, %s1260_s14 }
 0xb39   : > { %832 = vrot.lane.b32.xlu1 %v828_v0, %s1260_s14 }
 0xb3c   : > { %v463_v3 = vpop.permute.xlu2 %462 }
 0xb3d   : > { %468 = vst.msk [vmem:[%s1366_s9 + $0x4] sm:$0xf] %vm466_vm4, %v463_v3 }
 0xb44   : > { %v709_v2 = vpop.permute.xlu2 %708  ;;  %v880_v17 = vld [vmem:[%s1366_s9] sm:$0xff] (%p1336_p6)  }
 0xb45   : > { %1057 = vst.msk [vmem:[%s1366_s9 + $0x10] sm:$0xf] %vm466_vm4, %v709_v2 }
 0xb46   : > { %881 = vst [vmem:[%s863_s8] sm:$0xff] (%p1336_p6), %v880_v17  }
 0xb54   : > { %v823_v7 = vpop.permute.xlu0 %822 }
 0xb55   : > { %v827_v9 = vadd.f32 %v1203_v58, %v823_v7 }
 0xb57   : > { %v829_v8 = vpack.c.bf16 %v827_v9, %v827_v9  ;;  %845 = vrot.lane.b32.xlu1 %v827_v9, %s1260_s14 }
 0xb59   : > { %834 = vrot.lane.b32.xlu2 %v829_v8, %s1260_s14 }
 0xb5c   : > { %v585_v10 = vpop.permute.xlu0 %584 }
 0xb5d   : > { %1050 = vst.msk [vmem:[%s1366_s9 + $0x8] sm:$0xf] %vm466_vm4, %v585_v10 }
 0xb64   : > { %v711_v12 = vpop.permute.xlu0 %710  ;;  %v884_v18 = vld [vmem:[%s1366_s9 + $0x8] sm:$0xff] (%p1336_p6)  }
 0xb65   : > { %1058 = vst.msk [vmem:[%s1366_s9 + $0x14] sm:$0xf] %vm466_vm4, %v711_v12 }
 0xb66   : > { %885 = vst [vmem:[%s863_s8 + $0x10] sm:$0xff] (%p1336_p6), %v884_v18  }
 0xb6c   : > { %v888_v19 = vld [vmem:[%s1366_s9 + $0x10] sm:$0xff] (%p1336_p6)  }
 0xb6d   : > { %889 = vst [vmem:[%s863_s8 + $0x20] sm:$0xff] (%p1336_p6), %v888_v19  }
 0xba9   : > { %v844_v13 = vpop.permute.xlu0 %843 }
 0xbaa   : > { %849 = vst.msk [vmem:[#allocation2] sm:$0xff] %vm346_vm1, %v844_v13 }
 0xbab   : > { %v833_v14 = vpop.permute.xlu1 %832 }
 0xbac   : > { %1064 = vst.msk [vmem:[%s1366_s9 + $0x18] sm:$0xf] %vm466_vm4, %v833_v14 }
 0xbb3   : > { %v835_v15 = vpop.permute.xlu2 %834 }
 0xbb4   : > { %1065 = vst.msk [vmem:[%s1366_s9 + $0x1c] sm:$0xf] %vm466_vm4, %v835_v15 }
 0xbbb   : > { %v892_v20 = vld [vmem:[%s1366_s9 + $0x18] sm:$0xff] (%p1336_p6)  }
 0xbbc   : > { %893 = vst [vmem:[%s863_s8 + $0x30] sm:$0xff] (%p1336_p6), %v892_v20  }
 0xbc6   : > { %857 = sbr.rel (!%p1336_p6) target bundleno = 3019 (0xbcb), region = 85 }
 0xbc9   : > { %v846_v16 = vpop.permute.xlu1 %845 }
 0xbca   : > { %850 = vst.msk [vmem:[#allocation2 + $0x8] sm:$0xff] %vm346_vm1, %v846_v16 }
 0xbcb PF: > { %s14_s21 = sadd.s32 1, %s1258_s21   ;;  %s1561_s15 = smov %s1238_s16 }
 0xbcc   : > { %p11_p0 = scmp.ge.s32.totalorder %s14_s21, 8   ;;  %s1562_s16 = smov %s1344_s30 }
 0xbcd   : > { %s1563_s17 = smov %s1250_s19  ;;  %s1564_s18 = smov %s1254_s20 }
 0xbce   : > { %s1565_s19 = smov %s1568_s22  ;;  %s1566_s20 = smov %s1572_s23 }
 0xbcf   :  { %13 = sbr.rel (!%p11_p0) target bundleno = 4 (0x4), region = 166 }

// kernel: decoder_forward.7
= control target key start
LH: loop header
LB: loop body
LE: loop exit
PB: predicated region body
PF: predicated region fallthrough
CT: control target
= control target key end

     0   :  { %v757_v0 = vmov 0   ;;  %vm146_vm0 = vcmask 261120   ;;  %s1236_s3 = inlined_call_operand.vmem [shape: f32[224,1], index: 3, kind: input, shape index: {}]   ;;  %s1237_s1 = inlined_call_operand.vmem [shape: bf16[32,256], index: 1, kind: input, shape index: {}]   ;;  %s1238_s0 = inlined_call_operand.vmem [shape: bf16[224,32], index: 0, kind: input, shape index: {}]   ;;  %s1239_s2 = inlined_call_operand.vmem [shape: f32[1,256], index: 2, kind: input, shape index: {}]   ;;  %s1240_s4 = inlined_call_operand.vmem [shape: f32[224,256], index: 4, kind: output, shape index: {}]  }
   0x1   :  { %754 = vset.pattern.permute.xlu0 %v757_v0  ;;  %v347_v1 = vld [vmem:[%s1236_s3] sm:$0xff]  ;;  %v697_v2 = vld [vmem:[%s1237_s1 + $0x10] sm:$0xf]  ;;  %v748_v3 = vld [vmem:[%s1237_s1 + $0x14] sm:$0xf0]  ;;  %755 = vset.pattern.permute.xlu1 %v757_v0 }
   0x2   :  { %377 = vperm.xlu0 %754, %v347_v1   ;;  %v698_v4 = vor.u32 %v748_v3, %v697_v2  ;;  %v747_v5 = vld [vmem:[%s1237_s1 + $0x14] sm:$0xf]  ;;  %v699_v6 = vld [vmem:[%s1237_s1 + $0x18] sm:$0xf0]  ;;  %756 = vset.pattern.permute.xlu2 %v757_v0  ;;  %v689_v9 = vld [vmem:[%s1237_s1] sm:$0xf] }
   0x3   :  { %v349_v7 = vld [vmem:[%s1236_s3 + $0x10] sm:$0xff]  ;;  %v702_v8 = vor.u32 %v747_v5, %v699_v6  ;;  %v746_v10 = vld [vmem:[%s1237_s1 + $0x4] sm:$0xf0]  ;;  %v745_v11 = vld [vmem:[%s1237_s1 + $0x4] sm:$0xf] }
   0x4   :  { %387 = vperm.xlu1 %755, %v349_v7   ;;  %195 = vmatpush.bf16.msra.mxu0 %v698_v4  ;;  %v690_v12 = vor.u32 %v746_v10, %v689_v9  ;;  %v691_v13 = vld [vmem:[%s1237_s1 + $0x8] sm:$0xf0]  ;;  %v351_v15 = vld [vmem:[%s1236_s3 + $0x20] sm:$0xff]  ;;  %v738_v18 = vld [vmem:[%s1238_s0 + $0x38] sm:$0xff] }
   0x5   :  { %749 = vmatpush.bf16.msra.mxu2 %v698_v4  ;;  %274 = vmatpush.bf16.msra.mxu1 %v702_v8  ;;  %v694_v14 = vor.u32 %v745_v11, %v691_v13  ;;  %v348_v16 = vld [vmem:[%s1236_s3 + $0x8] sm:$0xff]  ;;  %v731_v17 = vld [vmem:[%s1238_s0] sm:$0xff]  ;;  %v350_v19 = vld [vmem:[%s1236_s3 + $0x18] sm:$0xff] }
   0x6   :  { %751 = vmatpush.bf16.msra.mxu3 %v702_v8  ;;  %397 = vperm.xlu2 %756, %v351_v15   ;;  %v352_v20 = vld [vmem:[%s1236_s3 + $0x28] sm:$0xff]  ;;  %v353_v21 = vld [vmem:[%s1236_s3 + $0x30] sm:$0xff]  ;;  %v354_v22 = vld [vmem:[%s1236_s3 + $0x38] sm:$0xff] }
   0x7   :  { %v355_v23 = vld [vmem:[%s1236_s3 + $0x40] sm:$0xff]  ;;  %v356_v24 = vld [vmem:[%s1236_s3 + $0x48] sm:$0xff]  ;;  %v357_v27 = vld [vmem:[%s1236_s3 + $0x50] sm:$0xff] }
   0x8   :  { %196 = vmatpush.bf16.msra.mxu0 %v690_v12  ;;  %v732_v25 = vld [vmem:[%s1238_s0 + $0x8] sm:$0xff]  ;;  %v739_v26 = vld [vmem:[%s1238_s0 + $0x40] sm:$0xff]  ;;  %v358_v28 = vld [vmem:[%s1236_s3 + $0x58] sm:$0xff] }
   0x9   :  { %750 = vmatpush.bf16.msra.mxu2 %v690_v12  ;;  %275 = vmatpush.bf16.msra.mxu1 %v694_v14  ;;  %v359_v29 = vld [vmem:[%s1236_s3 + $0x60] sm:$0xff]  ;;  %v360_v30 = vld [vmem:[%s1236_s3 + $0x68] sm:$0xff]  ;;  %v361_v31 = vld [vmem:[%s1236_s3 + $0x70] sm:$0xff] }
   0xa   :  { %752 = vmatpush.bf16.msra.mxu3 %v694_v14  ;;  %382 = vperm.xlu0 %754, %v348_v16   ;;  %v362_v32 = vld [vmem:[%s1236_s3 + $0x78] sm:$0xff]  ;;  %v733_v33 = vld [vmem:[%s1238_s0 + $0x10] sm:$0xff]  ;;  %v740_v34 = vld [vmem:[%s1238_s0 + $0x48] sm:$0xff] }
   0xb   :  { %703 = vmatmul.msk.bf16.vlgmr.msra.gmra.mxu0 %vm146_vm0, %v731_v17  ;;  %v363_v35 = vld [vmem:[%s1236_s3 + $0x80] sm:$0xff]  ;;  %v364_v36 = vld [vmem:[%s1236_s3 + $0x88] sm:$0xff]  ;;  %v365_v37 = vld [vmem:[%s1236_s3 + $0x90] sm:$0xff] }
   0xc   :  { %710 = vmatmul.msk.bf16.vlgmr.msra.gmra.mxu2 %vm146_vm0, %v738_v18  ;;  %717 = vmatmul.msk.bf16.vlgmr.msra.gmra.mxu1 %vm146_vm0, %v731_v17  ;;  %v366_v38 = vld [vmem:[%s1236_s3 + $0x98] sm:$0xff]  ;;  %v367_v39 = vld [vmem:[%s1236_s3 + $0xa0] sm:$0xff]  ;;  %v368_v40 = vld [vmem:[%s1236_s3 + $0xa8] sm:$0xff] }
   0xd   :  { %724 = vmatmul.msk.bf16.vlgmr.msra.gmra.mxu3 %vm146_vm0, %v738_v18  ;;  %392 = vperm.xlu1 %755, %v350_v19   ;;  %v734_v41 = vld [vmem:[%s1238_s0 + $0x18] sm:$0xff]  ;;  %v741_v42 = vld [vmem:[%s1238_s0 + $0x50] sm:$0xff]  ;;  %v371_v45 = vld [vmem:[%s1236_s3 + $0xc0] sm:$0xff] }
   0xe   :  { %402 = vperm.xlu2 %756, %v352_v20   ;;  %v369_v43 = vld [vmem:[%s1236_s3 + $0xb0] sm:$0xff]  ;;  %v370_v44 = vld [vmem:[%s1236_s3 + $0xb8] sm:$0xff]  ;;  %v372_v46 = vld [vmem:[%s1236_s3 + $0xc8] sm:$0xff] }
   0xf   :  { %v373_v47 = vld [vmem:[%s1236_s3 + $0xd0] sm:$0xff]  ;;  %v374_v48 = vld [vmem:[%s1236_s3 + $0xd8] sm:$0xff]  ;;  %v735_v49 = vld [vmem:[%s1238_s0 + $0x20] sm:$0xff] }
  0x10   :  { %v742_v50 = vld [vmem:[%s1238_s0 + $0x58] sm:$0xff]  ;;  %v736_v51 = vld [vmem:[%s1238_s0 + $0x28] sm:$0xff]  ;;  %v743_v52 = vld [vmem:[%s1238_s0 + $0x60] sm:$0xff] }
  0x11   :  { %v737_v54 = vld [vmem:[%s1238_s0 + $0x30] sm:$0xff]  ;;  %v744_v55 = vld [vmem:[%s1238_s0 + $0x68] sm:$0xff]  ;;  %v50_v62 = vld [vmem:[%s1239_s2] sm:$0x3] }
  0x12   :  { %407 = vperm.xlu0 %754, %v353_v21   ;;  %v976_v1 = vperm.slane %v50_v62, 0  ;;  %v978_v2 = vperm.slane %v50_v62, 1 }
  0x15   :  { %412 = vperm.xlu1 %755, %v354_v22  }
  0x16   :  { %417 = vperm.xlu2 %756, %v355_v23  }
  0x1a   :  { %422 = vperm.xlu0 %754, %v356_v24  }
  0x1b   :  { %704 = vmatmul.msk.bf16.gmra.mxu0 %vm146_vm0, %v732_v25 }
  0x1c   :  { %711 = vmatmul.msk.bf16.gmra.mxu2 %vm146_vm0, %v739_v26  ;;  %718 = vmatmul.msk.bf16.gmra.mxu1 %vm146_vm0, %v732_v25 }
  0x1d   :  { %725 = vmatmul.msk.bf16.gmra.mxu3 %vm146_vm0, %v739_v26  ;;  %427 = vperm.xlu1 %755, %v357_v27  }
  0x1e   :  { %432 = vperm.xlu2 %756, %v358_v28  }
  0x22   :  { %437 = vperm.xlu0 %754, %v359_v29  }
  0x25   :  { %442 = vperm.xlu1 %755, %v360_v30  }
  0x26   :  { %447 = vperm.xlu2 %756, %v361_v31  }
  0x2a   :  { %452 = vperm.xlu0 %754, %v362_v32  }
  0x2b   :  { %705 = vmatmul.msk.bf16.gmra.mxu0 %vm146_vm0, %v733_v33 }
  0x2c   :  { %712 = vmatmul.msk.bf16.gmra.mxu2 %vm146_vm0, %v740_v34  ;;  %719 = vmatmul.msk.bf16.gmra.mxu1 %vm146_vm0, %v733_v33 }
  0x2d   :  { %726 = vmatmul.msk.bf16.gmra.mxu3 %vm146_vm0, %v740_v34  ;;  %457 = vperm.xlu1 %755, %v363_v35  }
  0x2e   :  { %462 = vperm.xlu2 %756, %v364_v36  }
  0x32   :  { %467 = vperm.xlu0 %754, %v365_v37  }
  0x35   :  { %472 = vperm.xlu1 %755, %v366_v38  }
  0x36   :  { %477 = vperm.xlu2 %756, %v367_v39  }
  0x3a   :  { %482 = vperm.xlu0 %754, %v368_v40  }
  0x3b   :  { %706 = vmatmul.msk.bf16.gmra.mxu0 %vm146_vm0, %v734_v41 }
  0x3c   :  { %713 = vmatmul.msk.bf16.gmra.mxu2 %vm146_vm0, %v741_v42  ;;  %720 = vmatmul.msk.bf16.gmra.mxu1 %vm146_vm0, %v734_v41 }
  0x3d   :  { %727 = vmatmul.msk.bf16.gmra.mxu3 %vm146_vm0, %v741_v42  ;;  %487 = vperm.xlu1 %755, %v369_v43  }
  0x3e   :  { %492 = vperm.xlu2 %756, %v370_v44  }
  0x42   :  { %497 = vperm.xlu0 %754, %v371_v45  }
  0x45   :  { %502 = vperm.xlu1 %755, %v372_v46  }
  0x46   :  { %507 = vperm.xlu2 %756, %v373_v47  }
  0x4a   :  { %512 = vperm.xlu0 %754, %v374_v48  }
  0x4b   :  { %707 = vmatmul.msk.bf16.gmra.mxu0 %vm146_vm0, %v735_v49 }
  0x4c   :  { %714 = vmatmul.msk.bf16.gmra.mxu2 %vm146_vm0, %v742_v50  ;;  %721 = vmatmul.msk.bf16.gmra.mxu1 %vm146_vm0, %v735_v49 }
  0x4d   :  { %728 = vmatmul.msk.bf16.gmra.mxu3 %vm146_vm0, %v742_v50 }
  0x5b   :  { %708 = vmatmul.msk.bf16.gmra.mxu0 %vm146_vm0, %v736_v51 }
  0x5c   :  { %715 = vmatmul.msk.bf16.gmra.mxu2 %vm146_vm0, %v743_v52  ;;  %722 = vmatmul.msk.bf16.gmra.mxu1 %vm146_vm0, %v736_v51 }
  0x5d   :  { %729 = vmatmul.msk.bf16.gmra.mxu3 %vm146_vm0, %v743_v52 }
  0x60   :  { %v951_v53 = vpop.permute.xlu2 %397 }
  0x68   :  { %v963_v56 = vpop.permute.xlu2 %402 }
  0x6b   :  { %709 = vmatmul.msk.bf16.gmra.mxu0 %vm146_vm0, %v737_v54 }
  0x6c   :  { %716 = vmatmul.msk.bf16.gmra.mxu2 %vm146_vm0, %v744_v55  ;;  %723 = vmatmul.msk.bf16.gmra.mxu1 %vm146_vm0, %v737_v54 }
  0x6d   :  { %730 = vmatmul.msk.bf16.gmra.mxu3 %vm146_vm0, %v744_v55 }
  0x70   :  { %v965_v59 = vpop.permute.xlu2 %417 }
  0x74   :  { %v378_v57 = vpop.permute.xlu0 %377 }
  0x76   :  { %v388_v58 = vpop.permute.xlu1 %387 }
  0x78   :  { %v974_v0 = vpop.permute.xlu2 %432 }
  0x7c   :  { %v383_v60 = vpop.permute.xlu0 %382 }
  0x7f   :  { %v967_v61 = vpop.permute.xlu1 %392 }
  0x80   :  { %v448_v12 = vpop.permute.xlu2 %447 }
  0x84   :  { %v972_v63 = vpop.permute.xlu0 %407 }
  0x87   :  { %v980_v3 = vpop.permute.xlu1 %412 }
  0x88   :  { %v198_v4 = vpop.f32.mrf.mxu0 }
  0x89   :  { %v199_v5 = vadd.f32 %v198_v4, %v976_v1  ;;  %v277_v6 = vpop.f32.mrf.mxu1 }
  0x8a   :  { %v278_v7 = vadd.f32 %v277_v6, %v978_v2 }
  0x8b   :  { %v515_v8 = vsub.f32 %v199_v5, %v378_v57 }
  0x8c   :  { %v516_v9 = vsub.f32 %v278_v7, %v378_v57  ;;  %v984_v10 = vpop.permute.xlu0 %422 }
  0x8d   :  { %571 = vst [vmem:[%s1240_s4] sm:$0xff] %v515_v8 }
  0x8e   :  { %572 = vst [vmem:[%s1240_s4 + $0x8] sm:$0xff] %v516_v9 }
  0x8f   :  { %v233_v11 = vpop.f32.mrf.mxu2  ;;  %v993_v15 = vpop.permute.xlu1 %427 }
  0x90   :  { %v234_v13 = vadd.f32 %v233_v11, %v976_v1  ;;  %v312_v14 = vpop.f32.mrf.mxu3  ;;  %v200_v17 = vpop.f32.mrf.mxu0 }
  0x91   :  { %v313_v16 = vadd.f32 %v312_v14, %v978_v2  ;;  %v201_v19 = vadd.f32 %v200_v17, %v976_v1  ;;  %v279_v20 = vpop.f32.mrf.mxu1 }
  0x92   :  { %v543_v18 = vsub.f32 %v234_v13, %v448_v12  ;;  %v280_v22 = vadd.f32 %v279_v20, %v978_v2 }
  0x93   :  { %v544_v21 = vsub.f32 %v313_v16, %v448_v12  ;;  %v517_v23 = vsub.f32 %v201_v19, %v383_v60 }
  0x94   :  { %599 = vst [vmem:[%s1240_s4 + $0xe0] sm:$0xff] %v543_v18  ;;  %v518_v24 = vsub.f32 %v280_v22, %v383_v60  ;;  %v1004_v25 = vpop.permute.xlu0 %437 }
  0x95   :  { %600 = vst [vmem:[%s1240_s4 + $0xe8] sm:$0xff] %v544_v21 }
  0x96   :  { %573 = vst [vmem:[%s1240_s4 + $0x10] sm:$0xff] %v517_v23 }
  0x97   :  { %574 = vst [vmem:[%s1240_s4 + $0x18] sm:$0xff] %v518_v24  ;;  %v235_v26 = vpop.f32.mrf.mxu2  ;;  %v1012_v28 = vpop.permute.xlu1 %442 }
  0x98   :  { %v314_v27 = vpop.f32.mrf.mxu3  ;;  %v203_v29 = vpop.f32.mrf.mxu0  ;;  %v236_v33 = vadd.f32 %v235_v26, %v976_v1 }
  0x99   :  { %v204_v30 = vadd.f32 %v203_v29, %v976_v1  ;;  %v282_v31 = vpop.f32.mrf.mxu1  ;;  %v315_v34 = vadd.f32 %v314_v27, %v978_v2 }
  0x9a   :  { %v283_v32 = vadd.f32 %v282_v31, %v978_v2 }
  0x9b   :  { %v519_v35 = vsub.f32 %v204_v30, %v388_v58 }
  0x9c   :  { %v520_v36 = vsub.f32 %v283_v32, %v388_v58  ;;  %v453_v37 = vpop.permute.xlu0 %452  ;;  %v463_v58 = vpop.permute.xlu2 %462 }
  0x9d   :  { %575 = vst [vmem:[%s1240_s4 + $0x20] sm:$0xff] %v519_v35  ;;  %v545_v38 = vsub.f32 %v236_v33, %v453_v37  ;;  %v546_v39 = vsub.f32 %v315_v34, %v453_v37 }
  0x9e   :  { %576 = vst [vmem:[%s1240_s4 + $0x28] sm:$0xff] %v520_v36 }
  0x9f   :  { %v238_v40 = vpop.f32.mrf.mxu2  ;;  %601 = vst [vmem:[%s1240_s4 + $0xf0] sm:$0xff] %v545_v38  ;;  %v458_v43 = vpop.permute.xlu1 %457 }
  0xa0   :  { %v239_v41 = vadd.f32 %v238_v40, %v976_v1  ;;  %v317_v42 = vpop.f32.mrf.mxu3  ;;  %602 = vst [vmem:[%s1240_s4 + $0xf8] sm:$0xff] %v546_v39  ;;  %v205_v45 = vpop.f32.mrf.mxu0 }
  0xa1   :  { %v318_v44 = vadd.f32 %v317_v42, %v978_v2  ;;  %v206_v47 = vadd.f32 %v205_v45, %v976_v1  ;;  %v284_v48 = vpop.f32.mrf.mxu1 }
  0xa2   :  { %v547_v46 = vsub.f32 %v239_v41, %v458_v43  ;;  %v285_v50 = vadd.f32 %v284_v48, %v978_v2 }
  0xa3   :  { %v548_v49 = vsub.f32 %v318_v44, %v458_v43  ;;  %v521_v51 = vsub.f32 %v206_v47, %v967_v61 }
  0xa4   :  { %603 = vst [vmem:[%s1240_s4 + $0x100] sm:$0xff] %v547_v46  ;;  %v522_v52 = vsub.f32 %v285_v50, %v967_v61  ;;  %v468_v14 = vpop.permute.xlu0 %467  ;;  %v478_v41 = vpop.permute.xlu2 %477 }
  0xa5   :  { %604 = vst [vmem:[%s1240_s4 + $0x108] sm:$0xff] %v548_v49 }
  0xa6   :  { %577 = vst [vmem:[%s1240_s4 + $0x30] sm:$0xff] %v521_v51 }
  0xa7   :  { %578 = vst [vmem:[%s1240_s4 + $0x38] sm:$0xff] %v522_v52  ;;  %v240_v54 = vpop.f32.mrf.mxu2  ;;  %v473_v29 = vpop.permute.xlu1 %472 }
  0xa8   :  { %v241_v55 = vadd.f32 %v240_v54, %v976_v1  ;;  %v319_v57 = vpop.f32.mrf.mxu3  ;;  %v208_v62 = vpop.f32.mrf.mxu0 }
  0xa9   :  { %v320_v60 = vadd.f32 %v319_v57, %v978_v2  ;;  %v209_v5 = vadd.f32 %v208_v62, %v976_v1  ;;  %v287_v61 = vpop.f32.mrf.mxu1 }
  0xaa   :  { %v549_v4 = vsub.f32 %v241_v55, %v463_v58  ;;  %v288_v7 = vadd.f32 %v287_v61, %v978_v2 }
  0xab   :  { %v550_v6 = vsub.f32 %v320_v60, %v463_v58  ;;  %v523_v8 = vsub.f32 %v209_v5, %v951_v53 }
  0xac   :  { %605 = vst [vmem:[%s1240_s4 + $0x110] sm:$0xff] %v549_v4  ;;  %v524_v9 = vsub.f32 %v288_v7, %v951_v53  ;;  %v483_v54 = vpop.permute.xlu0 %482 }
  0xad   :  { %606 = vst [vmem:[%s1240_s4 + $0x118] sm:$0xff] %v550_v6 }
  0xae   :  { %579 = vst [vmem:[%s1240_s4 + $0x40] sm:$0xff] %v523_v8 }
  0xaf   :  { %580 = vst [vmem:[%s1240_s4 + $0x48] sm:$0xff] %v524_v9  ;;  %v243_v11 = vpop.f32.mrf.mxu2  ;;  %v488_v9 = vpop.permute.xlu1 %487 }
  0xb0   :  { %v244_v12 = vadd.f32 %v243_v11, %v976_v1  ;;  %v322_v13 = vpop.f32.mrf.mxu3  ;;  %v210_v17 = vpop.f32.mrf.mxu0 }
  0xb1   :  { %v323_v16 = vadd.f32 %v322_v13, %v978_v2  ;;  %v211_v19 = vadd.f32 %v210_v17, %v976_v1  ;;  %v289_v53 = vpop.f32.mrf.mxu1 }
  0xb2   :  { %v551_v18 = vsub.f32 %v244_v12, %v468_v14  ;;  %v290_v21 = vadd.f32 %v289_v53, %v978_v2 }
  0xb3   :  { %v552_v20 = vsub.f32 %v323_v16, %v468_v14  ;;  %v525_v22 = vsub.f32 %v211_v19, %v963_v56 }
  0xb4   :  { %607 = vst [vmem:[%s1240_s4 + $0x120] sm:$0xff] %v551_v18  ;;  %v526_v23 = vsub.f32 %v290_v21, %v963_v56 }
  0xb5   :  { %608 = vst [vmem:[%s1240_s4 + $0x128] sm:$0xff] %v552_v20 }
  0xb6   :  { %581 = vst [vmem:[%s1240_s4 + $0x50] sm:$0xff] %v525_v22  ;;  %v493_v22 = vpop.permute.xlu2 %492 }
  0xb7   :  { %582 = vst [vmem:[%s1240_s4 + $0x58] sm:$0xff] %v526_v23  ;;  %v245_v24 = vpop.f32.mrf.mxu2 }
  0xb8   :  { %v246_v26 = vadd.f32 %v245_v24, %v976_v1  ;;  %v324_v27 = vpop.f32.mrf.mxu3  ;;  %v213_v31 = vpop.f32.mrf.mxu0 }
  0xb9   :  { %v325_v30 = vadd.f32 %v324_v27, %v978_v2  ;;  %v214_v33 = vadd.f32 %v213_v31, %v976_v1  ;;  %v292_v56 = vpop.f32.mrf.mxu1 }
  0xba   :  { %v553_v32 = vsub.f32 %v246_v26, %v473_v29  ;;  %v293_v35 = vadd.f32 %v292_v56, %v978_v2 }
  0xbb   :  { %v554_v34 = vsub.f32 %v325_v30, %v473_v29  ;;  %v527_v36 = vsub.f32 %v214_v33, %v972_v63 }
  0xbc   :  { %609 = vst [vmem:[%s1240_s4 + $0x130] sm:$0xff] %v553_v32  ;;  %v528_v37 = vsub.f32 %v293_v35, %v972_v63  ;;  %v498_v35 = vpop.permute.xlu0 %497 }
  0xbd   :  { %610 = vst [vmem:[%s1240_s4 + $0x138] sm:$0xff] %v554_v34 }
  0xbe   :  { %583 = vst [vmem:[%s1240_s4 + $0x60] sm:$0xff] %v527_v36 }
  0xbf   :  { %584 = vst [vmem:[%s1240_s4 + $0x68] sm:$0xff] %v528_v37  ;;  %v248_v38 = vpop.f32.mrf.mxu2 }
  0xc0   :  { %v249_v39 = vadd.f32 %v248_v38, %v976_v1  ;;  %v327_v40 = vpop.f32.mrf.mxu3  ;;  %v215_v43 = vpop.f32.mrf.mxu0 }
  0xc1   :  { %v328_v42 = vadd.f32 %v327_v40, %v978_v2  ;;  %v216_v45 = vadd.f32 %v215_v43, %v976_v1  ;;  %v294_v63 = vpop.f32.mrf.mxu1 }
  0xc2   :  { %v555_v44 = vsub.f32 %v249_v39, %v478_v41  ;;  %v295_v47 = vadd.f32 %v294_v63, %v978_v2 }
  0xc3   :  { %v556_v46 = vsub.f32 %v328_v42, %v478_v41  ;;  %v529_v48 = vsub.f32 %v216_v45, %v980_v3 }
  0xc4   :  { %611 = vst [vmem:[%s1240_s4 + $0x140] sm:$0xff] %v555_v44  ;;  %v530_v49 = vsub.f32 %v295_v47, %v980_v3 }
  0xc5   :  { %612 = vst [vmem:[%s1240_s4 + $0x148] sm:$0xff] %v556_v46  ;;  %v503_v46 = vpop.permute.xlu1 %502 }
  0xc6   :  { %585 = vst [vmem:[%s1240_s4 + $0x70] sm:$0xff] %v529_v48 }
  0xc7   :  { %586 = vst [vmem:[%s1240_s4 + $0x78] sm:$0xff] %v530_v49  ;;  %v250_v50 = vpop.f32.mrf.mxu2 }
  0xc8   :  { %v251_v51 = vadd.f32 %v250_v50, %v976_v1  ;;  %v329_v52 = vpop.f32.mrf.mxu3  ;;  %v218_v57 = vpop.f32.mrf.mxu0 }
  0xc9   :  { %v330_v55 = vadd.f32 %v329_v52, %v978_v2  ;;  %v219_v60 = vadd.f32 %v218_v57, %v976_v1  ;;  %v297_v3 = vpop.f32.mrf.mxu1 }
  0xca   :  { %v557_v58 = vsub.f32 %v251_v51, %v483_v54  ;;  %v298_v4 = vadd.f32 %v297_v3, %v978_v2  ;;  %v508_v3 = vpop.permute.xlu2 %507 }
  0xcb   :  { %v558_v62 = vsub.f32 %v330_v55, %v483_v54  ;;  %v531_v5 = vsub.f32 %v219_v60, %v965_v59 }
  0xcc   :  { %613 = vst [vmem:[%s1240_s4 + $0x150] sm:$0xff] %v557_v58  ;;  %v532_v61 = vsub.f32 %v298_v4, %v965_v59 }
  0xcd   :  { %614 = vst [vmem:[%s1240_s4 + $0x158] sm:$0xff] %v558_v62 }
  0xce   :  { %587 = vst [vmem:[%s1240_s4 + $0x80] sm:$0xff] %v531_v5 }
  0xcf   :  { %588 = vst [vmem:[%s1240_s4 + $0x88] sm:$0xff] %v532_v61  ;;  %v253_v6 = vpop.f32.mrf.mxu2 }
  0xd0   :  { %v254_v7 = vadd.f32 %v253_v6, %v976_v1  ;;  %v332_v8 = vpop.f32.mrf.mxu3  ;;  %v220_v12 = vpop.f32.mrf.mxu0 }
  0xd1   :  { %v333_v11 = vadd.f32 %v332_v8, %v978_v2  ;;  %v221_v14 = vadd.f32 %v220_v12, %v976_v1  ;;  %v299_v59 = vpop.f32.mrf.mxu1 }
  0xd2   :  { %v559_v13 = vsub.f32 %v254_v7, %v488_v9  ;;  %v300_v17 = vadd.f32 %v299_v59, %v978_v2 }
  0xd3   :  { %v560_v16 = vsub.f32 %v333_v11, %v488_v9  ;;  %v533_v18 = vsub.f32 %v221_v14, %v984_v10  ;;  %v513_v14 = vpop.permute.xlu0 %512 }
  0xd4   :  { %615 = vst [vmem:[%s1240_s4 + $0x160] sm:$0xff] %v559_v13  ;;  %v534_v19 = vsub.f32 %v300_v17, %v984_v10 }
  0xd5   :  { %616 = vst [vmem:[%s1240_s4 + $0x168] sm:$0xff] %v560_v16 }
  0xd6   :  { %589 = vst [vmem:[%s1240_s4 + $0x90] sm:$0xff] %v533_v18 }
  0xd7   :  { %590 = vst [vmem:[%s1240_s4 + $0x98] sm:$0xff] %v534_v19  ;;  %v255_v53 = vpop.f32.mrf.mxu2 }
  0xd8   :  { %v256_v20 = vadd.f32 %v255_v53, %v976_v1  ;;  %v334_v21 = vpop.f32.mrf.mxu3  ;;  %v223_v24 = vpop.f32.mrf.mxu0 }
  0xd9   :  { %v335_v23 = vadd.f32 %v334_v21, %v978_v2  ;;  %v224_v27 = vadd.f32 %v223_v24, %v976_v1  ;;  %v302_v10 = vpop.f32.mrf.mxu1 }
  0xda   :  { %v561_v26 = vsub.f32 %v256_v20, %v493_v22  ;;  %v303_v30 = vadd.f32 %v302_v10, %v978_v2 }
  0xdb   :  { %v562_v29 = vsub.f32 %v335_v23, %v493_v22  ;;  %v535_v31 = vsub.f32 %v224_v27, %v993_v15 }
  0xdc   :  { %617 = vst [vmem:[%s1240_s4 + $0x170] sm:$0xff] %v561_v26  ;;  %v536_v32 = vsub.f32 %v303_v30, %v993_v15 }
  0xdd   :  { %618 = vst [vmem:[%s1240_s4 + $0x178] sm:$0xff] %v562_v29 }
  0xde   :  { %591 = vst [vmem:[%s1240_s4 + $0xa0] sm:$0xff] %v535_v31 }
  0xdf   :  { %592 = vst [vmem:[%s1240_s4 + $0xa8] sm:$0xff] %v536_v32  ;;  %v258_v33 = vpop.f32.mrf.mxu2 }
  0xe0   :  { %v259_v56 = vadd.f32 %v258_v33, %v976_v1  ;;  %v337_v34 = vpop.f32.mrf.mxu3  ;;  %v225_v37 = vpop.f32.mrf.mxu0 }
  0xe1   :  { %v338_v36 = vadd.f32 %v337_v34, %v978_v2  ;;  %v226_v39 = vadd.f32 %v225_v37, %v976_v1  ;;  %v304_v15 = vpop.f32.mrf.mxu1 }
  0xe2   :  { %v563_v38 = vsub.f32 %v259_v56, %v498_v35  ;;  %v305_v41 = vadd.f32 %v304_v15, %v978_v2 }
  0xe3   :  { %v564_v40 = vsub.f32 %v338_v36, %v498_v35  ;;  %v537_v42 = vsub.f32 %v226_v39, %v974_v0 }
  0xe4   :  { %619 = vst [vmem:[%s1240_s4 + $0x180] sm:$0xff] %v563_v38  ;;  %v538_v43 = vsub.f32 %v305_v41, %v974_v0 }
  0xe5   :  { %620 = vst [vmem:[%s1240_s4 + $0x188] sm:$0xff] %v564_v40 }
  0xe6   :  { %593 = vst [vmem:[%s1240_s4 + $0xb0] sm:$0xff] %v537_v42 }
  0xe7   :  { %594 = vst [vmem:[%s1240_s4 + $0xb8] sm:$0xff] %v538_v43  ;;  %v260_v44 = vpop.f32.mrf.mxu2 }
  0xe8   :  { %v261_v45 = vadd.f32 %v260_v44, %v976_v1  ;;  %v339_v63 = vpop.f32.mrf.mxu3  ;;  %v228_v48 = vpop.f32.mrf.mxu0 }
  0xe9   :  { %v340_v47 = vadd.f32 %v339_v63, %v978_v2  ;;  %v229_v50 = vadd.f32 %v228_v48, %v976_v1  ;;  %v307_v0 = vpop.f32.mrf.mxu1 }
  0xea   :  { %v565_v49 = vsub.f32 %v261_v45, %v503_v46  ;;  %v308_v52 = vadd.f32 %v307_v0, %v978_v2 }
  0xeb   :  { %v566_v51 = vsub.f32 %v340_v47, %v503_v46  ;;  %v539_v54 = vsub.f32 %v229_v50, %v1004_v25 }
  0xec   :  { %621 = vst [vmem:[%s1240_s4 + $0x190] sm:$0xff] %v565_v49  ;;  %v540_v55 = vsub.f32 %v308_v52, %v1004_v25 }
  0xed   :  { %622 = vst [vmem:[%s1240_s4 + $0x198] sm:$0xff] %v566_v51 }
  0xee   :  { %595 = vst [vmem:[%s1240_s4 + $0xc0] sm:$0xff] %v539_v54 }
  0xef   :  { %596 = vst [vmem:[%s1240_s4 + $0xc8] sm:$0xff] %v540_v55  ;;  %v263_v57 = vpop.f32.mrf.mxu2 }
  0xf0   :  { %v264_v58 = vadd.f32 %v263_v57, %v976_v1  ;;  %v342_v60 = vpop.f32.mrf.mxu3  ;;  %v230_v4 = vpop.f32.mrf.mxu0 }
  0xf1   :  { %v343_v62 = vadd.f32 %v342_v60, %v978_v2  ;;  %v231_v61 = vadd.f32 %v230_v4, %v976_v1  ;;  %v309_v25 = vpop.f32.mrf.mxu1 }
  0xf2   :  { %v567_v5 = vsub.f32 %v264_v58, %v508_v3  ;;  %v310_v7 = vadd.f32 %v309_v25, %v978_v2 }
  0xf3   :  { %v568_v6 = vsub.f32 %v343_v62, %v508_v3  ;;  %v541_v8 = vsub.f32 %v231_v61, %v1012_v28 }
  0xf4   :  { %623 = vst [vmem:[%s1240_s4 + $0x1a0] sm:$0xff] %v567_v5  ;;  %v542_v9 = vsub.f32 %v310_v7, %v1012_v28 }
  0xf5   :  { %624 = vst [vmem:[%s1240_s4 + $0x1a8] sm:$0xff] %v568_v6 }
  0xf6   :  { %597 = vst [vmem:[%s1240_s4 + $0xd0] sm:$0xff] %v541_v8 }
  0xf7   :  { %598 = vst [vmem:[%s1240_s4 + $0xd8] sm:$0xff] %v542_v9  ;;  %v265_v11 = vpop.f32.mrf.mxu2 }
  0xf8   :  { %v266_v12 = vadd.f32 %v265_v11, %v976_v1  ;;  %v344_v13 = vpop.f32.mrf.mxu3 }
  0xf9   :  { %v345_v59 = vadd.f32 %v344_v13, %v978_v2 }
  0xfa   :  { %v569_v16 = vsub.f32 %v266_v12, %v513_v14 }
  0xfb   :  { %v570_v17 = vsub.f32 %v345_v59, %v513_v14 }
  0xfc   :  { %625 = vst [vmem:[%s1240_s4 + $0x1b0] sm:$0xff] %v569_v16 }
  0xfd   :  { %626 = vst [vmem:[%s1240_s4 + $0x1b8] sm:$0xff] %v570_v17 }

// kernel: decoder_forward.6
= control target key start
LH: loop header
LB: loop body
LE: loop exit
PB: predicated region body
PF: predicated region fallthrough
CT: control target
= control target key end

     0   :  { %vm204_vm0 = vcmask 261120   ;;  %vm19_vm1 = vcmask 7168   ;;  %s2685_s1 = inlined_call_operand.vmem [shape: bf16[32,256], index: 1, kind: input, shape index: {}]   ;;  %s2686_s0 = inlined_call_operand.vmem [shape: bf16[224,32], index: 0, kind: input, shape index: {}]   ;;  %s2687_s2 = inlined_call_operand.vmem [shape: f32[1,256], index: 2, kind: input, shape index: {}]   ;;  %s2688_s3 = inlined_call_operand.vmem [shape: f32[224,1], index: 3, kind: output, shape index: {}]  }
   0x1   :  { %v1403_v0 = vld [vmem:[%s2685_s1 + $0x10] sm:$0xf]  ;;  %v1454_v1 = vld [vmem:[%s2685_s1 + $0x14] sm:$0xf0]  ;;  %v1453_v2 = vld [vmem:[%s2685_s1 + $0x14] sm:$0xf] }
   0x2   :  { %v1404_v3 = vor.u32 %v1454_v1, %v1403_v0  ;;  %v1405_v4 = vld [vmem:[%s2685_s1 + $0x18] sm:$0xf0]  ;;  %v1395_v5 = vld [vmem:[%s2685_s1] sm:$0xf]  ;;  %v1452_v6 = vld [vmem:[%s2685_s1 + $0x4] sm:$0xf0] }
   0x3   :  { %v1408_v7 = vor.u32 %v1453_v2, %v1405_v4  ;;  %v1451_v8 = vld [vmem:[%s2685_s1 + $0x4] sm:$0xf]  ;;  %v1397_v9 = vld [vmem:[%s2685_s1 + $0x8] sm:$0xf0]  ;;  %v1396_v10 = vor.u32 %v1452_v6, %v1395_v5  ;;  %v1444_v13 = vld [vmem:[%s2686_s0 + $0x38] sm:$0xff] }
   0x4   :  { %253 = vmatpush.bf16.msra.mxu0 %v1404_v3  ;;  %1455 = vmatpush.bf16.msra.mxu2 %v1404_v3  ;;  %v1400_v11 = vor.u32 %v1451_v8, %v1397_v9  ;;  %v1437_v12 = vld [vmem:[%s2686_s0] sm:$0xff]  ;;  %v1438_v14 = vld [vmem:[%s2686_s0 + $0x8] sm:$0xff]  ;;  %v1439_v16 = vld [vmem:[%s2686_s0 + $0x10] sm:$0xff] }
   0x5   :  { %332 = vmatpush.bf16.msra.mxu1 %v1408_v7  ;;  %1457 = vmatpush.bf16.msra.mxu3 %v1408_v7  ;;  %v1445_v15 = vld [vmem:[%s2686_s0 + $0x40] sm:$0xff]  ;;  %v1446_v17 = vld [vmem:[%s2686_s0 + $0x48] sm:$0xff]  ;;  %v1440_v18 = vld [vmem:[%s2686_s0 + $0x18] sm:$0xff] }
   0x6   :  { %v1447_v19 = vld [vmem:[%s2686_s0 + $0x50] sm:$0xff]  ;;  %v1441_v20 = vld [vmem:[%s2686_s0 + $0x20] sm:$0xff]  ;;  %v1448_v21 = vld [vmem:[%s2686_s0 + $0x58] sm:$0xff] }
   0x7   :  { %v1442_v22 = vld [vmem:[%s2686_s0 + $0x28] sm:$0xff]  ;;  %v1449_v23 = vld [vmem:[%s2686_s0 + $0x60] sm:$0xff]  ;;  %v1443_v24 = vld [vmem:[%s2686_s0 + $0x30] sm:$0xff] }
   0x8   :  { %254 = vmatpush.bf16.msra.mxu0 %v1396_v10  ;;  %1456 = vmatpush.bf16.msra.mxu2 %v1396_v10  ;;  %v1450_v25 = vld [vmem:[%s2686_s0 + $0x68] sm:$0xff]  ;;  %v108_v26 = vld [vmem:[%s2687_s2] sm:$0x3] }
   0x9   :  { %333 = vmatpush.bf16.msra.mxu1 %v1400_v11  ;;  %1458 = vmatpush.bf16.msra.mxu3 %v1400_v11  ;;  %v1809_v27 = vperm.slane %v108_v26, 0  ;;  %v1811_v28 = vperm.slane %v108_v26, 1 }
   0xb   :  { %1409 = vmatmul.msk.bf16.vlgmr.msra.gmra.mxu0 %vm204_vm0, %v1437_v12  ;;  %1416 = vmatmul.msk.bf16.vlgmr.msra.gmra.mxu2 %vm204_vm0, %v1444_v13 }
   0xc   :  { %1423 = vmatmul.msk.bf16.vlgmr.msra.gmra.mxu1 %vm204_vm0, %v1437_v12  ;;  %1430 = vmatmul.msk.bf16.vlgmr.msra.gmra.mxu3 %vm204_vm0, %v1444_v13 }
  0x1b   :  { %1410 = vmatmul.msk.bf16.gmra.mxu0 %vm204_vm0, %v1438_v14  ;;  %1417 = vmatmul.msk.bf16.gmra.mxu2 %vm204_vm0, %v1445_v15 }
  0x1c   :  { %1424 = vmatmul.msk.bf16.gmra.mxu1 %vm204_vm0, %v1438_v14  ;;  %1431 = vmatmul.msk.bf16.gmra.mxu3 %vm204_vm0, %v1445_v15 }
  0x2b   :  { %1411 = vmatmul.msk.bf16.gmra.mxu0 %vm204_vm0, %v1439_v16  ;;  %1418 = vmatmul.msk.bf16.gmra.mxu2 %vm204_vm0, %v1446_v17 }
  0x2c   :  { %1425 = vmatmul.msk.bf16.gmra.mxu1 %vm204_vm0, %v1439_v16  ;;  %1432 = vmatmul.msk.bf16.gmra.mxu3 %vm204_vm0, %v1446_v17 }
  0x3b   :  { %1412 = vmatmul.msk.bf16.gmra.mxu0 %vm204_vm0, %v1440_v18  ;;  %1419 = vmatmul.msk.bf16.gmra.mxu2 %vm204_vm0, %v1447_v19 }
  0x3c   :  { %1426 = vmatmul.msk.bf16.gmra.mxu1 %vm204_vm0, %v1440_v18  ;;  %1433 = vmatmul.msk.bf16.gmra.mxu3 %vm204_vm0, %v1447_v19 }
  0x4b   :  { %1413 = vmatmul.msk.bf16.gmra.mxu0 %vm204_vm0, %v1441_v20  ;;  %1420 = vmatmul.msk.bf16.gmra.mxu2 %vm204_vm0, %v1448_v21 }
  0x4c   :  { %1427 = vmatmul.msk.bf16.gmra.mxu1 %vm204_vm0, %v1441_v20  ;;  %1434 = vmatmul.msk.bf16.gmra.mxu3 %vm204_vm0, %v1448_v21 }
  0x5b   :  { %1414 = vmatmul.msk.bf16.gmra.mxu0 %vm204_vm0, %v1442_v22  ;;  %1421 = vmatmul.msk.bf16.gmra.mxu2 %vm204_vm0, %v1449_v23 }
  0x5c   :  { %1428 = vmatmul.msk.bf16.gmra.mxu1 %vm204_vm0, %v1442_v22  ;;  %1435 = vmatmul.msk.bf16.gmra.mxu3 %vm204_vm0, %v1449_v23 }
  0x6b   :  { %1415 = vmatmul.msk.bf16.gmra.mxu0 %vm204_vm0, %v1443_v24  ;;  %1422 = vmatmul.msk.bf16.gmra.mxu2 %vm204_vm0, %v1450_v25 }
  0x6c   :  { %1429 = vmatmul.msk.bf16.gmra.mxu1 %vm204_vm0, %v1443_v24  ;;  %1436 = vmatmul.msk.bf16.gmra.mxu3 %vm204_vm0, %v1450_v25 }
  0x88   :  { %v256_v29 = vpop.f32.mrf.mxu0 }
  0x89   :  { %v1814_v30 = vadd.f32 %v256_v29, %v1809_v27  ;;  %v335_v31 = vpop.f32.mrf.mxu1 }
  0x8a   :  { %v1817_v32 = vadd.f32 %v335_v31, %v1811_v28 }
  0x8c   :  { %v433_v33 = vmax.f32 %v1814_v30, %v1817_v32 }
  0x8e   :  { %434 = vmax.xlane.f32.xlu0 %v433_v33  ;;  %v291_v34 = vpop.f32.mrf.mxu2 }
  0x8f   :  { %v1822_v35 = vadd.f32 %v291_v34, %v1809_v27  ;;  %v370_v36 = vpop.f32.mrf.mxu3 }
  0x90   :  { %v1825_v37 = vadd.f32 %v370_v36, %v1811_v28  ;;  %v258_v38 = vpop.f32.mrf.mxu0 }
  0x91   :  { %v1828_v39 = vadd.f32 %v258_v38, %v1809_v27  ;;  %v337_v40 = vpop.f32.mrf.mxu1 }
  0x92   :  { %v1831_v41 = vadd.f32 %v337_v40, %v1811_v28  ;;  %v475_v42 = vmax.f32 %v1822_v35, %v1825_v37 }
  0x94   :  { %476 = vmax.xlane.f32.xlu2 %v475_v42  ;;  %v436_v43 = vmax.f32 %v1828_v39, %v1831_v41 }
  0x96   :  { %437 = vmax.xlane.f32.xlu0 %v436_v43  ;;  %v293_v44 = vpop.f32.mrf.mxu2 }
  0x97   :  { %v372_v45 = vpop.f32.mrf.mxu3  ;;  %v1838_v46 = vadd.f32 %v293_v44, %v1809_v27 }
  0x98   :  { %v1841_v47 = vadd.f32 %v372_v45, %v1811_v28  ;;  %v261_v48 = vpop.f32.mrf.mxu0 }
  0x99   :  { %v1844_v49 = vadd.f32 %v261_v48, %v1809_v27  ;;  %v340_v50 = vpop.f32.mrf.mxu1 }
  0x9a   :  { %v1847_v51 = vadd.f32 %v340_v50, %v1811_v28  ;;  %v478_v53 = vmax.f32 %v1838_v46, %v1841_v47 }
  0x9c   :  { %v439_v52 = vmax.f32 %v1844_v49, %v1847_v51 }
  0x9e   :  { %440 = vmax.xlane.f32.xlu1 %v439_v52  ;;  %479 = vmax.xlane.f32.xlu0 %v478_v53  ;;  %v296_v54 = vpop.f32.mrf.mxu2 }
  0x9f   :  { %v375_v55 = vpop.f32.mrf.mxu3  ;;  %v1854_v56 = vadd.f32 %v296_v54, %v1809_v27 }
  0xa0   :  { %v1857_v57 = vadd.f32 %v375_v55, %v1811_v28  ;;  %v263_v58 = vpop.f32.mrf.mxu0 }
  0xa1   :  { %v342_v59 = vpop.f32.mrf.mxu1  ;;  %v1865_v0 = vadd.f32 %v263_v58, %v1809_v27 }
  0xa2   :  { %v481_v60 = vmax.f32 %v1854_v56, %v1857_v57  ;;  %v1868_v1 = vadd.f32 %v342_v59, %v1811_v28 }
  0xa4   :  { %v442_v8 = vmax.f32 %v1865_v0, %v1868_v1 }
  0xa6   :  { %482 = vmax.xlane.f32.xlu1 %v481_v60  ;;  %v298_v61 = vpop.f32.mrf.mxu2 }
  0xa7   :  { %v1862_v62 = vadd.f32 %v298_v61, %v1809_v27  ;;  %v377_v63 = vpop.f32.mrf.mxu3 }
  0xa8   :  { %v1871_v2 = vadd.f32 %v377_v63, %v1811_v28  ;;  %v266_v3 = vpop.f32.mrf.mxu0 }
  0xa9   :  { %v345_v4 = vpop.f32.mrf.mxu1  ;;  %v1876_v6 = vadd.f32 %v266_v3, %v1809_v27 }
  0xaa   :  { %v484_v5 = vmax.f32 %v1862_v62, %v1871_v2  ;;  %v1879_v7 = vadd.f32 %v345_v4, %v1811_v28 }
  0xac   :  { %485 = vmax.xlane.f32.xlu2 %v484_v5  ;;  %v445_v14 = vmax.f32 %v1876_v6, %v1879_v7 }
  0xae   :  { %443 = vmax.xlane.f32.xlu1 %v442_v8  ;;  %v301_v9 = vpop.f32.mrf.mxu2 }
  0xaf   :  { %v1884_v10 = vadd.f32 %v301_v9, %v1809_v27  ;;  %v380_v11 = vpop.f32.mrf.mxu3 }
  0xb0   :  { %v1887_v12 = vadd.f32 %v380_v11, %v1811_v28  ;;  %v268_v13 = vpop.f32.mrf.mxu0 }
  0xb1   :  { %v347_v15 = vpop.f32.mrf.mxu1  ;;  %v1894_v17 = vadd.f32 %v268_v13, %v1809_v27 }
  0xb2   :  { %v487_v16 = vmax.f32 %v1884_v10, %v1887_v12  ;;  %v1897_v18 = vadd.f32 %v347_v15, %v1811_v28 }
  0xb4   :  { %446 = vmax.xlane.f32.xlu2 %v445_v14  ;;  %488 = vmax.xlane.f32.xlu0 %v487_v16  ;;  %v448_v29 = vmax.f32 %v1894_v17, %v1897_v18 }
  0xb6   :  { %v303_v19 = vpop.f32.mrf.mxu2 }
  0xb7   :  { %v1900_v20 = vadd.f32 %v303_v19, %v1809_v27  ;;  %v382_v21 = vpop.f32.mrf.mxu3 }
  0xb8   :  { %v1903_v22 = vadd.f32 %v382_v21, %v1811_v28  ;;  %v271_v23 = vpop.f32.mrf.mxu0 }
  0xb9   :  { %v1906_v24 = vadd.f32 %v271_v23, %v1809_v27  ;;  %v350_v25 = vpop.f32.mrf.mxu1 }
  0xba   :  { %v1909_v26 = vadd.f32 %v350_v25, %v1811_v28  ;;  %v490_v31 = vmax.f32 %v1900_v20, %v1903_v22 }
  0xbc   :  { %449 = vmax.xlane.f32.xlu2 %v448_v29  ;;  %491 = vmax.xlane.f32.xlu1 %v490_v31  ;;  %v451_v33 = vmax.f32 %v1906_v24, %v1909_v26 }
  0xbe   :  { %452 = vmax.xlane.f32.xlu0 %v451_v33  ;;  %v306_v34 = vpop.f32.mrf.mxu2 }
  0xbf   :  { %v1918_v36 = vadd.f32 %v306_v34, %v1809_v27  ;;  %v385_v38 = vpop.f32.mrf.mxu3 }
  0xc0   :  { %v1921_v40 = vadd.f32 %v385_v38, %v1811_v28  ;;  %v273_v42 = vpop.f32.mrf.mxu0 }
  0xc1   :  { %v1924_v43 = vadd.f32 %v273_v42, %v1809_v27  ;;  %v352_v44 = vpop.f32.mrf.mxu1 }
  0xc2   :  { %v1927_v45 = vadd.f32 %v352_v44, %v1811_v28  ;;  %v493_v48 = vmax.f32 %v1918_v36, %v1921_v40 }
  0xc4   :  { %494 = vmax.xlane.f32.xlu2 %v493_v48  ;;  %v454_v50 = vmax.f32 %v1924_v43, %v1927_v45  ;;  %v1689_v48 = vmov -inf  }
  0xc5   :  { %20 = vst.msk [vmem:[#allocation2] sm:$0xff] %vm19_vm1, %v1689_v48 }
  0xc6   :  { %455 = vmax.xlane.f32.xlu1 %v454_v50  ;;  %v308_v52 = vpop.f32.mrf.mxu2  ;;  %21 = vst.msk [vmem:[#allocation2 + $0x8] sm:$0xff] %vm19_vm1, %v1689_v48 }
  0xc7   :  { %v1934_v53 = vadd.f32 %v308_v52, %v1809_v27  ;;  %v387_v54 = vpop.f32.mrf.mxu3  ;;  %22 = vst.msk [vmem:[#allocation2 + $0x10] sm:$0xff] %vm19_vm1, %v1689_v48 }
  0xc8   :  { %v1937_v55 = vadd.f32 %v387_v54, %v1811_v28  ;;  %v276_v58 = vpop.f32.mrf.mxu0  ;;  %23 = vst.msk [vmem:[#allocation2 + $0x18] sm:$0xff] %vm19_vm1, %v1689_v48 }
  0xc9   :  { %v1940_v59 = vadd.f32 %v276_v58, %v1809_v27  ;;  %v355_v60 = vpop.f32.mrf.mxu1  ;;  %24 = vst.msk [vmem:[#allocation2 + $0x20] sm:$0xff] %vm19_vm1, %v1689_v48 }
  0xca   :  { %v1943_v61 = vadd.f32 %v355_v60, %v1811_v28  ;;  %v496_v63 = vmax.f32 %v1934_v53, %v1937_v55  ;;  %25 = vst.msk [vmem:[#allocation2 + $0x28] sm:$0xff] %vm19_vm1, %v1689_v48 }
  0xcb   :  { %26 = vst.msk [vmem:[#allocation2 + $0x30] sm:$0xff] %vm19_vm1, %v1689_v48 }
  0xcc   :  { %497 = vmax.xlane.f32.xlu0 %v496_v63  ;;  %v457_v3 = vmax.f32 %v1940_v59, %v1943_v61  ;;  %27 = vst.msk [vmem:[#allocation2 + $0x38] sm:$0xff] %vm19_vm1, %v1689_v48 }
  0xcd   :  { %28 = vst.msk [vmem:[#allocation2 + $0x40] sm:$0xff] %vm19_vm1, %v1689_v48 }
  0xce   :  { %458 = vmax.xlane.f32.xlu2 %v457_v3  ;;  %v311_v4 = vpop.f32.mrf.mxu2  ;;  %29 = vst.msk [vmem:[#allocation2 + $0x48] sm:$0xff] %vm19_vm1, %v1689_v48 }
  0xcf   :  { %v1950_v5 = vadd.f32 %v311_v4, %v1809_v27  ;;  %v390_v8 = vpop.f32.mrf.mxu3  ;;  %30 = vst.msk [vmem:[#allocation2 + $0x50] sm:$0xff] %vm19_vm1, %v1689_v48 }
  0xd0   :  { %v1953_v9 = vadd.f32 %v390_v8, %v1811_v28  ;;  %v278_v11 = vpop.f32.mrf.mxu0  ;;  %31 = vst.msk [vmem:[#allocation2 + $0x58] sm:$0xff] %vm19_vm1, %v1689_v48 }
  0xd1   :  { %v1956_v13 = vadd.f32 %v278_v11, %v1809_v27  ;;  %v357_v14 = vpop.f32.mrf.mxu1  ;;  %32 = vst.msk [vmem:[#allocation2 + $0x60] sm:$0xff] %vm19_vm1, %v1689_v48 }
  0xd2   :  { %v1959_v15 = vadd.f32 %v357_v14, %v1811_v28  ;;  %v499_v16 = vmax.f32 %v1950_v5, %v1953_v9  ;;  %33 = vst.msk [vmem:[#allocation2 + $0x68] sm:$0xff] %vm19_vm1, %v1689_v48 }
  0xd3   :  { %34 = vst.msk [vmem:[#allocation2 + $0x70] sm:$0xff] %vm19_vm1, %v1689_v48 }
  0xd4   :  { %500 = vmax.xlane.f32.xlu1 %v499_v16  ;;  %v460_v19 = vmax.f32 %v1956_v13, %v1959_v15  ;;  %35 = vst.msk [vmem:[#allocation2 + $0x78] sm:$0xff] %vm19_vm1, %v1689_v48 }
  0xd5   :  { %36 = vst.msk [vmem:[#allocation2 + $0x80] sm:$0xff] %vm19_vm1, %v1689_v48 }
  0xd6   :  { %461 = vmax.xlane.f32.xlu0 %v460_v19  ;;  %v313_v21 = vpop.f32.mrf.mxu2  ;;  %37 = vst.msk [vmem:[#allocation2 + $0x88] sm:$0xff] %vm19_vm1, %v1689_v48 }
  0xd7   :  { %v1966_v23 = vadd.f32 %v313_v21, %v1809_v27  ;;  %v392_v25 = vpop.f32.mrf.mxu3  ;;  %38 = vst.msk [vmem:[#allocation2 + $0x90] sm:$0xff] %vm19_vm1, %v1689_v48 }
  0xd8   :  { %v1969_v29 = vadd.f32 %v392_v25, %v1811_v28  ;;  %v281_v31 = vpop.f32.mrf.mxu0  ;;  %39 = vst.msk [vmem:[#allocation2 + $0x98] sm:$0xff] %vm19_vm1, %v1689_v48 }
  0xd9   :  { %v1972_v33 = vadd.f32 %v281_v31, %v1809_v27  ;;  %v360_v34 = vpop.f32.mrf.mxu1  ;;  %40 = vst.msk [vmem:[#allocation2 + $0xa0] sm:$0xff] %vm19_vm1, %v1689_v48 }
  0xda   :  { %v1975_v38 = vadd.f32 %v360_v34, %v1811_v28  ;;  %v502_v42 = vmax.f32 %v1966_v23, %v1969_v29  ;;  %41 = vst.msk [vmem:[#allocation2 + $0xa8] sm:$0xff] %vm19_vm1, %v1689_v48 }
  0xdb   :  { %42 = vst.msk [vmem:[#allocation2 + $0xb0] sm:$0xff] %vm19_vm1, %v1689_v48 }
  0xdc   :  { %503 = vmax.xlane.f32.xlu2 %v502_v42  ;;  %v463_v44 = vmax.f32 %v1972_v33, %v1975_v38  ;;  %43 = vst.msk [vmem:[#allocation2 + $0xb8] sm:$0xff] %vm19_vm1, %v1689_v48 }
  0xdd   :  { %44 = vst.msk [vmem:[#allocation2 + $0xc0] sm:$0xff] %vm19_vm1, %v1689_v48 }
  0xde   :  { %464 = vmax.xlane.f32.xlu1 %v463_v44  ;;  %v316_v50 = vpop.f32.mrf.mxu2  ;;  %45 = vst.msk [vmem:[#allocation2 + $0xc8] sm:$0xff] %vm19_vm1, %v1689_v48 }
  0xdf   :  { %v1986_v52 = vadd.f32 %v316_v50, %v1809_v27  ;;  %v395_v54 = vpop.f32.mrf.mxu3  ;;  %v1690_v50 = vmov 0   ;;  %46 = vst.msk [vmem:[#allocation2 + $0xd0] sm:$0xff] %vm19_vm1, %v1689_v48 }
  0xe0   :  { %v1991_v58 = vadd.f32 %v395_v54, %v1811_v28  ;;  %v283_v60 = vpop.f32.mrf.mxu0  ;;  %1463 = vset.pattern.permute.xlu2 %v1690_v50  ;;  %1462 = vset.pattern.permute.xlu1 %v1690_v50  ;;  %47 = vst.msk [vmem:[#allocation2 + $0xd8] sm:$0xff] %vm19_vm1, %v1689_v48 }
  0xe1   :  { %v1996_v63 = vadd.f32 %v283_v60, %v1809_v27  ;;  %v362_v3 = vpop.f32.mrf.mxu1  ;;  %1464 = vset.pattern.permute.xlu0 %v1690_v50 }
  0xe2   :  { %v2001_v4 = vadd.f32 %v362_v3, %v1811_v28  ;;  %v505_v8 = vmax.f32 %v1986_v52, %v1991_v58 }
  0xe4   :  { %2752 = vst [vmem:[#allocation4_spill] sm:$0xff] %v2001_v4  ;;  %506 = vmax.xlane.f32.xlu0 %v505_v8  ;;  %v466_v11 = vmax.f32 %v1996_v63, %v2001_v4 }
  0xe6   :  { %467 = vmax.xlane.f32.xlu2 %v466_v11  ;;  %v318_v14 = vpop.f32.mrf.mxu2 }
  0xe7   :  { %v2018_v16 = vadd.f32 %v318_v14, %v1809_v27  ;;  %v397_v19 = vpop.f32.mrf.mxu3 }
  0xe8   :  { %v2023_v21 = vadd.f32 %v397_v19, %v1811_v28  ;;  %v286_v25 = vpop.f32.mrf.mxu0 }
  0xe9   :  { %v2028_v31 = vadd.f32 %v286_v25, %v1809_v27  ;;  %v365_v34 = vpop.f32.mrf.mxu1 }
  0xea   :  { %v2033_v42 = vadd.f32 %v365_v34, %v1811_v28  ;;  %v508_v44 = vmax.f32 %v2018_v16, %v2023_v21 }
  0xeb   :  { %2753 = vst [vmem:[#allocation5_spill] sm:$0xff] %v2028_v31 }
  0xec   :  { %2754 = vst [vmem:[#allocation6_spill] sm:$0xff] %v2033_v42  ;;  %509 = vmax.xlane.f32.xlu1 %v508_v44  ;;  %v469_v54 = vmax.f32 %v2028_v31, %v2033_v42 }
  0xee   :  { %470 = vmax.xlane.f32.xlu0 %v469_v54  ;;  %v321_v60 = vpop.f32.mrf.mxu2 }
  0xef   :  { %v2050_v3 = vadd.f32 %v321_v60, %v1809_v27  ;;  %v400_v8 = vpop.f32.mrf.mxu3 }
  0xf0   :  { %v2055_v11 = vadd.f32 %v400_v8, %v1811_v28  ;;  %v288_v14 = vpop.f32.mrf.mxu0 }
  0xf1   :  { %2755 = vst [vmem:[#allocation7_spill] sm:$0xff] %v2050_v3  ;;  %v2060_v19 = vadd.f32 %v288_v14, %v1809_v27  ;;  %v367_v25 = vpop.f32.mrf.mxu1 }
  0xf2   :  { %2756 = vst [vmem:[#allocation8_spill] sm:$0xff] %v2055_v11  ;;  %v2065_v34 = vadd.f32 %v367_v25, %v1811_v28  ;;  %v511_v44 = vmax.f32 %v2050_v3, %v2055_v11  ;;  %v1691_v25 = vmov 0.0  }
  0xf3   :  { %49 = vst.msk [vmem:[#allocation3 + $0x8] sm:$0xff] %vm19_vm1, %v1691_v25 }
  0xf4   :  { %512 = vmax.xlane.f32.xlu2 %v511_v44  ;;  %v472_v50 = vmax.f32 %v2060_v19, %v2065_v34  ;;  %48 = vst.msk [vmem:[#allocation3] sm:$0xff] %vm19_vm1, %v1691_v25 }
  0xf5   :  { %50 = vst.msk [vmem:[#allocation3 + $0x10] sm:$0xff] %vm19_vm1, %v1691_v25 }
  0xf6   :  { %473 = vmax.xlane.f32.xlu1 %v472_v50  ;;  %v323_v54 = vpop.f32.mrf.mxu2  ;;  %51 = vst.msk [vmem:[#allocation3 + $0x18] sm:$0xff] %vm19_vm1, %v1691_v25 }
  0xf7   :  { %v2082_v60 = vadd.f32 %v323_v54, %v1809_v27  ;;  %v402_v8 = vpop.f32.mrf.mxu3  ;;  %52 = vst.msk [vmem:[#allocation3 + $0x20] sm:$0xff] %vm19_vm1, %v1691_v25  ;;  %v2099_v27 = vld [vmem:[#allocation2] sm:$0xff]  ;;  %v2113_v54 = vld [vmem:[#allocation2 + $0x70] sm:$0xff] }
  0xf8   :  { %v2087_v14 = vadd.f32 %v402_v8, %v1811_v28  ;;  %53 = vst.msk [vmem:[#allocation3 + $0x28] sm:$0xff] %vm19_vm1, %v1691_v25 }
  0xf9   :  { %2757 = vst [vmem:[#allocation9_spill] sm:$0xff] %v2082_v60 }
  0xfa   :  { %2758 = vst [vmem:[#allocation10_spill] sm:$0xff] %v2087_v14  ;;  %v514_v44 = vmax.f32 %v2082_v60, %v2087_v14 }
  0xfb   :  { %2759 = vst [vmem:[#allocation11_spill] sm:$0xff] %v2099_v27 }
  0xfc   :  { %515 = vmax.xlane.f32.xlu0 %v514_v44  ;;  %54 = vst.msk [vmem:[#allocation3 + $0x30] sm:$0xff] %vm19_vm1, %v1691_v25  ;;  %v2117_v44 = vld [vmem:[#allocation2 + $0x8] sm:$0xff] }
  0xfd   :  { %55 = vst.msk [vmem:[#allocation3 + $0x38] sm:$0xff] %vm19_vm1, %v1691_v25 }
  0xfe   :  { %56 = vst.msk [vmem:[#allocation3 + $0x40] sm:$0xff] %vm19_vm1, %v1691_v25 }
  0xff   :  { %57 = vst.msk [vmem:[#allocation3 + $0x48] sm:$0xff] %vm19_vm1, %v1691_v25 }
 0x100   :  { %58 = vst.msk [vmem:[#allocation3 + $0x50] sm:$0xff] %vm19_vm1, %v1691_v25 }
 0x101   :  { %v435_v28 = vpop.xlane.xlu0 %434  ;;  %2761 = vst [vmem:[#allocation13_spill] sm:$0xff] %v2113_v54 }
 0x102   :  { %v2105_v48 = vmax.f32 %v2099_v27, %v435_v28  ;;  %59 = vst.msk [vmem:[#allocation3 + $0x58] sm:$0xff] %vm19_vm1, %v1691_v25  ;;  %v2141_v27 = vld [vmem:[#allocation2 + $0x10] sm:$0xff] }
 0x103   :  { %60 = vst.msk [vmem:[#allocation3 + $0x60] sm:$0xff] %vm19_vm1, %v1691_v25 }
 0x104   :  { %2760 = vst [vmem:[#allocation12_spill] sm:$0xff] %v2105_v48 }
 0x105   :  { %1134 = vst.msk [vmem:[#allocation2] sm:$0xff] %vm19_vm1, %v2105_v48 }
 0x106   :  { %2762 = vst [vmem:[#allocation14_spill] sm:$0xff] %v2117_v44 }
 0x107   :  { %v477_v8 = vpop.xlane.xlu2 %476  ;;  %61 = vst.msk [vmem:[#allocation3 + $0x68] sm:$0xff] %vm19_vm1, %v1691_v25 }
 0x108   :  { %v2121_v28 = vmax.f32 %v2113_v54, %v477_v8  ;;  %62 = vst.msk [vmem:[#allocation3 + $0x70] sm:$0xff] %vm19_vm1, %v1691_v25 }
 0x109   :  { %v438_v50 = vpop.xlane.xlu0 %437  ;;  %63 = vst.msk [vmem:[#allocation3 + $0x78] sm:$0xff] %vm19_vm1, %v1691_v25 }
 0x10a   :  { %2763 = vst [vmem:[#allocation15_spill] sm:$0xff] %v2121_v28  ;;  %v2130_v14 = vmax.f32 %v2117_v44, %v438_v50  ;;  %v2143_v50 = vld [vmem:[#allocation2 + $0x78] sm:$0xff] }
 0x10b   :  { %1148 = vst.msk [vmem:[#allocation2 + $0x70] sm:$0xff] %vm19_vm1, %v2121_v28 }
 0x10c   :  { %2764 = vst [vmem:[#allocation16_spill] sm:$0xff] %v2130_v14  ;;  %692 = vperm.xlu2 %1463, %v2130_v14  }
 0x10d   :  { %64 = vst.msk [vmem:[#allocation3 + $0x80] sm:$0xff] %vm19_vm1, %v1691_v25 }
 0x10e   :  { %1135 = vst.msk [vmem:[#allocation2 + $0x8] sm:$0xff] %vm19_vm1, %v2130_v14 }
 0x10f   :  { %65 = vst.msk [vmem:[#allocation3 + $0x88] sm:$0xff] %vm19_vm1, %v1691_v25  ;;  %687 = vperm.xlu1 %1462, %v2105_v48  }
 0x110   :  { %66 = vst.msk [vmem:[#allocation3 + $0x90] sm:$0xff] %vm19_vm1, %v1691_v25 }
 0x111   :  { %2765 = vst [vmem:[#allocation17_spill] sm:$0xff] %v2141_v27  ;;  %v441_v8 = vpop.xlane.xlu1 %440  ;;  %v480_v54 = vpop.xlane.xlu0 %479 }
 0x112   :  { %2766 = vst [vmem:[#allocation18_spill] sm:$0xff] %v2143_v50  ;;  %v2149_v14 = vmax.f32 %v2141_v27, %v441_v8  ;;  %v2152_v44 = vmax.f32 %v2143_v50, %v480_v54  ;;  %v2167_v54 = vld [vmem:[#allocation2 + $0x80] sm:$0xff]  ;;  %v2181_v27 = vld [vmem:[#allocation2 + $0x88] sm:$0xff] }
 0x113   :  { %67 = vst.msk [vmem:[#allocation3 + $0x98] sm:$0xff] %vm19_vm1, %v1691_v25 }
 0x114   :  { %68 = vst.msk [vmem:[#allocation3 + $0xa0] sm:$0xff] %vm19_vm1, %v1691_v25  ;;  %762 = vperm.xlu0 %1464, %v2152_v44  }
 0x115   :  { %69 = vst.msk [vmem:[#allocation3 + $0xa8] sm:$0xff] %vm19_vm1, %v1691_v25 }
 0x116   :  { %2767 = vst [vmem:[#allocation19_spill] sm:$0xff] %v2149_v14 }
 0x117   :  { %2768 = vst [vmem:[#allocation20_spill] sm:$0xff] %v2152_v44  ;;  %757 = vperm.xlu1 %1462, %v2121_v28  }
 0x118   :  { %70 = vst.msk [vmem:[#allocation3 + $0xb0] sm:$0xff] %vm19_vm1, %v1691_v25 }
 0x119   :  { %71 = vst.msk [vmem:[#allocation3 + $0xb8] sm:$0xff] %vm19_vm1, %v1691_v25  ;;  %v483_v8 = vpop.xlane.xlu1 %482 }
 0x11a   :  { %1136 = vst.msk [vmem:[#allocation2 + $0x10] sm:$0xff] %vm19_vm1, %v2149_v14  ;;  %v2173_v48 = vmax.f32 %v2167_v54, %v483_v8 }
 0x11b   :  { %1149 = vst.msk [vmem:[#allocation2 + $0x78] sm:$0xff] %vm19_vm1, %v2152_v44  ;;  %v2183_v44 = vld [vmem:[#allocation2 + $0x18] sm:$0xff] }
 0x11c   :  { %72 = vst.msk [vmem:[#allocation3 + $0xc0] sm:$0xff] %vm19_vm1, %v1691_v25  ;;  %767 = vperm.xlu2 %1463, %v2173_v48   ;;  %697 = vperm.xlu0 %1464, %v2149_v14   ;;  %v2225_v14 = vld [vmem:[#allocation2 + $0x30] sm:$0xff] }
 0x11d   :  { %2769 = vst [vmem:[#allocation21_spill] sm:$0xff] %v2167_v54 }
 0x11e   :  { %73 = vst.msk [vmem:[#allocation3 + $0xc8] sm:$0xff] %vm19_vm1, %v1691_v25 }
 0x11f   :  { %74 = vst.msk [vmem:[#allocation3 + $0xd0] sm:$0xff] %vm19_vm1, %v1691_v25  ;;  %v486_v28 = vpop.xlane.xlu2 %485 }
 0x120   :  { %75 = vst.msk [vmem:[#allocation3 + $0xd8] sm:$0xff] %vm19_vm1, %v1691_v25  ;;  %v2186_v25 = vmax.f32 %v2181_v27, %v486_v28  ;;  %v2201_v28 = vld [vmem:[#allocation2 + $0x20] sm:$0xff] }
 0x121   :  { %2770 = vst [vmem:[#allocation22_spill] sm:$0xff] %v2173_v48  ;;  %v444_v8 = vpop.xlane.xlu1 %443 }
 0x122   :  { %1150 = vst.msk [vmem:[#allocation2 + $0x80] sm:$0xff] %vm19_vm1, %v2173_v48  ;;  %v2193_v60 = vmax.f32 %v2183_v44, %v444_v8  ;;  %772 = vperm.xlu1 %1462, %v2186_v25   ;;  %v2203_v48 = vld [vmem:[#allocation2 + $0x90] sm:$0xff] }
 0x123   :  { %2771 = vst [vmem:[#allocation23_spill] sm:$0xff] %v2181_v27 }
 0x124   :  { %2772 = vst [vmem:[#allocation24_spill] sm:$0xff] %v2183_v44  ;;  %702 = vperm.xlu2 %1463, %v2193_v60  }
 0x125   :  { %2773 = vst [vmem:[#allocation25_spill] sm:$0xff] %v2186_v25 }
 0x126   :  { %1151 = vst.msk [vmem:[#allocation2 + $0x88] sm:$0xff] %vm19_vm1, %v2186_v25 }
 0x127   :  { %2774 = vst [vmem:[#allocation26_spill] sm:$0xff] %v2193_v60  ;;  %v447_v50 = vpop.xlane.xlu2 %446  ;;  %v489_v27 = vpop.xlane.xlu0 %488 }
 0x128   :  { %1137 = vst.msk [vmem:[#allocation2 + $0x18] sm:$0xff] %vm19_vm1, %v2193_v60  ;;  %v2206_v54 = vmax.f32 %v2201_v28, %v447_v50  ;;  %v2209_v8 = vmax.f32 %v2203_v48, %v489_v27  ;;  %v2221_v50 = vld [vmem:[#allocation2 + $0x28] sm:$0xff]  ;;  %v2223_v27 = vld [vmem:[#allocation2 + $0x98] sm:$0xff] }
 0x129   :  { %2775 = vst [vmem:[#allocation27_spill] sm:$0xff] %v2201_v28 }
 0x12a   :  { %2776 = vst [vmem:[#allocation28_spill] sm:$0xff] %v2203_v48  ;;  %707 = vperm.xlu1 %1462, %v2206_v54   ;;  %777 = vperm.xlu0 %1464, %v2209_v8  }
 0x12b   :  { %2777 = vst [vmem:[#allocation29_spill] sm:$0xff] %v2206_v54 }
 0x12c   :  { %2778 = vst [vmem:[#allocation30_spill] sm:$0xff] %v2209_v8 }
 0x12d   :  { %1138 = vst.msk [vmem:[#allocation2 + $0x20] sm:$0xff] %vm19_vm1, %v2206_v54 }
 0x12e   :  { %1152 = vst.msk [vmem:[#allocation2 + $0x90] sm:$0xff] %vm19_vm1, %v2209_v8  ;;  %v2252_v8 = vld [vmem:[#allocation2 + $0x38] sm:$0xff] }
 0x12f   :  { %2779 = vst [vmem:[#allocation31_spill] sm:$0xff] %v2221_v50  ;;  %v450_v60 = vpop.xlane.xlu2 %449  ;;  %v492_v44 = vpop.xlane.xlu1 %491 }
 0x130   :  { %2780 = vst [vmem:[#allocation32_spill] sm:$0xff] %v2223_v27  ;;  %v2228_v28 = vmax.f32 %v2221_v50, %v450_v60  ;;  %v2231_v25 = vmax.f32 %v2223_v27, %v492_v44  ;;  %v2250_v44 = vld [vmem:[#allocation2 + $0xa0] sm:$0xff] }
 0x131   :  { %2781 = vst [vmem:[#allocation33_spill] sm:$0xff] %v2225_v14  ;;  %v453_v48 = vpop.xlane.xlu0 %452  ;;  %v2272_v50 = vld [vmem:[#allocation2 + $0x40] sm:$0xff] }
 0x132   :  { %2782 = vst [vmem:[#allocation34_spill] sm:$0xff] %v2228_v28  ;;  %v2240_v11 = vmax.f32 %v2225_v14, %v453_v48  ;;  %712 = vperm.xlu2 %1463, %v2228_v28  }
 0x133   :  { %2783 = vst [vmem:[#allocation35_spill] sm:$0xff] %v2231_v25 }
 0x134   :  { %1139 = vst.msk [vmem:[#allocation2 + $0x28] sm:$0xff] %vm19_vm1, %v2228_v28  ;;  %717 = vperm.xlu1 %1462, %v2240_v11  }
 0x135   :  { %2784 = vst [vmem:[#allocation36_spill] sm:$0xff] %v2240_v11 }
 0x136   :  { %1153 = vst.msk [vmem:[#allocation2 + $0x98] sm:$0xff] %vm19_vm1, %v2231_v25 }
 0x137   :  { %1140 = vst.msk [vmem:[#allocation2 + $0x30] sm:$0xff] %vm19_vm1, %v2240_v11  ;;  %v495_v54 = vpop.xlane.xlu2 %494 }
 0x138   :  { %2785 = vst [vmem:[#allocation37_spill] sm:$0xff] %v2250_v44  ;;  %v2255_v48 = vmax.f32 %v2250_v44, %v495_v54  ;;  %v2270_v54 = vld [vmem:[#allocation2 + $0xa8] sm:$0xff] }
 0x139   :  { %2786 = vst [vmem:[#allocation38_spill] sm:$0xff] %v2252_v8  ;;  %v456_v28 = vpop.xlane.xlu1 %455 }
 0x13a   :  { %2787 = vst [vmem:[#allocation39_spill] sm:$0xff] %v2255_v48  ;;  %v2262_v60 = vmax.f32 %v2252_v8, %v456_v28  ;;  %782 = vperm.xlu2 %1463, %v2231_v25  }
 0x13b   :  { %1154 = vst.msk [vmem:[#allocation2 + $0xa0] sm:$0xff] %vm19_vm1, %v2255_v48 }
 0x13c   :  { %2788 = vst [vmem:[#allocation40_spill] sm:$0xff] %v2262_v60  ;;  %787 = vperm.xlu1 %1462, %v2255_v48  }
 0x13d   :  { %1141 = vst.msk [vmem:[#allocation2 + $0x38] sm:$0xff] %vm19_vm1, %v2262_v60 }
 0x13e   :  { %2789 = vst [vmem:[#allocation41_spill] sm:$0xff] %v2270_v54 }
 0x13f   :  { %v498_v14 = vpop.xlane.xlu0 %497  ;;  %2790 = vst [vmem:[#allocation42_spill] sm:$0xff] %v2272_v50 }
 0x140   :  { %v2275_v44 = vmax.f32 %v2270_v54, %v498_v14  ;;  %v2291_v14 = vld [vmem:[#allocation2 + $0xb0] sm:$0xff]  ;;  %v2293_v54 = vld [vmem:[#allocation2 + $0x48] sm:$0xff] }
 0x141   :  { %v459_v28 = vpop.xlane.xlu2 %458  ;;  %2793 = vst [vmem:[#allocation45_spill] sm:$0xff] %v2291_v14 }
 0x142   :  { %2791 = vst [vmem:[#allocation43_spill] sm:$0xff] %v2275_v44  ;;  %v2282_v11 = vmax.f32 %v2272_v50, %v459_v28  ;;  %722 = vperm.xlu2 %1463, %v2262_v60   ;;  %792 = vperm.xlu0 %1464, %v2275_v44  }
 0x143   :  { %1155 = vst.msk [vmem:[#allocation2 + $0xa8] sm:$0xff] %vm19_vm1, %v2275_v44  ;;  %v2313_v44 = vld [vmem:[#allocation2 + $0x50] sm:$0xff] }
 0x144   :  { %2792 = vst [vmem:[#allocation44_spill] sm:$0xff] %v2282_v11  ;;  %727 = vperm.xlu1 %1462, %v2282_v11  }
 0x145   :  { %1142 = vst.msk [vmem:[#allocation2 + $0x40] sm:$0xff] %vm19_vm1, %v2282_v11 }
 0x146   :  { %2794 = vst [vmem:[#allocation46_spill] sm:$0xff] %v2293_v54 }
 0x147   :  { %v501_v25 = vpop.xlane.xlu1 %500  ;;  %2798 = vst [vmem:[#allocation50_spill] sm:$0xff] %v2313_v44 }
 0x148   :  { %v2296_v28 = vmax.f32 %v2291_v14, %v501_v25  ;;  %v2311_v25 = vld [vmem:[#allocation2 + $0xb8] sm:$0xff] }
 0x149   :  { %v462_v8 = vpop.xlane.xlu0 %461  ;;  %2797 = vst [vmem:[#allocation49_spill] sm:$0xff] %v2311_v25 }
 0x14a   :  { %2795 = vst [vmem:[#allocation47_spill] sm:$0xff] %v2296_v28  ;;  %v2303_v48 = vmax.f32 %v2293_v54, %v462_v8  ;;  %797 = vperm.xlu2 %1463, %v2296_v28  }
 0x14b   :  { %1156 = vst.msk [vmem:[#allocation2 + $0xb0] sm:$0xff] %vm19_vm1, %v2296_v28  ;;  %v2333_v28 = vld [vmem:[#allocation2 + $0x58] sm:$0xff] }
 0x14c   :  { %2796 = vst [vmem:[#allocation48_spill] sm:$0xff] %v2303_v48  ;;  %732 = vperm.xlu0 %1464, %v2303_v48  }
 0x14d   :  { %1143 = vst.msk [vmem:[#allocation2 + $0x48] sm:$0xff] %vm19_vm1, %v2303_v48 }
 0x14e   :  { %2802 = vst [vmem:[#allocation54_spill] sm:$0xff] %v2333_v28 }
 0x14f   :  { %v504_v50 = vpop.xlane.xlu2 %503 }
 0x150   :  { %v2316_v14 = vmax.f32 %v2311_v25, %v504_v50  ;;  %v2331_v50 = vld [vmem:[#allocation2 + $0xc0] sm:$0xff] }
 0x151   :  { %v465_v8 = vpop.xlane.xlu1 %464  ;;  %2801 = vst [vmem:[#allocation53_spill] sm:$0xff] %v2331_v50 }
 0x152   :  { %2799 = vst [vmem:[#allocation51_spill] sm:$0xff] %v2316_v14  ;;  %v2323_v11 = vmax.f32 %v2313_v44, %v465_v8  ;;  %802 = vperm.xlu1 %1462, %v2316_v14  }
 0x153   :  { %1157 = vst.msk [vmem:[#allocation2 + $0xb8] sm:$0xff] %vm19_vm1, %v2316_v14  ;;  %v2353_v14 = vld [vmem:[#allocation2 + $0x60] sm:$0xff] }
 0x154   :  { %2800 = vst [vmem:[#allocation52_spill] sm:$0xff] %v2323_v11  ;;  %737 = vperm.xlu2 %1463, %v2323_v11  }
 0x155   :  { %1144 = vst.msk [vmem:[#allocation2 + $0x50] sm:$0xff] %vm19_vm1, %v2323_v11 }
 0x156   :  { %2806 = vst [vmem:[#allocation58_spill] sm:$0xff] %v2353_v14 }
 0x157   :  { %v507_v54 = vpop.xlane.xlu0 %506 }
 0x158   :  { %v2336_v25 = vmax.f32 %v2331_v50, %v507_v54  ;;  %v2351_v54 = vld [vmem:[#allocation2 + $0xc8] sm:$0xff] }
 0x159   :  { %v468_v8 = vpop.xlane.xlu2 %467  ;;  %2805 = vst [vmem:[#allocation57_spill] sm:$0xff] %v2351_v54 }
 0x15a   :  { %2803 = vst [vmem:[#allocation55_spill] sm:$0xff] %v2336_v25  ;;  %v2343_v48 = vmax.f32 %v2333_v28, %v468_v8  ;;  %807 = vperm.xlu0 %1464, %v2336_v25  }
 0x15b   :  { %1158 = vst.msk [vmem:[#allocation2 + $0xc0] sm:$0xff] %vm19_vm1, %v2336_v25  ;;  %v2373_v25 = vld [vmem:[#allocation2 + $0x68] sm:$0xff] }
 0x15c   :  { %2804 = vst [vmem:[#allocation56_spill] sm:$0xff] %v2343_v48  ;;  %742 = vperm.xlu1 %1462, %v2343_v48  }
 0x15d   :  { %1145 = vst.msk [vmem:[#allocation2 + $0x58] sm:$0xff] %vm19_vm1, %v2343_v48 }
 0x15e   :  { %2810 = vst [vmem:[#allocation62_spill] sm:$0xff] %v2373_v25 }
 0x15f   :  { %v510_v44 = vpop.xlane.xlu1 %509 }
 0x160   :  { %v2356_v50 = vmax.f32 %v2351_v54, %v510_v44  ;;  %v2371_v44 = vld [vmem:[#allocation2 + $0xd0] sm:$0xff] }
 0x161   :  { %v471_v8 = vpop.xlane.xlu0 %470  ;;  %2809 = vst [vmem:[#allocation61_spill] sm:$0xff] %v2371_v44 }
 0x162   :  { %2807 = vst [vmem:[#allocation59_spill] sm:$0xff] %v2356_v50  ;;  %v2363_v11 = vmax.f32 %v2353_v14, %v471_v8  ;;  %812 = vperm.xlu2 %1463, %v2356_v50  }
 0x163   :  { %1159 = vst.msk [vmem:[#allocation2 + $0xc8] sm:$0xff] %vm19_vm1, %v2356_v50 }
 0x164   :  { %2808 = vst [vmem:[#allocation60_spill] sm:$0xff] %v2363_v11  ;;  %747 = vperm.xlu0 %1464, %v2363_v11  }
 0x165   :  { %1146 = vst.msk [vmem:[#allocation2 + $0x60] sm:$0xff] %vm19_vm1, %v2363_v11 }
 0x167   :  { %v513_v28 = vpop.xlane.xlu2 %512 }
 0x168   :  { %v2376_v54 = vmax.f32 %v2371_v44, %v513_v28  ;;  %v2391_v28 = vld [vmem:[#allocation2 + $0xd8] sm:$0xff] }
 0x169   :  { %v474_v8 = vpop.xlane.xlu1 %473  ;;  %2813 = vst [vmem:[#allocation65_spill] sm:$0xff] %v2391_v28 }
 0x16a   :  { %2811 = vst [vmem:[#allocation63_spill] sm:$0xff] %v2376_v54  ;;  %v2383_v48 = vmax.f32 %v2373_v25, %v474_v8  ;;  %817 = vperm.xlu1 %1462, %v2376_v54  }
 0x16b   :  { %1160 = vst.msk [vmem:[#allocation2 + $0xd0] sm:$0xff] %vm19_vm1, %v2376_v54 }
 0x16c   :  { %2812 = vst [vmem:[#allocation64_spill] sm:$0xff] %v2383_v48  ;;  %752 = vperm.xlu2 %1463, %v2383_v48  }
 0x16d   :  { %1147 = vst.msk [vmem:[#allocation2 + $0x68] sm:$0xff] %vm19_vm1, %v2383_v48 }
 0x16f   :  { %v516_v14 = vpop.xlane.xlu0 %515  ;;  %v693_v50 = vpop.permute.xlu2 %692 }
 0x170   :  { %v2394_v44 = vmax.f32 %v2391_v28, %v516_v14  ;;  %v827_v54 = vsub.f32 %v1828_v39, %v693_v50  ;;  %v828_v48 = vsub.f32 %v1831_v41, %v693_v50 }
 0x172   :  { %2814 = vst [vmem:[#allocation66_spill] sm:$0xff] %v2394_v44  ;;  %822 = vperm.xlu0 %1464, %v2394_v44   ;;  %v885_v14 = vmul.f32 1.442695, %v827_v54  ;;  %v887_v3 = vmul.f32 1.442695, %v828_v48 }
 0x173   :  { %1161 = vst.msk [vmem:[#allocation2 + $0xd8] sm:$0xff] %vm19_vm1, %v2394_v44 }
 0x174   :  { %1465 = vpow2.f32 %v885_v14 }
 0x175   :  { %1467 = vpow2.f32 %v887_v3 }
 0x177   :  { %v768_v11 = vpop.permute.xlu2 %767 }
 0x178   :  { %v857_v8 = vsub.f32 %v1854_v56, %v768_v11  ;;  %v858_v31 = vsub.f32 %v1857_v57, %v768_v11 }
 0x17a   :  { %v945_v50 = vmul.f32 1.442695, %v857_v8  ;;  %v1466_v11 = vpop.eup %1465 }
 0x17f   :  { %v703_v42 = vpop.permute.xlu2 %702 }
 0x181   :  { %v688_v25 = vpop.permute.xlu1 %687 }
 0x182   :  { %v825_v60 = vsub.f32 %v1814_v30, %v688_v25  ;;  %v826_v27 = vsub.f32 %v1817_v32, %v688_v25  ;;  %v947_v32 = vmul.f32 1.442695, %v858_v31  ;;  %v832_v31 = vsub.f32 %v1868_v1, %v703_v42 }
 0x184   :  { %v881_v28 = vmul.f32 1.442695, %v825_v60  ;;  %v883_v4 = vmul.f32 1.442695, %v826_v27 }
 0x186   :  { %v763_v44 = vpop.permute.xlu0 %762  ;;  %1469 = vpow2.f32 %v881_v28 }
 0x187   :  { %v855_v39 = vsub.f32 %v1838_v46, %v763_v44  ;;  %v856_v41 = vsub.f32 %v1841_v47, %v763_v44  ;;  %1471 = vpow2.f32 %v883_v4  ;;  %v1468_v46 = vpop.eup %1467  ;;  %v831_v44 = vsub.f32 %v1865_v0, %v703_v42 }
 0x188   :  { %1473 = vpow2.f32 %v945_v50  ;;  %v996_v28 = vadd.f32 %v1468_v46, %v1466_v11 }
 0x189   :  { %v758_v30 = vpop.permute.xlu1 %757  ;;  %v941_v60 = vmul.f32 1.442695, %v855_v39  ;;  %v943_v25 = vmul.f32 1.442695, %v856_v41  ;;  %1475 = vpow2.f32 %v947_v32  ;;  %v893_v14 = vmul.f32 1.442695, %v831_v44 }
 0x18a   :  { %v853_v48 = vsub.f32 %v1822_v35, %v758_v30  ;;  %v854_v56 = vsub.f32 %v1825_v37, %v758_v30 }
 0x18b   :  { %1477 = vpow2.f32 %v941_v60 }
 0x18c   :  { %v2411_v57 = vpop.permute.xlu2 %712  ;;  %v937_v27 = vmul.f32 1.442695, %v853_v48  ;;  %v939_v3 = vmul.f32 1.442695, %v854_v56  ;;  %v1470_v54 = vpop.eup %1469  ;;  %1479 = vpow2.f32 %v943_v25 }
 0x18d   :  { %v1472_v4 = vpop.eup %1471 }
 0x18e   :  { %v698_v47 = vpop.permute.xlu0 %697  ;;  %1481 = vpow2.f32 %v937_v27  ;;  %v1474_v8 = vpop.eup %1473  ;;  %v993_v39 = vadd.f32 %v1472_v4, %v1470_v54 }
 0x18f   :  { %v829_v35 = vsub.f32 %v1844_v49, %v698_v47  ;;  %v830_v37 = vsub.f32 %v1847_v51, %v698_v47  ;;  %1483 = vpow2.f32 %v939_v3  ;;  %v1476_v41 = vpop.eup %1475  ;;  %v895_v49 = vmul.f32 1.442695, %v832_v31 }
 0x190   :  { %1485 = vpow2.f32 %v893_v14  ;;  %v1041_v25 = vadd.f32 %v1476_v41, %v1474_v8 }
 0x191   :  { %v889_v50 = vmul.f32 1.442695, %v829_v35  ;;  %v1478_v0 = vpop.eup %1477  ;;  %v891_v32 = vmul.f32 1.442695, %v830_v37 }
 0x192   :  { %v1480_v56 = vpop.eup %1479 }
 0x193   :  { %1487 = vpow2.f32 %v889_v50  ;;  %v1038_v11 = vadd.f32 %v1480_v56, %v1478_v0 }
 0x194   :  { %v773_v30 = vpop.permute.xlu1 %772  ;;  %997 = vadd.xlane.f32.xlu1 %v996_v28  ;;  %v783_v48 = vpop.permute.xlu2 %782  ;;  %1489 = vpow2.f32 %v891_v32 }
 0x195   :  { %994 = vadd.xlane.f32.xlu2 %v993_v39  ;;  %v1482_v60 = vpop.eup %1481  ;;  %v859_v51 = vsub.f32 %v1862_v62, %v773_v30  ;;  %v860_v42 = vsub.f32 %v1871_v2, %v773_v30  ;;  %1491 = vpow2.f32 %v895_v49  ;;  %v863_v28 = vsub.f32 %v1900_v20, %v783_v48 }
 0x196   :  { %v1484_v1 = vpop.eup %1483 }
 0x197   :  { %v949_v27 = vmul.f32 1.442695, %v859_v51  ;;  %v1035_v46 = vadd.f32 %v1484_v1, %v1482_v60  ;;  %v951_v3 = vmul.f32 1.442695, %v860_v42  ;;  %v1486_v54 = vpop.eup %1485  ;;  %v957_v0 = vmul.f32 1.442695, %v863_v28 }
 0x199   :  { %v1488_v35 = vpop.eup %1487  ;;  %1493 = vpow2.f32 %v949_v27 }
 0x19a   :  { %v1490_v31 = vpop.eup %1489  ;;  %1495 = vpow2.f32 %v951_v3 }
 0x19b   :  { %v1492_v41 = vpop.eup %1491  ;;  %v999_v30 = vadd.f32 %v1490_v31, %v1488_v35 }
 0x19c   :  { %v708_v47 = vpop.permute.xlu1 %707  ;;  %1042 = vadd.xlane.f32.xlu1 %v1041_v25  ;;  %1039 = vadd.xlane.f32.xlu0 %v1038_v11  ;;  %v778_v62 = vpop.permute.xlu0 %777  ;;  %v1002_v20 = vadd.f32 %v1492_v41, %v1486_v54 }
 0x19d   :  { %v833_v44 = vsub.f32 %v1876_v6, %v708_v47  ;;  %v834_v4 = vsub.f32 %v1879_v7, %v708_v47  ;;  %1036 = vadd.xlane.f32.xlu2 %v1035_v46  ;;  %v861_v2 = vsub.f32 %v1884_v10, %v778_v62  ;;  %v862_v37 = vsub.f32 %v1887_v12, %v778_v62  ;;  %v723_v39 = vpop.permute.xlu2 %722 }
 0x19e   :  { %v864_v6 = vsub.f32 %v1903_v22, %v783_v48  ;;  %v835_v7 = vsub.f32 %v1894_v17, %v2411_v57  ;;  %v836_v10 = vsub.f32 %v1897_v18, %v2411_v57  ;;  %v839_v51 = vsub.f32 %v1924_v43, %v723_v39 }
 0x19f   :  { %v897_v8 = vmul.f32 1.442695, %v833_v44  ;;  %v899_v14 = vmul.f32 1.442695, %v834_v4  ;;  %v953_v50 = vmul.f32 1.442695, %v861_v2  ;;  %v1494_v56 = vpop.eup %1493  ;;  %v840_v42 = vsub.f32 %v1927_v45, %v723_v39 }
 0x1a0   :  { %v955_v12 = vmul.f32 1.442695, %v862_v37  ;;  %v959_v32 = vmul.f32 1.442695, %v864_v6  ;;  %v901_v49 = vmul.f32 1.442695, %v835_v7  ;;  %v1496_v22 = vpop.eup %1495 }
 0x1a1   :  { %1497 = vpow2.f32 %v897_v8  ;;  %v903_v48 = vmul.f32 1.442695, %v836_v10  ;;  %v909_v47 = vmul.f32 1.442695, %v839_v51  ;;  %v1044_v54 = vadd.f32 %v1496_v22, %v1494_v56 }
 0x1a2   :  { %1499 = vpow2.f32 %v899_v14  ;;  %v911_v44 = vmul.f32 1.442695, %v840_v42 }
 0x1a3   :  { %1501 = vpow2.f32 %v953_v50 }
 0x1a4   :  { %1000 = vadd.xlane.f32.xlu0 %v999_v30  ;;  %1503 = vpow2.f32 %v955_v12 }
 0x1a5   :  { %1003 = vadd.xlane.f32.xlu2 %v1002_v20  ;;  %1505 = vpow2.f32 %v957_v0  ;;  %v798_v25 = vpop.permute.xlu2 %797 }
 0x1a6   :  { %v718_v17 = vpop.permute.xlu1 %717  ;;  %1507 = vpow2.f32 %v959_v32  ;;  %v870_v28 = vsub.f32 %v1953_v9, %v798_v25 }
 0x1a7   :  { %v1498_v60 = vpop.eup %1497  ;;  %v837_v18 = vsub.f32 %v1906_v24, %v718_v17  ;;  %v838_v57 = vsub.f32 %v1909_v26, %v718_v17  ;;  %1509 = vpow2.f32 %v901_v49  ;;  %v869_v24 = vsub.f32 %v1950_v5, %v798_v25 }
 0x1a8   :  { %v1500_v1 = vpop.eup %1499  ;;  %1511 = vpow2.f32 %v903_v48  ;;  %v971_v12 = vmul.f32 1.442695, %v870_v28 }
 0x1a9   :  { %v905_v11 = vmul.f32 1.442695, %v837_v18  ;;  %v907_v27 = vmul.f32 1.442695, %v838_v57  ;;  %v1005_v46 = vadd.f32 %v1500_v1, %v1498_v60  ;;  %v1502_v3 = vpop.eup %1501  ;;  %v969_v8 = vmul.f32 1.442695, %v869_v24 }
 0x1aa   :  { %v1504_v43 = vpop.eup %1503 }
 0x1ab   :  { %1513 = vpow2.f32 %v905_v11  ;;  %1006 = vadd.xlane.f32.xlu1 %v1005_v46  ;;  %v1506_v26 = vpop.eup %1505  ;;  %v1047_v4 = vadd.f32 %v1504_v43, %v1502_v3 }
 0x1ac   :  { %1515 = vpow2.f32 %v907_v27  ;;  %v1508_v45 = vpop.eup %1507 }
 0x1ad   :  { %1045 = vadd.xlane.f32.xlu2 %v1044_v54  ;;  %v1510_v35 = vpop.eup %1509  ;;  %1517 = vpow2.f32 %v909_v47  ;;  %1048 = vadd.xlane.f32.xlu0 %v1047_v4  ;;  %v1050_v39 = vadd.f32 %v1508_v45, %v1506_v26 }
 0x1ae   :  { %v788_v62 = vpop.permute.xlu1 %787  ;;  %v1512_v31 = vpop.eup %1511  ;;  %1519 = vpow2.f32 %v911_v44 }
 0x1af   :  { %v865_v2 = vsub.f32 %v1918_v36, %v788_v62  ;;  %v866_v37 = vsub.f32 %v1921_v40, %v788_v62  ;;  %v738_v7 = vpop.permute.xlu2 %737  ;;  %v1008_v10 = vadd.f32 %v1512_v31, %v1510_v35  ;;  %1521 = vpow2.f32 %v969_v8 }
 0x1b0   :  { %v845_v20 = vsub.f32 %v1972_v33, %v738_v7  ;;  %v846_v17 = vsub.f32 %v1975_v38, %v738_v7 }
 0x1b1   :  { %v1514_v14 = vpop.eup %1513  ;;  %v961_v5 = vmul.f32 1.442695, %v865_v2  ;;  %v963_v6 = vmul.f32 1.442695, %v866_v37 }
 0x1b2   :  { %v1516_v41 = vpop.eup %1515  ;;  %v921_v33 = vmul.f32 1.442695, %v845_v20  ;;  %v923_v1 = vmul.f32 1.442695, %v846_v17 }
 0x1b3   :  { %1051 = vadd.xlane.f32.xlu1 %v1050_v39  ;;  %v1011_v50 = vadd.f32 %v1516_v41, %v1514_v14  ;;  %v1518_v36 = vpop.eup %1517  ;;  %1523 = vpow2.f32 %v961_v5 }
 0x1b4   :  { %v793_v30 = vpop.permute.xlu0 %792  ;;  %v1520_v9 = vpop.eup %1519  ;;  %1525 = vpow2.f32 %v963_v6 }
 0x1b5   :  { %v867_v40 = vsub.f32 %v1934_v53, %v793_v30  ;;  %v868_v0 = vsub.f32 %v1937_v55, %v793_v30  ;;  %1009 = vadd.xlane.f32.xlu2 %v1008_v10  ;;  %1012 = vadd.xlane.f32.xlu0 %v1011_v50  ;;  %1527 = vpow2.f32 %v971_v12  ;;  %v1014_v55 = vadd.f32 %v1520_v9, %v1518_v36  ;;  %v1522_v51 = vpop.eup %1521 }
 0x1b6   :  { %v728_v32 = vpop.permute.xlu1 %727 }
 0x1b7   :  { %v965_v56 = vmul.f32 1.442695, %v867_v40  ;;  %v967_v49 = vmul.f32 1.442695, %v868_v0  ;;  %v841_v22 = vsub.f32 %v1940_v59, %v728_v32  ;;  %v842_v48 = vsub.f32 %v1943_v61, %v728_v32  ;;  %v2815_v40 = vld [vmem:[#allocation4_spill] sm:$0xff] }
 0x1b9   :  { %1529 = vpow2.f32 %v965_v56  ;;  %v913_v53 = vmul.f32 1.442695, %v841_v22  ;;  %v915_v60 = vmul.f32 1.442695, %v842_v48  ;;  %v1524_v18 = vpop.eup %1523 }
 0x1ba   :  { %1531 = vpow2.f32 %v967_v49  ;;  %v1526_v57 = vpop.eup %1525 }
 0x1bb   :  { %1533 = vpow2.f32 %v913_v53  ;;  %1015 = vadd.xlane.f32.xlu1 %v1014_v55  ;;  %v1053_v42 = vadd.f32 %v1526_v57, %v1524_v18  ;;  %v1528_v59 = vpop.eup %1527  ;;  %v2816_v53 = vld [vmem:[#allocation5_spill] sm:$0xff]  ;;  %v2817_v55 = vld [vmem:[#allocation6_spill] sm:$0xff] }
 0x1bc   :  { %1535 = vpow2.f32 %v915_v60  ;;  %v813_v25 = vpop.permute.xlu2 %812  ;;  %v1059_v43 = vadd.f32 %v1528_v59, %v1522_v51 }
 0x1bd   :  { %1537 = vpow2.f32 %v921_v33  ;;  %1054 = vadd.xlane.f32.xlu2 %v1053_v42  ;;  %v875_v35 = vsub.f32 %v2018_v16, %v813_v25  ;;  %v876_v14 = vsub.f32 %v2023_v21, %v813_v25 }
 0x1be   :  { %v733_v61 = vpop.permute.xlu0 %732  ;;  %1539 = vpow2.f32 %v923_v1 }
 0x1bf   :  { %v1530_v11 = vpop.eup %1529  ;;  %v843_v38 = vsub.f32 %v1956_v13, %v733_v61  ;;  %v844_v27 = vsub.f32 %v1959_v15, %v733_v61  ;;  %v983_v7 = vmul.f32 1.442695, %v876_v14 }
 0x1c0   :  { %v1532_v46 = vpop.eup %1531 }
 0x1c1   :  { %v1534_v3 = vpop.eup %1533  ;;  %v917_v47 = vmul.f32 1.442695, %v843_v38  ;;  %v919_v54 = vmul.f32 1.442695, %v844_v27  ;;  %v1056_v44 = vadd.f32 %v1532_v46, %v1530_v11  ;;  %v2818_v38 = vld [vmem:[#allocation7_spill] sm:$0xff]  ;;  %v2819_v46 = vld [vmem:[#allocation8_spill] sm:$0xff] }
 0x1c2   :  { %v1536_v24 = vpop.eup %1535 }
 0x1c3   :  { %1541 = vpow2.f32 %v917_v47  ;;  %1060 = vadd.xlane.f32.xlu1 %v1059_v43  ;;  %1057 = vadd.xlane.f32.xlu0 %v1056_v44  ;;  %v1017_v26 = vadd.f32 %v1536_v24, %v1534_v3  ;;  %v1538_v45 = vpop.eup %1537 }
 0x1c4   :  { %1543 = vpow2.f32 %v919_v54  ;;  %v803_v4 = vpop.permute.xlu1 %802  ;;  %v1540_v15 = vpop.eup %1539 }
 0x1c5   :  { %v871_v62 = vsub.f32 %v1966_v23, %v803_v4  ;;  %v872_v13 = vsub.f32 %v1969_v29, %v803_v4  ;;  %1018 = vadd.xlane.f32.xlu2 %v1017_v26  ;;  %v1023_v23 = vadd.f32 %v1540_v15, %v1538_v45  ;;  %v981_v29 = vmul.f32 1.442695, %v875_v35  ;;  %v2820_v4 = vld [vmem:[#allocation9_spill] sm:$0xff] }
 0x1c6   :  { %v753_v2 = vpop.permute.xlu2 %752 }
 0x1c7   :  { %v973_v37 = vmul.f32 1.442695, %v871_v62  ;;  %v975_v31 = vmul.f32 1.442695, %v872_v13  ;;  %v851_v28 = vsub.f32 %v2060_v19, %v753_v2  ;;  %v852_v8 = vsub.f32 %v2065_v34, %v753_v2  ;;  %v2821_v62 = vld [vmem:[#allocation10_spill] sm:$0xff] }
 0x1c9   :  { %v1542_v5 = vpop.eup %1541  ;;  %1545 = vpow2.f32 %v973_v37  ;;  %v933_v39 = vmul.f32 1.442695, %v851_v28  ;;  %v935_v41 = vmul.f32 1.442695, %v852_v8 }
 0x1ca   :  { %v1544_v6 = vpop.eup %1543  ;;  %1547 = vpow2.f32 %v975_v31 }
 0x1cb   :  { %1549 = vpow2.f32 %v933_v39  ;;  %1024 = vadd.xlane.f32.xlu1 %v1023_v23  ;;  %v1020_v16 = vadd.f32 %v1544_v6, %v1542_v5  ;;  %v2822_v5 = vld [vmem:[#allocation14_spill] sm:$0xff]  ;;  %v2823_v39 = vld [vmem:[#allocation16_spill] sm:$0xff]  ;;  %v2825_v6 = vld [vmem:[#allocation11_spill] sm:$0xff] }
 0x1cc   :  { %1551 = vpow2.f32 %v935_v41  ;;  %v808_v50 = vpop.permute.xlu0 %807  ;;  %v2824_v41 = vsub.f32 %v2822_v5, %v2823_v39  ;;  %v547_v5 = vld [vmem:[#allocation3 + $0x10] sm:$0xff] }
 0x1cd   :  { %1021 = vadd.xlane.f32.xlu0 %v1020_v16  ;;  %v873_v19 = vsub.f32 %v1986_v52, %v808_v50  ;;  %v874_v34 = vsub.f32 %v1991_v58, %v808_v50  ;;  %1553 = vpow2.f32 %v981_v29  ;;  %v2826_v29 = vld [vmem:[#allocation12_spill] sm:$0xff]  ;;  %v2828_v50 = vld [vmem:[#allocation18_spill] sm:$0xff] }
 0x1ce   :  { %v743_v21 = vpop.permute.xlu1 %742  ;;  %1555 = vpow2.f32 %v983_v7  ;;  %v603_v23 = vmul.f32 1.442695, %v2824_v41  ;;  %v2827_v16 = vsub.f32 %v2825_v6, %v2826_v29  ;;  %v2849_v41 = vld [vmem:[#allocation28_spill] sm:$0xff] }
 0x1cf   :  { %v1546_v10 = vpop.eup %1545  ;;  %v977_v12 = vmul.f32 1.442695, %v873_v19  ;;  %v979_v30 = vmul.f32 1.442695, %v874_v34  ;;  %v847_v36 = vsub.f32 %v1996_v63, %v743_v21  ;;  %v848_v0 = vsub.f32 %v2815_v40, %v743_v21  ;;  %v2829_v19 = vld [vmem:[#allocation20_spill] sm:$0xff]  ;;  %v2834_v40 = vld [vmem:[#allocation13_spill] sm:$0xff] }
 0x1d0   :  { %v1548_v9 = vpop.eup %1547  ;;  %v601_v7 = vmul.f32 1.442695, %v2827_v16  ;;  %v2830_v34 = vsub.f32 %v2828_v50, %v2829_v19  ;;  %v548_v16 = vld [vmem:[#allocation3 + $0x18] sm:$0xff] }
 0x1d1   :  { %v1550_v20 = vpop.eup %1549  ;;  %1557 = vpow2.f32 %v977_v12  ;;  %v925_v32 = vmul.f32 1.442695, %v847_v36  ;;  %v927_v56 = vmul.f32 1.442695, %v848_v0  ;;  %v1062_v49 = vadd.f32 %v1548_v9, %v1546_v10  ;;  %v2831_v10 = vld [vmem:[#allocation21_spill] sm:$0xff]  ;;  %v2832_v12 = vld [vmem:[#allocation22_spill] sm:$0xff] }
 0x1d2   :  { %v1552_v22 = vpop.eup %1551  ;;  %1559 = vpow2.f32 %v979_v30  ;;  %v631_v21 = vmul.f32 1.442695, %v2830_v34  ;;  %v2833_v30 = vsub.f32 %v2831_v10, %v2832_v12  ;;  %v2835_v0 = vld [vmem:[#allocation15_spill] sm:$0xff] }
 0x1d3   :  { %1561 = vpow2.f32 %v925_v32  ;;  %1063 = vadd.xlane.f32.xlu2 %v1062_v49  ;;  %v1032_v52 = vadd.f32 %v1552_v22, %v1550_v20  ;;  %v1554_v58 = vpop.eup %1553  ;;  %v2836_v9 = vsub.f32 %v2834_v40, %v2835_v0  ;;  %v545_v22 = vld [vmem:[#allocation3] sm:$0xff]  ;;  %v2853_v50 = vld [vmem:[#allocation35_spill] sm:$0xff] }
 0x1d4   :  { %1563 = vpow2.f32 %v927_v56  ;;  %v1556_v48 = vpop.eup %1555  ;;  %v633_v36 = vmul.f32 1.442695, %v2833_v30  ;;  %v546_v56 = vld [vmem:[#allocation3 + $0x8] sm:$0xff] }
 0x1d5   :  { %1033 = vadd.xlane.f32.xlu1 %v1032_v52  ;;  %v1068_v25 = vadd.f32 %v1556_v48, %v1554_v58  ;;  %v629_v20 = vmul.f32 1.442695, %v2836_v9  ;;  %v1166_v9 = vld [vmem:[#allocation2 + $0x8] sm:$0xff] }
 0x1d6   :  { %v748_v17 = vpop.permute.xlu0 %747 }
 0x1d7   :  { %v1558_v63 = vpop.eup %1557  ;;  %v849_v60 = vsub.f32 %v2816_v53, %v748_v17  ;;  %v850_v51 = vsub.f32 %v2817_v55, %v748_v17  ;;  %v2837_v53 = vld [vmem:[#allocation17_spill] sm:$0xff] }
 0x1d8   :  { %v1560_v18 = vpop.eup %1559 }
 0x1d9   :  { %v1562_v33 = vpop.eup %1561  ;;  %v929_v57 = vmul.f32 1.442695, %v849_v60  ;;  %v931_v1 = vmul.f32 1.442695, %v850_v51  ;;  %v1065_v42 = vadd.f32 %v1560_v18, %v1558_v63  ;;  %v2838_v60 = vld [vmem:[#allocation19_spill] sm:$0xff] }
 0x1da   :  { %v1564_v59 = vpop.eup %1563  ;;  %v2839_v55 = vsub.f32 %v2837_v53, %v2838_v60  ;;  %v1165_v60 = vld [vmem:[#allocation2] sm:$0xff] }
 0x1db   :  { %1565 = vpow2.f32 %v929_v57  ;;  %1066 = vadd.xlane.f32.xlu0 %v1065_v42  ;;  %v1026_v61 = vadd.f32 %v1564_v59, %v1562_v33  ;;  %v2840_v57 = vld [vmem:[#allocation24_spill] sm:$0xff] }
 0x1dc   :  { %1567 = vpow2.f32 %v931_v1  ;;  %v818_v11 = vpop.permute.xlu1 %817  ;;  %v605_v51 = vmul.f32 1.442695, %v2839_v55  ;;  %v2841_v1 = vld [vmem:[#allocation26_spill] sm:$0xff] }
 0x1dd   :  { %1069 = vadd.xlane.f32.xlu1 %v1068_v25  ;;  %1027 = vadd.xlane.f32.xlu2 %v1026_v61  ;;  %v877_v27 = vsub.f32 %v2818_v38, %v818_v11  ;;  %v878_v3 = vsub.f32 %v2819_v46, %v818_v11  ;;  %v2842_v42 = vsub.f32 %v2840_v57, %v2841_v1  ;;  %v561_v61 = vld [vmem:[#allocation3 + $0x80] sm:$0xff]  ;;  %v560_v11 = vld [vmem:[#allocation3 + $0x78] sm:$0xff] }
 0x1de   :  { %v2859_v57 = vld [vmem:[#allocation36_spill] sm:$0xff] }
 0x1df   :  { %v985_v47 = vmul.f32 1.442695, %v877_v27  ;;  %v987_v54 = vmul.f32 1.442695, %v878_v3  ;;  %v607_v59 = vmul.f32 1.442695, %v2842_v42 }
 0x1e0   :  { %v559_v27 = vld [vmem:[#allocation3 + $0x70] sm:$0xff] }
 0x1e1   :  { %v1566_v43 = vpop.eup %1565  ;;  %1569 = vpow2.f32 %v985_v47 }
 0x1e2   :  { %v1568_v44 = vpop.eup %1567  ;;  %1571 = vpow2.f32 %v987_v54 }
 0x1e3   :  { %v1029_v24 = vadd.f32 %v1568_v44, %v1566_v43  ;;  %v2843_v44 = vld [vmem:[#allocation27_spill] sm:$0xff] }
 0x1e4   :  { %v823_v26 = vpop.permute.xlu0 %822 }
 0x1e5   :  { %1030 = vadd.xlane.f32.xlu0 %v1029_v24  ;;  %v879_v45 = vsub.f32 %v2820_v4, %v823_v26  ;;  %v880_v13 = vsub.f32 %v2821_v62, %v823_v26  ;;  %v2844_v24 = vld [vmem:[#allocation29_spill] sm:$0xff] }
 0x1e6   :  { %v2845_v26 = vsub.f32 %v2843_v44, %v2844_v24  ;;  %v2862_v44 = vld [vmem:[#allocation40_spill] sm:$0xff] }
 0x1e7   :  { %v1570_v15 = vpop.eup %1569  ;;  %v989_v35 = vmul.f32 1.442695, %v879_v45  ;;  %v991_v2 = vmul.f32 1.442695, %v880_v13 }
 0x1e8   :  { %v1572_v37 = vpop.eup %1571  ;;  %v609_v4 = vmul.f32 1.442695, %v2845_v26 }
 0x1e9   :  { %1573 = vpow2.f32 %v989_v35  ;;  %v1071_v31 = vadd.f32 %v1572_v37, %v1570_v15  ;;  %v2847_v37 = vld [vmem:[#allocation25_spill] sm:$0xff] }
 0x1ea   :  { %1575 = vpow2.f32 %v991_v2  ;;  %v2846_v2 = vld [vmem:[#allocation23_spill] sm:$0xff] }
 0x1eb   :  { %1072 = vadd.xlane.f32.xlu2 %v1071_v31  ;;  %1577 = vpow2.f32 %v603_v23  ;;  %v2848_v31 = vsub.f32 %v2846_v2, %v2847_v37  ;;  %v2850_v23 = vld [vmem:[#allocation30_spill] sm:$0xff]  ;;  %v1181_v2 = vld [vmem:[#allocation2 + $0x80] sm:$0xff] }
 0x1ec   :  { %1579 = vpow2.f32 %v601_v7  ;;  %v2851_v6 = vsub.f32 %v2849_v41, %v2850_v23  ;;  %v2852_v7 = vld [vmem:[#allocation32_spill] sm:$0xff] }
 0x1ed   :  { %1581 = vpow2.f32 %v631_v21  ;;  %v2854_v19 = vsub.f32 %v2852_v7, %v2853_v50 }
 0x1ee   :  { %1583 = vpow2.f32 %v633_v36  ;;  %v637_v29 = vmul.f32 1.442695, %v2851_v6  ;;  %v1179_v6 = vld [vmem:[#allocation2 + $0x70] sm:$0xff] }
 0x1ef   :  { %v1574_v28 = vpop.eup %1573  ;;  %1585 = vpow2.f32 %v629_v20  ;;  %v639_v34 = vmul.f32 1.442695, %v2854_v19 }
 0x1f0   :  { %v1576_v8 = vpop.eup %1575  ;;  %1587 = vpow2.f32 %v605_v51 }
 0x1f1   :  { %v1074_v14 = vadd.f32 %v1576_v8, %v1574_v28  ;;  %v1578_v32 = vpop.eup %1577  ;;  %1589 = vpow2.f32 %v607_v59  ;;  %v635_v28 = vmul.f32 1.442695, %v2848_v31 }
 0x1f2   :  { %v1580_v49 = vpop.eup %1579  ;;  %v658_v52 = vmul.f32 %v1578_v32, %v546_v56 }
 0x1f3   :  { %1075 = vadd.xlane.f32.xlu0 %v1074_v14  ;;  %v657_v48 = vmul.f32 %v1580_v49, %v545_v22  ;;  %v1582_v33 = vpop.eup %1581  ;;  %v549_v49 = vld [vmem:[#allocation3 + $0x20] sm:$0xff] }
 0x1f4   :  { %v1584_v25 = vpop.eup %1583  ;;  %v672_v3 = vmul.f32 %v1582_v33, %v560_v11  ;;  %v2858_v33 = vld [vmem:[#allocation33_spill] sm:$0xff] }
 0x1f5   :  { %v1586_v38 = vpop.eup %1585  ;;  %v673_v46 = vmul.f32 %v1584_v25, %v561_v61  ;;  %v2860_v1 = vsub.f32 %v2858_v33, %v2859_v57  ;;  %v562_v25 = vld [vmem:[#allocation3 + $0x88] sm:$0xff]  ;;  %v1167_v57 = vld [vmem:[#allocation2 + $0x10] sm:$0xff] }
 0x1f6   :  { %v671_v43 = vmul.f32 %v1586_v38, %v559_v27  ;;  %v1588_v14 = vpop.eup %1587 }
 0x1f7   :  { %v1590_v39 = vpop.eup %1589  ;;  %v659_v21 = vmul.f32 %v1588_v14, %v547_v5  ;;  %v613_v42 = vmul.f32 1.442695, %v2860_v1  ;;  %v564_v14 = vld [vmem:[#allocation3 + $0x98] sm:$0xff] }
 0x1f8   :  { %v660_v12 = vmul.f32 %v1590_v39, %v548_v16  ;;  %v1180_v5 = vld [vmem:[#allocation2 + $0x78] sm:$0xff] }
 0x1f9   :  { %v2865_v16 = vld [vmem:[#allocation39_spill] sm:$0xff] }
 0x207   :  { %v998_v58 = vpop.xlane.xlu1 %997 }
 0x208   :  { %v1078_v17 = vadd.f32 %v998_v58, %v658_v52  ;;  %v995_v63 = vpop.xlane.xlu2 %994  ;;  %v2855_v52 = vld [vmem:[#allocation31_spill] sm:$0xff]  ;;  %v2856_v58 = vld [vmem:[#allocation34_spill] sm:$0xff] }
 0x209   :  { %v1077_v18 = vadd.f32 %v995_v63, %v657_v48  ;;  %v2857_v48 = vsub.f32 %v2855_v52, %v2856_v58  ;;  %v2870_v52 = vld [vmem:[#allocation45_spill] sm:$0xff]  ;;  %v2871_v58 = vld [vmem:[#allocation47_spill] sm:$0xff] }
 0x20a   :  { %1107 = vst.msk [vmem:[#allocation3 + $0x8] sm:$0xff] %vm19_vm1, %v1078_v17 }
 0x20b   :  { %1106 = vst.msk [vmem:[#allocation3] sm:$0xff] %vm19_vm1, %v1077_v18  ;;  %v611_v17 = vmul.f32 1.442695, %v2857_v48  ;;  %v2872_v48 = vsub.f32 %v2870_v52, %v2871_v58 }
 0x20f   :  { %v1043_v47 = vpop.xlane.xlu1 %1042  ;;  %v1040_v54 = vpop.xlane.xlu0 %1039 }
 0x210   :  { %v1093_v45 = vadd.f32 %v1043_v47, %v673_v46  ;;  %v1092_v62 = vadd.f32 %v1040_v54, %v672_v3  ;;  %v1037_v13 = vpop.xlane.xlu2 %1036  ;;  %v563_v3 = vld [vmem:[#allocation3 + $0x90] sm:$0xff] }
 0x211   :  { %v1194_v15 = vld [vmem:[#allocation3 + $0x8] sm:$0xff]  ;;  %v1091_v35 = vadd.f32 %v1037_v13, %v671_v43  ;;  %v2861_v43 = vld [vmem:[#allocation38_spill] sm:$0xff] }
 0x212   :  { %1591 = vlog2.f32 %v1194_v15  ;;  %v1193_v8 = vld [vmem:[#allocation3] sm:$0xff]  ;;  %1122 = vst.msk [vmem:[#allocation3 + $0x80] sm:$0xff] %vm19_vm1, %v1093_v45  ;;  %v2863_v24 = vsub.f32 %v2861_v43, %v2862_v44 }
 0x213   :  { %1593 = vlog2.f32 %v1193_v8  ;;  %1121 = vst.msk [vmem:[#allocation3 + $0x78] sm:$0xff] %vm19_vm1, %v1092_v62 }
 0x214   :  { %1595 = vpow2.f32 %v609_v4  ;;  %1120 = vst.msk [vmem:[#allocation3 + $0x70] sm:$0xff] %vm19_vm1, %v1091_v35  ;;  %v615_v26 = vmul.f32 1.442695, %v2863_v24 }
 0x215   :  { %1597 = vpow2.f32 %v635_v28 }
 0x216   :  { %1599 = vpow2.f32 %v637_v29  ;;  %v2864_v29 = vld [vmem:[#allocation37_spill] sm:$0xff] }
 0x217   :  { %v1001_v10 = vpop.xlane.xlu0 %1000  ;;  %1601 = vpow2.f32 %v639_v34  ;;  %v2866_v7 = vsub.f32 %v2864_v29, %v2865_v16 }
 0x218   :  { %v1592_v30 = vpop.eup %1591  ;;  %v1079_v36 = vadd.f32 %v1001_v10, %v659_v21  ;;  %v1004_v40 = vpop.xlane.xlu2 %1003  ;;  %v550_v21 = vld [vmem:[#allocation3 + $0x28] sm:$0xff] }
 0x219   :  { %v1594_v0 = vpop.eup %1593  ;;  %v1224_v20 = vmul.f32 0.6931472, %v1592_v30  ;;  %v1209_v32 = vld [vmem:[#allocation3 + $0x80] sm:$0xff]  ;;  %v1080_v56 = vadd.f32 %v1004_v40, %v660_v12  ;;  %v641_v50 = vmul.f32 1.442695, %v2866_v7  ;;  %v2868_v40 = vld [vmem:[#allocation43_spill] sm:$0xff] }
 0x21a   :  { %v1596_v22 = vpop.eup %1595  ;;  %v1222_v63 = vmul.f32 0.6931472, %v1594_v0  ;;  %1603 = vlog2.f32 %v1209_v32  ;;  %v1208_v53 = vld [vmem:[#allocation3 + $0x78] sm:$0xff]  ;;  %1108 = vst.msk [vmem:[#allocation3 + $0x10] sm:$0xff] %vm19_vm1, %v1079_v36  ;;  %v2867_v36 = vld [vmem:[#allocation41_spill] sm:$0xff]  ;;  %v551_v32 = vld [vmem:[#allocation3 + $0x30] sm:$0xff] }
 0x21b   :  { %v1278_v55 = vadd.f32 %v1224_v20, %v1166_v9  ;;  %1605 = vlog2.f32 %v1208_v53  ;;  %v1207_v51 = vld [vmem:[#allocation3 + $0x70] sm:$0xff]  ;;  %1109 = vst.msk [vmem:[#allocation3 + $0x18] sm:$0xff] %vm19_vm1, %v1080_v56  ;;  %v1598_v18 = vpop.eup %1597  ;;  %v661_v61 = vmul.f32 %v1596_v22, %v549_v49  ;;  %v2869_v0 = vsub.f32 %v2867_v36, %v2868_v40 }
 0x21c   :  { %v1277_v59 = vadd.f32 %v1222_v63, %v1165_v60  ;;  %1607 = vlog2.f32 %v1207_v51  ;;  %v1600_v11 = vpop.eup %1599  ;;  %v674_v47 = vmul.f32 %v1598_v18, %v562_v25  ;;  %v552_v25 = vld [vmem:[#allocation3 + $0x38] sm:$0xff] }
 0x21d   :  { %1306 = vst.msk [vmem:[%s2688_s3 + $0x8] sm:$0xff] %vm19_vm1, %v1278_v55  ;;  %1609 = vpow2.f32 %v611_v17  ;;  %v1602_v27 = vpop.eup %1601  ;;  %v675_v28 = vmul.f32 %v1600_v11, %v563_v3  ;;  %v643_v9 = vmul.f32 1.442695, %v2869_v0  ;;  %v645_v17 = vmul.f32 1.442695, %v2872_v48  ;;  %v2873_v11 = vld [vmem:[#allocation42_spill] sm:$0xff] }
 0x21e   :  { %1305 = vst.msk [vmem:[%s2688_s3] sm:$0xff] %vm19_vm1, %v1277_v59  ;;  %v1007_v38 = vpop.xlane.xlu1 %1006  ;;  %1611 = vpow2.f32 %v613_v42  ;;  %v676_v12 = vmul.f32 %v1602_v27, %v564_v14  ;;  %v1169_v14 = vld [vmem:[#allocation2 + $0x20] sm:$0xff] }
 0x21f   :  { %v1081_v46 = vadd.f32 %v1007_v38, %v661_v61  ;;  %v1168_v61 = vld [vmem:[#allocation2 + $0x18] sm:$0xff]  ;;  %v2874_v38 = vld [vmem:[#allocation44_spill] sm:$0xff] }
 0x220   :  { %v1604_v54 = vpop.eup %1603  ;;  %v1046_v4 = vpop.xlane.xlu2 %1045  ;;  %v2875_v27 = vsub.f32 %v2873_v11, %v2874_v38 }
 0x221   :  { %v1606_v45 = vpop.eup %1605  ;;  %v1254_v62 = vmul.f32 0.6931472, %v1604_v54  ;;  %v1195_v13 = vld [vmem:[#allocation3 + $0x10] sm:$0xff]  ;;  %1110 = vst.msk [vmem:[#allocation3 + $0x20] sm:$0xff] %vm19_vm1, %v1081_v46  ;;  %v1094_v15 = vadd.f32 %v1046_v4, %v674_v47  ;;  %v1049_v8 = vpop.xlane.xlu0 %1048 }
 0x222   :  { %v1608_v35 = vpop.eup %1607  ;;  %v1252_v37 = vmul.f32 0.6931472, %v1606_v45  ;;  %1613 = vlog2.f32 %v1195_v13  ;;  %v1196_v31 = vld [vmem:[#allocation3 + $0x18] sm:$0xff]  ;;  %v1095_v34 = vadd.f32 %v1049_v8, %v675_v28  ;;  %v617_v46 = vmul.f32 1.442695, %v2875_v27 }
 0x223   :  { %v1293_v39 = vadd.f32 %v1254_v62, %v1181_v2  ;;  %v1250_v41 = vmul.f32 0.6931472, %v1608_v35  ;;  %1615 = vlog2.f32 %v1196_v31  ;;  %1123 = vst.msk [vmem:[#allocation3 + $0x88] sm:$0xff] %vm19_vm1, %v1094_v15  ;;  %v1610_v23 = vpop.eup %1609  ;;  %v2876_v15 = vld [vmem:[#allocation50_spill] sm:$0xff]  ;;  %v2877_v35 = vld [vmem:[#allocation52_spill] sm:$0xff] }
 0x224   :  { %1617 = vpow2.f32 %v615_v26  ;;  %v1292_v19 = vadd.f32 %v1252_v37, %v1180_v5  ;;  %v1612_v30 = vpop.eup %1611  ;;  %v662_v49 = vmul.f32 %v1610_v23, %v550_v21  ;;  %1124 = vst.msk [vmem:[#allocation3 + $0x90] sm:$0xff] %vm19_vm1, %v1095_v34  ;;  %v565_v26 = vld [vmem:[#allocation3 + $0xa0] sm:$0xff]  ;;  %v2878_v2 = vsub.f32 %v2876_v15, %v2877_v35  ;;  %v2879_v23 = vld [vmem:[#allocation46_spill] sm:$0xff] }
 0x225   :  { %1321 = vst.msk [vmem:[%s2688_s3 + $0x80] sm:$0xff] %vm19_vm1, %v1293_v39  ;;  %v1291_v10 = vadd.f32 %v1250_v41, %v1179_v6  ;;  %1619 = vpow2.f32 %v641_v50  ;;  %v663_v51 = vmul.f32 %v1612_v30, %v551_v32  ;;  %v566_v39 = vld [vmem:[#allocation3 + $0xa8] sm:$0xff]  ;;  %v2880_v6 = vld [vmem:[#allocation48_spill] sm:$0xff]  ;;  %v567_v21 = vld [vmem:[#allocation3 + $0xb0] sm:$0xff] }
 0x226   :  { %1320 = vst.msk [vmem:[%s2688_s3 + $0x78] sm:$0xff] %vm19_vm1, %v1292_v19  ;;  %v1052_v20 = vpop.xlane.xlu1 %1051  ;;  %v621_v37 = vmul.f32 1.442695, %v2878_v2  ;;  %v2881_v29 = vsub.f32 %v2879_v23, %v2880_v6  ;;  %v1171_v2 = vld [vmem:[#allocation2 + $0x30] sm:$0xff] }
 0x227   :  { %1319 = vst.msk [vmem:[%s2688_s3 + $0x70] sm:$0xff] %vm19_vm1, %v1291_v10  ;;  %v1096_v56 = vadd.f32 %v1052_v20, %v676_v12  ;;  %v1182_v10 = vld [vmem:[#allocation2 + $0x88] sm:$0xff] }
 0x228   :  { %v1614_v22 = vpop.eup %1613  ;;  %v1197_v63 = vld [vmem:[#allocation3 + $0x20] sm:$0xff]  ;;  %v1010_v53 = vpop.xlane.xlu2 %1009  ;;  %v619_v16 = vmul.f32 1.442695, %v2881_v29 }
 0x229   :  { %v1616_v60 = vpop.eup %1615  ;;  %v1226_v55 = vmul.f32 0.6931472, %v1614_v22  ;;  %1621 = vlog2.f32 %v1197_v63  ;;  %1125 = vst.msk [vmem:[#allocation3 + $0x98] sm:$0xff] %vm19_vm1, %v1096_v56  ;;  %v1082_v18 = vadd.f32 %v1010_v53, %v662_v49  ;;  %v1013_v59 = vpop.xlane.xlu0 %1012  ;;  %v553_v49 = vld [vmem:[#allocation3 + $0x40] sm:$0xff]  ;;  %v2882_v63 = vld [vmem:[#allocation49_spill] sm:$0xff]  ;;  %v2883_v53 = vld [vmem:[#allocation51_spill] sm:$0xff] }
 0x22a   :  { %v1618_v33 = vpop.eup %1617  ;;  %1623 = vpow2.f32 %v643_v9  ;;  %v1228_v1 = vmul.f32 0.6931472, %v1616_v60  ;;  %v1210_v42 = vld [vmem:[#allocation3 + $0x88] sm:$0xff]  ;;  %v1083_v47 = vadd.f32 %v1013_v59, %v663_v51  ;;  %v2884_v60 = vsub.f32 %v2882_v63, %v2883_v53 }
 0x22b   :  { %v1279_v3 = vadd.f32 %v1226_v55, %v1167_v57  ;;  %1625 = vlog2.f32 %v1210_v42  ;;  %1111 = vst.msk [vmem:[#allocation3 + $0x28] sm:$0xff] %vm19_vm1, %v1082_v18  ;;  %v664_v43 = vmul.f32 %v1618_v33, %v552_v25  ;;  %v1620_v44 = vpop.eup %1619  ;;  %v1211_v45 = vld [vmem:[#allocation3 + $0x90] sm:$0xff]  ;;  %v1184_v57 = vld [vmem:[#allocation2 + $0x98] sm:$0xff] }
 0x22c   :  { %1627 = vpow2.f32 %v645_v17  ;;  %v1280_v54 = vadd.f32 %v1228_v1, %v1168_v61  ;;  %1112 = vst.msk [vmem:[#allocation3 + $0x30] sm:$0xff] %vm19_vm1, %v1083_v47  ;;  %v677_v5 = vmul.f32 %v1620_v44, %v565_v26  ;;  %v1183_v17 = vld [vmem:[#allocation2 + $0x90] sm:$0xff]  ;;  %v647_v55 = vmul.f32 1.442695, %v2884_v60  ;;  %v2886_v61 = vld [vmem:[#allocation64_spill] sm:$0xff] }
 0x22d   :  { %1307 = vst.msk [vmem:[%s2688_s3 + $0x10] sm:$0xff] %vm19_vm1, %v1279_v3  ;;  %1629 = vpow2.f32 %v617_v46  ;;  %v2885_v25 = vld [vmem:[#allocation62_spill] sm:$0xff] }
 0x22e   :  { %1308 = vst.msk [vmem:[%s2688_s3 + $0x18] sm:$0xff] %vm19_vm1, %v1280_v54  ;;  %v1016_v24 = vpop.xlane.xlu1 %1015  ;;  %1631 = vlog2.f32 %v1211_v45  ;;  %v2887_v11 = vsub.f32 %v2885_v25, %v2886_v61  ;;  %v555_v47 = vld [vmem:[#allocation3 + $0x50] sm:$0xff]  ;;  %v1170_v54 = vld [vmem:[#allocation2 + $0x28] sm:$0xff] }
 0x22f   :  { %v1622_v4 = vpop.eup %1621  ;;  %v1084_v62 = vadd.f32 %v1016_v24, %v664_v43  ;;  %v1186_v61 = vld [vmem:[#allocation2 + $0xa8] sm:$0xff] }
 0x230   :  { %v1624_v13 = vpop.eup %1623  ;;  %v1230_v31 = vmul.f32 0.6931472, %v1622_v4  ;;  %v1212_v28 = vld [vmem:[#allocation3 + $0x98] sm:$0xff]  ;;  %v1055_v34 = vpop.xlane.xlu2 %1054  ;;  %v627_v38 = vmul.f32 1.442695, %v2887_v11  ;;  %v554_v4 = vld [vmem:[#allocation3 + $0x48] sm:$0xff] }
 0x231   :  { %v1626_v8 = vpop.eup %1625  ;;  %1633 = vlog2.f32 %v1212_v28  ;;  %1113 = vst.msk [vmem:[#allocation3 + $0x38] sm:$0xff] %vm19_vm1, %v1084_v62  ;;  %v1097_v12 = vadd.f32 %v1055_v34, %v677_v5  ;;  %v678_v0 = vmul.f32 %v1624_v13, %v566_v39  ;;  %v2891_v39 = vld [vmem:[#allocation54_spill] sm:$0xff] }
 0x232   :  { %v1628_v41 = vpop.eup %1627  ;;  %v1281_v7 = vadd.f32 %v1230_v31, %v1169_v14  ;;  %v1256_v50 = vmul.f32 0.6931472, %v1626_v8  ;;  %v1198_v19 = vld [vmem:[#allocation3 + $0x28] sm:$0xff]  ;;  %v2889_v31 = vld [vmem:[#allocation55_spill] sm:$0xff]  ;;  %v2897_v11 = vld [vmem:[#allocation58_spill] sm:$0xff] }
 0x233   :  { %1635 = vlog2.f32 %v1198_v19  ;;  %v1630_v36 = vpop.eup %1629  ;;  %1126 = vst.msk [vmem:[#allocation3 + $0xa0] sm:$0xff] %vm19_vm1, %v1097_v12  ;;  %v679_v40 = vmul.f32 %v1628_v41, %v567_v21  ;;  %v1199_v20 = vld [vmem:[#allocation3 + $0x30] sm:$0xff]  ;;  %v2892_v41 = vld [vmem:[#allocation56_spill] sm:$0xff]  ;;  %v1172_v19 = vld [vmem:[#allocation2 + $0x38] sm:$0xff] }
 0x234   :  { %1637 = vpow2.f32 %v621_v37  ;;  %1309 = vst.msk [vmem:[%s2688_s3 + $0x20] sm:$0xff] %vm19_vm1, %v1281_v7  ;;  %v1294_v30 = vadd.f32 %v1256_v50, %v1182_v10  ;;  %v1632_v9 = vpop.eup %1631  ;;  %v665_v42 = vmul.f32 %v1630_v36, %v553_v49  ;;  %v2888_v37 = vld [vmem:[#allocation53_spill] sm:$0xff]  ;;  %v2893_v23 = vsub.f32 %v2891_v39, %v2892_v41 }
 0x235   :  { %1639 = vpow2.f32 %v619_v16  ;;  %v1258_v52 = vmul.f32 0.6931472, %v1632_v9  ;;  %v2890_v28 = vsub.f32 %v2888_v37, %v2889_v31  ;;  %v2894_v12 = vld [vmem:[#allocation57_spill] sm:$0xff]  ;;  %v568_v9 = vld [vmem:[#allocation3 + $0xb8] sm:$0xff] }
 0x236   :  { %1322 = vst.msk [vmem:[%s2688_s3 + $0x88] sm:$0xff] %vm19_vm1, %v1294_v30  ;;  %v1061_v32 = vpop.xlane.xlu1 %1060  ;;  %v1058_v56 = vpop.xlane.xlu0 %1057  ;;  %1641 = vlog2.f32 %v1199_v20  ;;  %v623_v6 = vmul.f32 1.442695, %v2893_v23  ;;  %v2895_v30 = vld [vmem:[#allocation59_spill] sm:$0xff] }
 0x237   :  { %v1634_v22 = vpop.eup %1633  ;;  %v1099_v58 = vadd.f32 %v1061_v32, %v679_v40  ;;  %v1098_v48 = vadd.f32 %v1058_v56, %v678_v0  ;;  %v1295_v1 = vadd.f32 %v1258_v52, %v1183_v17  ;;  %v649_v8 = vmul.f32 1.442695, %v2890_v28  ;;  %v1185_v52 = vld [vmem:[#allocation2 + $0xa0] sm:$0xff] }
 0x238   :  { %v1260_v51 = vmul.f32 0.6931472, %v1634_v22  ;;  %v1200_v18 = vld [vmem:[#allocation3 + $0x38] sm:$0xff]  ;;  %v1019_v3 = vpop.xlane.xlu2 %1018  ;;  %v2896_v36 = vsub.f32 %v2894_v12, %v2895_v30  ;;  %v558_v22 = vld [vmem:[#allocation3 + $0x68] sm:$0xff] }
 0x239   :  { %v1636_v33 = vpop.eup %1635  ;;  %1643 = vlog2.f32 %v1200_v18  ;;  %1128 = vst.msk [vmem:[#allocation3 + $0xb0] sm:$0xff] %vm19_vm1, %v1099_v58  ;;  %v1085_v43 = vadd.f32 %v1019_v3, %v665_v42  ;;  %v1174_v12 = vld [vmem:[#allocation2 + $0x48] sm:$0xff] }
 0x23a   :  { %v1638_v59 = vpop.eup %1637  ;;  %v1296_v27 = vadd.f32 %v1260_v51, %v1184_v57  ;;  %v1232_v46 = vmul.f32 0.6931472, %v1636_v33  ;;  %1127 = vst.msk [vmem:[#allocation3 + $0xa8] sm:$0xff] %vm19_vm1, %v1098_v48  ;;  %1645 = vpow2.f32 %v647_v55  ;;  %v1213_v26 = vld [vmem:[#allocation3 + $0xa0] sm:$0xff]  ;;  %v651_v40 = vmul.f32 1.442695, %v2896_v36 }
 0x23b   :  { %1323 = vst.msk [vmem:[%s2688_s3 + $0x90] sm:$0xff] %vm19_vm1, %v1295_v1  ;;  %v1640_v44 = vpop.eup %1639  ;;  %1647 = vlog2.f32 %v1213_v26  ;;  %v667_v62 = vmul.f32 %v1638_v59, %v555_v47  ;;  %v1187_v1 = vld [vmem:[#allocation2 + $0xb0] sm:$0xff] }
 0x23c   :  { %1324 = vst.msk [vmem:[%s2688_s3 + $0x98] sm:$0xff] %vm19_vm1, %v1296_v27  ;;  %v1282_v24 = vadd.f32 %v1232_v46, %v1170_v54  ;;  %v1642_v45 = vpop.eup %1641  ;;  %1649 = vpow2.f32 %v627_v38  ;;  %v666_v5 = vmul.f32 %v1640_v44, %v554_v4  ;;  %v2898_v38 = vld [vmem:[#allocation60_spill] sm:$0xff]  ;;  %v556_v4 = vld [vmem:[#allocation3 + $0x58] sm:$0xff] }
 0x23d   :  { %1114 = vst.msk [vmem:[#allocation3 + $0x40] sm:$0xff] %vm19_vm1, %v1085_v43  ;;  %v1234_v13 = vmul.f32 0.6931472, %v1642_v45  ;;  %v2899_v27 = vsub.f32 %v2897_v11, %v2898_v38  ;;  %v569_v54 = vld [vmem:[#allocation3 + $0xc0] sm:$0xff]  ;;  %v570_v45 = vld [vmem:[#allocation3 + $0xc8] sm:$0xff] }
 0x23e   :  { %1310 = vst.msk [vmem:[%s2688_s3 + $0x28] sm:$0xff] %vm19_vm1, %v1282_v24  ;;  %v1025_v15 = vpop.xlane.xlu1 %1024 }
 0x23f   :  { %v1644_v35 = vpop.eup %1643  ;;  %v1087_v14 = vadd.f32 %v1025_v15, %v667_v62  ;;  %v1283_v29 = vadd.f32 %v1234_v13, %v1171_v2  ;;  %v625_v46 = vmul.f32 1.442695, %v2899_v27  ;;  %v1173_v62 = vld [vmem:[#allocation2 + $0x40] sm:$0xff] }
 0x240   :  { %v1236_v16 = vmul.f32 0.6931472, %v1644_v35  ;;  %v1215_v7 = vld [vmem:[#allocation3 + $0xb0] sm:$0xff]  ;;  %v1022_v50 = vpop.xlane.xlu0 %1021  ;;  %v1646_v10 = vpop.eup %1645  ;;  %v1189_v27 = vld [vmem:[#allocation2 + $0xc0] sm:$0xff] }
 0x241   :  { %1651 = vlog2.f32 %v1215_v7  ;;  %v1214_v34 = vld [vmem:[#allocation3 + $0xa8] sm:$0xff]  ;;  %1116 = vst.msk [vmem:[#allocation3 + $0x50] sm:$0xff] %vm19_vm1, %v1087_v14  ;;  %v1086_v21 = vadd.f32 %v1022_v50, %v666_v5  ;;  %v1648_v20 = vpop.eup %1647  ;;  %v680_v58 = vmul.f32 %v1646_v10, %v568_v9  ;;  %v2901_v14 = vld [vmem:[#allocation63_spill] sm:$0xff]  ;;  %v1175_v7 = vld [vmem:[#allocation2 + $0x50] sm:$0xff] }
 0x242   :  { %1311 = vst.msk [vmem:[%s2688_s3 + $0x30] sm:$0xff] %vm19_vm1, %v1283_v29  ;;  %v1284_v0 = vadd.f32 %v1236_v16, %v1172_v19  ;;  %1653 = vlog2.f32 %v1214_v34  ;;  %v1650_v32 = vpop.eup %1649  ;;  %v1262_v56 = vmul.f32 0.6931472, %v1648_v20  ;;  %v2903_v20 = vld [vmem:[#allocation65_spill] sm:$0xff] }
 0x243   :  { %1655 = vpow2.f32 %v649_v8  ;;  %1115 = vst.msk [vmem:[#allocation3 + $0x48] sm:$0xff] %vm19_vm1, %v1086_v21  ;;  %v670_v60 = vmul.f32 %v1650_v32, %v558_v22  ;;  %v2900_v8 = vld [vmem:[#allocation61_spill] sm:$0xff]  ;;  %v2904_v32 = vld [vmem:[#allocation66_spill] sm:$0xff] }
 0x244   :  { %1657 = vpow2.f32 %v623_v6  ;;  %1312 = vst.msk [vmem:[%s2688_s3 + $0x38] sm:$0xff] %vm19_vm1, %v1284_v0  ;;  %v1201_v49 = vld [vmem:[#allocation3 + $0x40] sm:$0xff]  ;;  %v1297_v48 = vadd.f32 %v1262_v56, %v1185_v52  ;;  %v2902_v5 = vsub.f32 %v2900_v8, %v2901_v14  ;;  %v2905_v56 = vsub.f32 %v2903_v20, %v2904_v32 }
 0x245   :  { %1659 = vlog2.f32 %v1201_v49 }
 0x246   :  { %1661 = vpow2.f32 %v651_v40  ;;  %v1064_v17 = vpop.xlane.xlu2 %1063  ;;  %1325 = vst.msk [vmem:[%s2688_s3 + $0xa0] sm:$0xff] %vm19_vm1, %v1297_v48  ;;  %v653_v39 = vmul.f32 1.442695, %v2902_v5  ;;  %v557_v40 = vld [vmem:[#allocation3 + $0x60] sm:$0xff]  ;;  %v655_v49 = vmul.f32 1.442695, %v2905_v56 }
 0x247   :  { %v1652_v63 = vpop.eup %1651  ;;  %v1100_v53 = vadd.f32 %v1064_v17, %v680_v58  ;;  %v1188_v17 = vld [vmem:[#allocation2 + $0xb8] sm:$0xff] }
 0x248   :  { %v1654_v55 = vpop.eup %1653  ;;  %v1266_v51 = vmul.f32 0.6931472, %v1652_v63  ;;  %v1203_v18 = vld [vmem:[#allocation3 + $0x50] sm:$0xff]  ;;  %v1034_v33 = vpop.xlane.xlu1 %1033 }
 0x249   :  { %v1656_v57 = vpop.eup %1655  ;;  %v1264_v42 = vmul.f32 0.6931472, %v1654_v55  ;;  %1663 = vlog2.f32 %v1203_v18  ;;  %1129 = vst.msk [vmem:[#allocation3 + $0xb8] sm:$0xff] %vm19_vm1, %v1100_v53  ;;  %v1090_v59 = vadd.f32 %v1034_v33, %v670_v60  ;;  %v571_v18 = vld [vmem:[#allocation3 + $0xd0] sm:$0xff]  ;;  %v1178_v33 = vld [vmem:[#allocation2 + $0x68] sm:$0xff] }
 0x24a   :  { %v1658_v25 = vpop.eup %1657  ;;  %v1299_v3 = vadd.f32 %v1266_v51, %v1187_v1  ;;  %v1202_v47 = vld [vmem:[#allocation3 + $0x48] sm:$0xff]  ;;  %v681_v13 = vmul.f32 %v1656_v57, %v569_v54 }
 0x24b   :  { %v1660_v43 = vpop.eup %1659  ;;  %v1298_v44 = vadd.f32 %v1264_v42, %v1186_v61  ;;  %1665 = vlog2.f32 %v1202_v47  ;;  %1119 = vst.msk [vmem:[#allocation3 + $0x68] sm:$0xff] %vm19_vm1, %v1090_v59  ;;  %v668_v31 = vmul.f32 %v1658_v25, %v556_v4 }
 0x24c   :  { %v1662_v24 = vpop.eup %1661  ;;  %1327 = vst.msk [vmem:[%s2688_s3 + $0xb0] sm:$0xff] %vm19_vm1, %v1299_v3  ;;  %v1238_v26 = vmul.f32 0.6931472, %v1660_v43  ;;  %1667 = vpow2.f32 %v625_v46  ;;  %v572_v43 = vld [vmem:[#allocation3 + $0xd8] sm:$0xff] }
 0x24d   :  { %1326 = vst.msk [vmem:[%s2688_s3 + $0xa8] sm:$0xff] %vm19_vm1, %v1298_v44  ;;  %v682_v28 = vmul.f32 %v1662_v24, %v570_v45  ;;  %v1176_v24 = vld [vmem:[#allocation2 + $0x58] sm:$0xff]  ;;  %v1190_v45 = vld [vmem:[#allocation2 + $0xc8] sm:$0xff] }
 0x24e   :  { %v1285_v15 = vadd.f32 %v1238_v26, %v1173_v62  ;;  %v1067_v35 = vpop.xlane.xlu0 %1066 }
 0x24f   :  { %v1664_v2 = vpop.eup %1663  ;;  %v1101_v37 = vadd.f32 %v1067_v35, %v681_v13 }
 0x250   :  { %1313 = vst.msk [vmem:[%s2688_s3 + $0x40] sm:$0xff] %vm19_vm1, %v1285_v15  ;;  %v1242_v41 = vmul.f32 0.6931472, %v1664_v2  ;;  %v1216_v23 = vld [vmem:[#allocation3 + $0xb8] sm:$0xff]  ;;  %v1028_v6 = vpop.xlane.xlu2 %1027  ;;  %v1070_v29 = vpop.xlane.xlu1 %1069 }
 0x251   :  { %v1666_v16 = vpop.eup %1665  ;;  %1669 = vlog2.f32 %v1216_v23  ;;  %1130 = vst.msk [vmem:[#allocation3 + $0xc0] sm:$0xff] %vm19_vm1, %v1101_v37  ;;  %v1088_v50 = vadd.f32 %v1028_v6, %v668_v31  ;;  %v1102_v19 = vadd.f32 %v1070_v29, %v682_v28  ;;  %v1177_v28 = vld [vmem:[#allocation2 + $0x60] sm:$0xff] }
 0x252   :  { %v1287_v34 = vadd.f32 %v1242_v41, %v1175_v7  ;;  %v1240_v21 = vmul.f32 0.6931472, %v1666_v16  ;;  %v1206_v10 = vld [vmem:[#allocation3 + $0x68] sm:$0xff]  ;;  %v1668_v30 = vpop.eup %1667  ;;  %v1191_v41 = vld [vmem:[#allocation2 + $0xd0] sm:$0xff]  ;;  %v1192_v16 = vld [vmem:[#allocation2 + $0xd8] sm:$0xff] }
 0x253   :  { %1671 = vlog2.f32 %v1206_v10  ;;  %1117 = vst.msk [vmem:[#allocation3 + $0x58] sm:$0xff] %vm19_vm1, %v1088_v50  ;;  %v669_v9 = vmul.f32 %v1668_v30, %v557_v40 }
 0x254   :  { %1673 = vpow2.f32 %v653_v39  ;;  %1315 = vst.msk [vmem:[%s2688_s3 + $0x50] sm:$0xff] %vm19_vm1, %v1287_v34  ;;  %v1286_v36 = vadd.f32 %v1240_v21, %v1174_v12 }
 0x255   :  { %1131 = vst.msk [vmem:[#allocation3 + $0xc8] sm:$0xff] %vm19_vm1, %v1102_v19 }
 0x256   :  { %1314 = vst.msk [vmem:[%s2688_s3 + $0x48] sm:$0xff] %vm19_vm1, %v1286_v36 }
 0x257   :  { %v1670_v0 = vpop.eup %1669 }
 0x258   :  { %v1268_v22 = vmul.f32 0.6931472, %v1670_v0  ;;  %v1217_v52 = vld [vmem:[#allocation3 + $0xc0] sm:$0xff]  ;;  %v1031_v58 = vpop.xlane.xlu0 %1030 }
 0x259   :  { %v1672_v48 = vpop.eup %1671  ;;  %1675 = vlog2.f32 %v1217_v52  ;;  %v1089_v63 = vadd.f32 %v1031_v58, %v669_v9 }
 0x25a   :  { %v1674_v53 = vpop.eup %1673  ;;  %v1300_v60 = vadd.f32 %v1268_v22, %v1188_v17  ;;  %v1248_v55 = vmul.f32 0.6931472, %v1672_v48  ;;  %v1204_v51 = vld [vmem:[#allocation3 + $0x58] sm:$0xff] }
 0x25b   :  { %1677 = vlog2.f32 %v1204_v51  ;;  %1118 = vst.msk [vmem:[#allocation3 + $0x60] sm:$0xff] %vm19_vm1, %v1089_v63  ;;  %v683_v42 = vmul.f32 %v1674_v53, %v571_v18 }
 0x25c   :  { %1679 = vpow2.f32 %v655_v49  ;;  %1328 = vst.msk [vmem:[%s2688_s3 + $0xb8] sm:$0xff] %vm19_vm1, %v1300_v60  ;;  %v1290_v57 = vadd.f32 %v1248_v55, %v1178_v33  ;;  %v1218_v1 = vld [vmem:[#allocation3 + $0xc8] sm:$0xff] }
 0x25d   :  { %1681 = vlog2.f32 %v1218_v1 }
 0x25e   :  { %1318 = vst.msk [vmem:[%s2688_s3 + $0x68] sm:$0xff] %vm19_vm1, %v1290_v57  ;;  %v1073_v59 = vpop.xlane.xlu2 %1072 }
 0x25f   :  { %v1676_v25 = vpop.eup %1675  ;;  %v1103_v61 = vadd.f32 %v1073_v59, %v683_v42 }
 0x260   :  { %v1270_v11 = vmul.f32 0.6931472, %v1676_v25 }
 0x261   :  { %v1678_v38 = vpop.eup %1677  ;;  %1132 = vst.msk [vmem:[#allocation3 + $0xd0] sm:$0xff] %vm19_vm1, %v1103_v61 }
 0x262   :  { %v1680_v46 = vpop.eup %1679  ;;  %v1301_v3 = vadd.f32 %v1270_v11, %v1189_v27  ;;  %v1244_v47 = vmul.f32 0.6931472, %v1678_v38  ;;  %v1205_v54 = vld [vmem:[#allocation3 + $0x60] sm:$0xff] }
 0x263   :  { %v1682_v44 = vpop.eup %1681  ;;  %1683 = vlog2.f32 %v1205_v54  ;;  %v684_v62 = vmul.f32 %v1680_v46, %v572_v43 }
 0x264   :  { %1329 = vst.msk [vmem:[%s2688_s3 + $0xc0] sm:$0xff] %vm19_vm1, %v1301_v3  ;;  %v1288_v26 = vadd.f32 %v1244_v47, %v1176_v24  ;;  %v1272_v4 = vmul.f32 0.6931472, %v1682_v44 }
 0x266   :  { %1316 = vst.msk [vmem:[%s2688_s3 + $0x58] sm:$0xff] %vm19_vm1, %v1288_v26  ;;  %v1302_v13 = vadd.f32 %v1272_v4, %v1190_v45  ;;  %v1076_v15 = vpop.xlane.xlu0 %1075 }
 0x267   :  { %v1104_v35 = vadd.f32 %v1076_v15, %v684_v62 }
 0x268   :  { %1330 = vst.msk [vmem:[%s2688_s3 + $0xc8] sm:$0xff] %vm19_vm1, %v1302_v13  ;;  %v1219_v2 = vld [vmem:[#allocation3 + $0xd0] sm:$0xff] }
 0x269   :  { %v1684_v37 = vpop.eup %1683  ;;  %1685 = vlog2.f32 %v1219_v2  ;;  %1133 = vst.msk [vmem:[#allocation3 + $0xd8] sm:$0xff] %vm19_vm1, %v1104_v35 }
 0x26a   :  { %v1246_v31 = vmul.f32 0.6931472, %v1684_v37 }
 0x26c   :  { %v1289_v8 = vadd.f32 %v1246_v31, %v1177_v28 }
 0x26e   :  { %1317 = vst.msk [vmem:[%s2688_s3 + $0x60] sm:$0xff] %vm19_vm1, %v1289_v8 }
 0x26f   :  { %v1686_v14 = vpop.eup %1685 }
 0x270   :  { %v1274_v5 = vmul.f32 0.6931472, %v1686_v14  ;;  %v1220_v39 = vld [vmem:[#allocation3 + $0xd8] sm:$0xff] }
 0x271   :  { %1687 = vlog2.f32 %v1220_v39 }
 0x272   :  { %v1303_v23 = vadd.f32 %v1274_v5, %v1191_v41 }
 0x274   :  { %1331 = vst.msk [vmem:[%s2688_s3 + $0xd0] sm:$0xff] %vm19_vm1, %v1303_v23 }
 0x277   :  { %v1688_v6 = vpop.eup %1687 }
 0x278   :  { %v1276_v29 = vmul.f32 0.6931472, %v1688_v6 }
 0x27a   :  { %v1304_v7 = vadd.f32 %v1276_v29, %v1192_v16 }
 0x27c   :  { %1332 = vst.msk [vmem:[%s2688_s3 + $0xd8] sm:$0xff] %vm19_vm1, %v1304_v7 }

</bundles_post_ra>
